<compile_context>
chip_gen: v5e
topology: v5e:2x2
jax: 0.10.0
libtpu: 0.0.40
codegen_flags: <defaults>
</compile_context>

<pallas_src>
import jax
import jax.numpy as jnp
from jax import lax
from jax.experimental import pallas as pl
from jax.experimental.pallas import tpu as pltpu


# -----------------------------------------------------------------------------
# Kernel 1: length-masked LSTM recurrence over a (batch, time) grid.
# -----------------------------------------------------------------------------
def lstm_kernel(nt_ref,          # SMEM (1,) int32: number of valid T blocks
                len_ref,         # VMEM (B_blk, 1) int32
                emb_ref,         # VMEM (T_tile, B_blk, E)   matmul dtype
                w_ih_ref,        # VMEM (E, 4H)              matmul dtype
                w_hh_ref,        # VMEM (H, 4H)              matmul dtype
                b_ref,           # VMEM (1, 4H) f32 (= b_ih + b_hh)
                h_out_ref,       # VMEM (B_blk, H) f32: final hidden state
                xp_ref,          # scratch (T_tile, B_blk, 4H) f32
                h_ref, c_ref):   # scratch (B_blk, H) f32
    t_blk = pl.program_id(1)
    n_t = pl.num_programs(1)
    t_tile, b_blk, e = emb_ref.shape
    h_dim = w_hh_ref.shape[0]

    @pl.when(t_blk == 0)
    def _init():
        h_ref[...] = jnp.zeros_like(h_ref)
        c_ref[...] = jnp.zeros_like(c_ref)

    # Skip compute for T blocks entirely past max(lengths) (pure padding).
    @pl.when(t_blk < nt_ref[0])
    def _compute():
        lengths = len_ref[...]                                   # (B_blk, 1)
        w_hh = w_hh_ref[...]                                     # (H, 4H)

        # Hoisted input projection: one big matmul for the whole time tile,
        # bias folded in once per block (no per-step broadcast).
        x2d = emb_ref[...].reshape(t_tile * b_blk, e)
        xp = jnp.dot(x2d, w_ih_ref[...], preferred_element_type=jnp.float32)
        xp_ref[...] = (xp + b_ref[...]).reshape(t_tile, b_blk, 4 * h_dim)

        t0 = t_blk * t_tile

        def step(t, carry):
            h, c = carry
            gates = xp_ref[t] + jnp.dot(h.astype(w_hh.dtype), w_hh,
                                        preferred_element_type=jnp.float32)
            i_g = jax.nn.sigmoid(gates[:, 0 * h_dim:1 * h_dim])
            f_g = jax.nn.sigmoid(gates[:, 1 * h_dim:2 * h_dim])
            g_g = jnp.tanh(gates[:, 2 * h_dim:3 * h_dim])
            o_g = jax.nn.sigmoid(gates[:, 3 * h_dim:4 * h_dim])
            c_new = f_g * c + i_g * g_g
            h_new = o_g * jnp.tanh(c_new)
            # packed-sequence semantics: freeze state once t >= length
            mask = (t0 + t) < lengths                            # (B_blk, 1)
            return jnp.where(mask, h_new, h), jnp.where(mask, c_new, c)

        h, c = lax.fori_loop(0, t_tile, step, (h_ref[...], c_ref[...]),
                             unroll=True)
        h_ref[...] = h
        c_ref[...] = c

    @pl.when(t_blk == n_t - 1)
    def _finalize():
        h_out_ref[...] = h_ref[...]


# -----------------------------------------------------------------------------
# Kernel 2: final FC, tiled over (batch, vocab).
# -----------------------------------------------------------------------------
def fc_kernel(h_ref, w_fc_ref, b_fc_ref, out_ref):
    out_ref[...] = (
        jnp.dot(h_ref[...].astype(w_fc_ref.dtype), w_fc_ref[...],
                preferred_element_type=jnp.float32)
        + b_fc_ref[...])


# -----------------------------------------------------------------------------
# Wrapper
# -----------------------------------------------------------------------------
def ulysses_forward(x, lengths, params, *, t_tile=8, b_blk=16, v_blk=128,
                    matmul_dtype=jnp.bfloat16):
    """x: (B, T) int32 token ids, lengths: (B,) int32. Returns (B, vocab) f32."""
    B, T = x.shape
    E, G = params["w_ih"].shape              # G = 4*H
    H = params["w_hh"].shape[0]
    V = params["w_fc"].shape[1]

    t_tile = min(t_tile, T)
    b_blk = min(b_blk, B)
    v_blk = min(v_blk, V)
    sublane = 16 if jnp.dtype(matmul_dtype).itemsize == 2 else 8
    assert T % t_tile == 0 and B % b_blk == 0 and V % v_blk == 0
    assert b_blk % sublane == 0, "batch block must be sublane-tile aligned"
    assert H % 128 == 0 and v_blk % 128 == 0, "H / vocab tile must be lane aligned"

    md = matmul_dtype

    # Glue: embedding gather + time-major transpose in XLA.
    # TODO(synk): fuse the embedding gather into the kernel (scalar-prefetch
    # token ids + DMA row gather) to avoid materializing (T, B, E) in HBM.
    emb = params["embedding"].astype(md)[x]                    # (B, T, E)
    emb_tm = jnp.transpose(emb, (1, 0, 2))                     # (T, B, E)

    len2d = lengths.reshape(B, 1).astype(jnp.int32)
    max_len = jnp.max(lengths).astype(jnp.int32)
    nt_valid = jnp.reshape((max_len + t_tile - 1) // t_tile, (1,)).astype(jnp.int32)

    h_last = pl.pallas_call(
        lstm_kernel,
        out_shape=jax.ShapeDtypeStruct((B, H), jnp.float32),
        grid_spec=pltpu.PrefetchScalarGridSpec(
            num_scalar_prefetch=1,
            grid=(B // b_blk, T // t_tile),
            in_specs=[
                pl.BlockSpec((b_blk, 1), lambda b, t, nt: (b, 0)),
                pl.BlockSpec((t_tile, b_blk, E), lambda b, t, nt: (t, b, 0)),
                pl.BlockSpec((E, G), lambda b, t, nt: (0, 0)),
                pl.BlockSpec((H, G), lambda b, t, nt: (0, 0)),
                pl.BlockSpec((1, G), lambda b, t, nt: (0, 0)),
            ],
            out_specs=pl.BlockSpec((b_blk, H), lambda b, t, nt: (b, 0)),
            scratch_shapes=[
                pltpu.VMEM((t_tile, b_blk, G), jnp.float32),   # x-projection
                pltpu.VMEM((b_blk, H), jnp.float32),           # h carry
                pltpu.VMEM((b_blk, H), jnp.float32),           # c carry
            ],
        ),
        compiler_params=pltpu.CompilerParams(
            dimension_semantics=("parallel", "arbitrary"),
            vmem_limit_bytes=32 * 1024 * 1024,
        ),
    )(nt_valid, len2d, emb_tm,
      params["w_ih"].astype(md), params["w_hh"].astype(md),
      params["b"].astype(jnp.float32))

    out = pl.pallas_call(
        fc_kernel,
        out_shape=jax.ShapeDtypeStruct((B, V), jnp.float32),
        grid_spec=pltpu.PrefetchScalarGridSpec(
            num_scalar_prefetch=0,
            grid=(B // b_blk, V // v_blk),
            in_specs=[
                pl.BlockSpec((b_blk, H), lambda b, v: (b, 0)),
                pl.BlockSpec((H, v_blk), lambda b, v: (0, v)),
                pl.BlockSpec((1, v_blk), lambda b, v: (0, v)),
            ],
            out_specs=pl.BlockSpec((b_blk, v_blk), lambda b, v: (b, v)),
        ),
        compiler_params=pltpu.CompilerParams(
            dimension_semantics=("parallel", "parallel"),
            vmem_limit_bytes=32 * 1024 * 1024,
        ),
    )(h_last, params["w_fc"].astype(md), params["b_fc"].astype(jnp.float32))

    return out


# -----------------------------------------------------------------------------
# Parameters / reference
# -----------------------------------------------------------------------------
def init_params(key, vocab_size, emb_dim, hidden_dim):
    ks = jax.random.split(key, 6)
    scale = 0.1
    embedding = scale * jax.random.normal(ks[0], (vocab_size, emb_dim), jnp.float32)
    embedding = embedding.at[0].set(0.0)                       # padding_idx=0
    w_ih = scale * jax.random.normal(ks[1], (emb_dim, 4 * hidden_dim), jnp.float32)
    w_hh = scale * jax.random.normal(ks[2], (hidden_dim, 4 * hidden_dim), jnp.float32)
    b_ih = scale * jax.random.normal(ks[3], (1, 4 * hidden_dim), jnp.float32)
    b_hh = scale * jax.random.normal(ks[4], (1, 4 * hidden_dim), jnp.float32)
    w_fc = scale * jax.random.normal(ks[5], (hidden_dim, vocab_size), jnp.float32)
    b_fc = jnp.zeros((1, vocab_size), jnp.float32)
    return {
        "embedding": embedding,
        "w_ih": w_ih,
        "w_hh": w_hh,
        "b": b_ih + b_hh,
        "w_fc": w_fc,
        "b_fc": b_fc,
    }


def reference_forward(x, lengths, params, matmul_dtype=jnp.bfloat16):
    """Pure-JAX reference with the same semantics and dtype policy."""
    B, T = x.shape
    H = params["w_hh"].shape[0]
    md = matmul_dtype
    emb = params["embedding"].astype(md)[x]                    # (B, T, E)
    w_ih = params["w_ih"].astype(md)
    w_hh = params["w_hh"].astype(md)
    b = params["b"].astype(jnp.float32)
    h = jnp.zeros((B, H), jnp.float32)
    c = jnp.zeros((B, H), jnp.float32)
    for t in range(T):
        gates = (jnp.dot(emb[:, t, :], w_ih, preferred_element_type=jnp.float32)
                 + jnp.dot(h.astype(md), w_hh, preferred_element_type=jnp.float32)
                 + b)
        i_g = jax.nn.sigmoid(gates[:, 0 * H:1 * H])
        f_g = jax.nn.sigmoid(gates[:, 1 * H:2 * H])
        g_g = jnp.tanh(gates[:, 2 * H:3 * H])
        o_g = jax.nn.sigmoid(gates[:, 3 * H:4 * H])
        c_new = f_g * c + i_g * g_g
        h_new = o_g * jnp.tanh(c_new)
        mask = (t < lengths)[:, None]
        h = jnp.where(mask, h_new, h)
        c = jnp.where(mask, c_new, c)
    return (jnp.dot(h.astype(md), params["w_fc"].astype(md),
                    preferred_element_type=jnp.float32)
            + params["b_fc"].astype(jnp.float32))


if __name__ == "__main__":
    # Small but TPU-aligned shapes: B multiple of 16 (bf16 sublane tile),
    # H multiple of 128 (lane-aligned gate slices), V multiple of 128.
    vocab_size, emb_dim, hidden_dim = 256, 128, 128
    B, T = 32, 16

    key = jax.random.PRNGKey(0)
    k_tok, k_len, k_param = jax.random.split(key, 3)

    lengths = jax.random.randint(k_len, (B,), 1, T + 1).astype(jnp.int32)
    tokens = jax.random.randint(k_tok, (B, T), 1, vocab_size).astype(jnp.int32)
    # zero-pad beyond each sequence's length (padding token id = 0)
    pos = jnp.arange(T)[None, :]
    x = jnp.where(pos < lengths[:, None], tokens, 0)

    params = init_params(k_param, vocab_size, emb_dim, hidden_dim)

    out = ulysses_forward(x, lengths, params)
    out = jax.block_until_ready(out)

    ref = reference_forward(x, lengths, params)
    assert out.shape == (B, vocab_size)
    assert jnp.allclose(out, ref, atol=2e-2, rtol=2e-2), \
        float(jnp.max(jnp.abs(out - ref)))

    print("KERNEL_OK")
</pallas_src>

<mosaic_0001>
module attributes {stable_mosaic.version = 11 : i64} {
  func.func @lstm_kernel(%arg0: i32, %arg1: i32, %arg2: memref<1xi32, #tpu.memory_space<smem>>, %arg3: memref<16x1xi32, #tpu.memory_space<vmem>>, %arg4: memref<8x16x128xbf16, #tpu.memory_space<vmem>>, %arg5: memref<128x512xbf16, #tpu.memory_space<vmem>>, %arg6: memref<128x512xbf16, #tpu.memory_space<vmem>>, %arg7: memref<1x512xf32, #tpu.memory_space<vmem>>, %arg8: memref<16x128xf32, #tpu.memory_space<vmem>>, %arg9: memref<8x16x512xf32, #tpu.memory_space<vmem>>, %arg10: memref<16x128xf32, #tpu.memory_space<vmem>>, %arg11: memref<16x128xf32, #tpu.memory_space<vmem>>) attributes {dimension_semantics = [#tpu.dimension_semantics<parallel>, #tpu.dimension_semantics<arbitrary>], iteration_bounds = array<i64: 2, 2>, scalar_prefetch = 1 : i64, scratch_operands = 3 : i64, tpu.core_type = #tpu.core_type<tc>, window_params = [{transform_indices = @transform_0, window_bounds = array<i64: 16, 1>}, {transform_indices = @transform_1, window_bounds = array<i64: 8, 16, 128>}, {pipeline_mode = #tpu.pipeline_mode<synchronous>, transform_indices = @transform_2, window_bounds = array<i64: 128, 512>}, {pipeline_mode = #tpu.pipeline_mode<synchronous>, transform_indices = @transform_3, window_bounds = array<i64: 128, 512>}, {pipeline_mode = #tpu.pipeline_mode<synchronous>, transform_indices = @transform_4, window_bounds = array<i64: 1, 512>}, {transform_indices = @transform_5, window_bounds = array<i64: 16, 128>}]} {
    %c0_i32 = arith.constant 0 : i32
    %0 = arith.cmpi eq, %arg1, %c0_i32 : i32
    %1 = arith.extui %0 : i1 to i32
    %c0_i32_0 = arith.constant 0 : i32
    %2 = arith.cmpi ne, %1, %c0_i32_0 : i32
    scf.if %2 {
      %cst = arith.constant 0.000000e+00 : f32
      %10 = vector.broadcast %cst : f32 to vector<16x128xf32>
      %c0_3 = arith.constant 0 : index
      %c0_4 = arith.constant 0 : index
      %11 = vector.load %arg10[%c0_3, %c0_4] : memref<16x128xf32, #tpu.memory_space<vmem>>, vector<16x128xf32>
      tpu.vector_store %arg10[%c0_3, %c0_4], %10 {strides = array<i32>} : memref<16x128xf32, #tpu.memory_space<vmem>>, vector<16x128xf32>,
      %cst_5 = arith.constant 0.000000e+00 : f32
      %12 = vector.broadcast %cst_5 : f32 to vector<16x128xf32>
      %c0_6 = arith.constant 0 : index
      %c0_7 = arith.constant 0 : index
      %13 = vector.load %arg11[%c0_6, %c0_7] : memref<16x128xf32, #tpu.memory_space<vmem>>, vector<16x128xf32>
      tpu.vector_store %arg11[%c0_6, %c0_7], %12 {strides = array<i32>} : memref<16x128xf32, #tpu.memory_space<vmem>>, vector<16x128xf32>,
    } else {
    }
    %c0 = arith.constant 0 : index
    %3 = memref.load %arg2[%c0] : memref<1xi32, #tpu.memory_space<smem>>
    %4 = arith.cmpi slt, %arg1, %3 : i32
    %5 = arith.extui %4 : i1 to i32
    %c0_i32_1 = arith.constant 0 : i32
    %6 = arith.cmpi ne, %5, %c0_i32_1 : i32
    scf.if %6 {
      %c0_3 = arith.constant 0 : index
      %c0_4 = arith.constant 0 : index
      %10 = vector.load %arg3[%c0_3, %c0_4] : memref<16x1xi32, #tpu.memory_space<vmem>>, vector<16x1xi32>
      %c0_5 = arith.constant 0 : index
      %c0_6 = arith.constant 0 : index
      %11 = vector.load %arg6[%c0_5, %c0_6] : memref<128x512xbf16, #tpu.memory_space<vmem>>, vector<128x512xbf16>
      %c0_7 = arith.constant 0 : index
      %c0_8 = arith.constant 0 : index
      %c0_9 = arith.constant 0 : index
      %12 = vector.load %arg4[%c0_7, %c0_8, %c0_9] : memref<8x16x128xbf16, #tpu.memory_space<vmem>>, vector<8x16x128xbf16>
      %13 = vector.shape_cast %12 : vector<8x16x128xbf16> to vector<128x128xbf16>
      %c0_10 = arith.constant 0 : index
      %c0_11 = arith.constant 0 : index
      %14 = vector.load %arg5[%c0_10, %c0_11] : memref<128x512xbf16, #tpu.memory_space<vmem>>, vector<128x512xbf16>
      %cst = arith.constant dense<0.000000e+00> : vector<128x512xf32>
      %15 = tpu.matmul %13, %14, %cst {dimension_numbers = #tpu.dot_dimension_numbers<[1], [0], [0], [1], [0, 0, 1, 1], [], []>} : vector<128x128xbf16>, vector<128x512xbf16>, vector<128x512xf32> -> vector<128x512xf32>
      %c0_12 = arith.constant 0 : index
      %c0_13 = arith.constant 0 : index
      %16 = vector.load %arg7[%c0_12, %c0_13] : memref<1x512xf32, #tpu.memory_space<vmem>>, vector<1x512xf32>
      %17 = vector.broadcast %16 : vector<1x512xf32> to vector<128x512xf32>
      %18 = arith.addf %15, %17 : vector<128x512xf32>
      %19 = vector.shape_cast %18 : vector<128x512xf32> to vector<8x16x512xf32>
      %c0_14 = arith.constant 0 : index
      %c0_15 = arith.constant 0 : index
      %c0_16 = arith.constant 0 : index
      %20 = vector.load %arg9[%c0_14, %c0_15, %c0_16] : memref<8x16x512xf32, #tpu.memory_space<vmem>>, vector<8x16x512xf32>
      tpu.vector_store %arg9[%c0_14, %c0_15, %c0_16], %19 {strides = array<i32>} : memref<8x16x512xf32, #tpu.memory_space<vmem>>, vector<8x16x512xf32>,
      %c8_i32 = arith.constant 8 : i32
      %21 = arith.muli %arg1, %c8_i32 : i32
      %c0_17 = arith.constant 0 : index
      %c0_18 = arith.constant 0 : index
      %22 = vector.load %arg10[%c0_17, %c0_18] : memref<16x128xf32, #tpu.memory_space<vmem>>, vector<16x128xf32>
      %c0_19 = arith.constant 0 : index
      %c0_20 = arith.constant 0 : index
      %23 = vector.load %arg11[%c0_19, %c0_20] : memref<16x128xf32, #tpu.memory_space<vmem>>, vector<16x128xf32>
      %c0_i32_21 = arith.constant 0 : i32
      %24 = arith.index_cast %c0_i32_21 : i32 to index
      %c0_22 = arith.constant 0 : index
      %c0_23 = arith.constant 0 : index
      %25 = vector.load %arg9[%24, %c0_22, %c0_23] : memref<8x16x512xf32, #tpu.memory_space<vmem>>, vector<1x16x512xf32>
      %26 = vector.shape_cast %25 : vector<1x16x512xf32> to vector<16x512xf32>
      %27 = arith.truncf %22 : vector<16x128xf32> to vector<16x128xbf16>
      %cst_24 = arith.constant dense<0.000000e+00> : vector<16x512xf32>
      %28 = tpu.matmul %27, %11, %cst_24 {dimension_numbers = #tpu.dot_dimension_numbers<[1], [0], [0], [1], [0, 0, 1, 1], [], []>} : vector<16x128xbf16>, vector<128x512xbf16>, vector<16x512xf32> -> vector<16x512xf32>
      %29 = arith.addf %26, %28 : vector<16x512xf32>
      %30 = vector.extract_strided_slice %29 {offsets = [0, 0], sizes = [16, 128], strides = [1, 1]} : vector<16x512xf32> to vector<16x128xf32>
      %31 = arith.negf %30 : vector<16x128xf32>
      %32 = math.exp %31 : vector<16x128xf32>
      %cst_25 = arith.constant 1.000000e+00 : f32
      %33 = vector.broadcast %cst_25 : f32 to vector<16x128xf32>
      %34 = arith.addf %33, %32 : vector<16x128xf32>
      %35 = arith.divf %33, %34 : vector<16x128xf32>
      %36 = vector.extract_strided_slice %29 {offsets = [0, 128], sizes = [16, 128], strides = [1, 1]} : vector<16x512xf32> to vector<16x128xf32>
      %37 = arith.negf %36 : vector<16x128xf32>
      %38 = math.exp %37 : vector<16x128xf32>
      %cst_26 = arith.constant 1.000000e+00 : f32
      %39 = vector.broadcast %cst_26 : f32 to vector<16x128xf32>
      %40 = arith.addf %39, %38 : vector<16x128xf32>
      %41 = arith.divf %39, %40 : vector<16x128xf32>
      %42 = vector.extract_strided_slice %29 {offsets = [0, 256], sizes = [16, 128], strides = [1, 1]} : vector<16x512xf32> to vector<16x128xf32>
      %43 = math.tanh %42 : vector<16x128xf32>
      %44 = vector.extract_strided_slice %29 {offsets = [0, 384], sizes = [16, 128], strides = [1, 1]} : vector<16x512xf32> to vector<16x128xf32>
      %45 = arith.negf %44 : vector<16x128xf32>
      %46 = math.exp %45 : vector<16x128xf32>
      %cst_27 = arith.constant 1.000000e+00 : f32
      %47 = vector.broadcast %cst_27 : f32 to vector<16x128xf32>
      %48 = arith.addf %47, %46 : vector<16x128xf32>
      %49 = arith.divf %47, %48 : vector<16x128xf32>
      %50 = arith.mulf %41, %23 : vector<16x128xf32>
      %51 = arith.mulf %35, %43 : vector<16x128xf32>
      %52 = arith.addf %50, %51 : vector<16x128xf32>
      %53 = math.tanh %52 : vector<16x128xf32>
      %54 = arith.mulf %49, %53 : vector<16x128xf32>
      %55 = arith.addi %21, %c0_i32_21 : i32
      %56 = vector.broadcast %55 : i32 to vector<16x1xi32>
      %57 = arith.cmpi slt, %56, %10 : vector<16x1xi32>
      %58 = vector.shape_cast %57 : vector<16x1xi1> to vector<16x1xi1>
      %59 = vector.broadcast %58 : vector<16x1xi1> to vector<16x128xi1>
      %60 = arith.select %59, %54, %22 : vector<16x128xi1>, vector<16x128xf32>
      %61 = vector.shape_cast %57 : vector<16x1xi1> to vector<16x1xi1>
      %62 = vector.broadcast %61 : vector<16x1xi1> to vector<16x128xi1>
      %63 = arith.select %62, %52, %23 : vector<16x128xi1>, vector<16x128xf32>
      %c1_i32_28 = arith.constant 1 : i32
      %64 = arith.index_cast %c1_i32_28 : i32 to index
      %c0_29 = arith.constant 0 : index
      %c0_30 = arith.constant 0 : index
      %65 = vector.load %arg9[%64, %c0_29, %c0_30] : memref<8x16x512xf32, #tpu.memory_space<vmem>>, vector<1x16x512xf32>
      %66 = vector.shape_cast %65 : vector<1x16x512xf32> to vector<16x512xf32>
      %67 = arith.truncf %60 : vector<16x128xf32> to vector<16x128xbf16>
      %cst_31 = arith.constant dense<0.000000e+00> : vector<16x512xf32>
      %68 = tpu.matmul %67, %11, %cst_31 {dimension_numbers = #tpu.dot_dimension_numbers<[1], [0], [0], [1], [0, 0, 1, 1], [], []>} : vector<16x128xbf16>, vector<128x512xbf16>, vector<16x512xf32> -> vector<16x512xf32>
      %69 = arith.addf %66, %68 : vector<16x512xf32>
      %70 = vector.extract_strided_slice %69 {offsets = [0, 0], sizes = [16, 128], strides = [1, 1]} : vector<16x512xf32> to vector<16x128xf32>
      %71 = arith.negf %70 : vector<16x128xf32>
      %72 = math.exp %71 : vector<16x128xf32>
      %cst_32 = arith.constant 1.000000e+00 : f32
      %73 = vector.broadcast %cst_32 : f32 to vector<16x128xf32>
      %74 = arith.addf %73, %72 : vector<16x128xf32>
      %75 = arith.divf %73, %74 : vector<16x128xf32>
      %76 = vector.extract_strided_slice %69 {offsets = [0, 128], sizes = [16, 128], strides = [1, 1]} : vector<16x512xf32> to vector<16x128xf32>
      %77 = arith.negf %76 : vector<16x128xf32>
      %78 = math.exp %77 : vector<16x128xf32>
      %cst_33 = arith.constant 1.000000e+00 : f32
      %79 = vector.broadcast %cst_33 : f32 to vector<16x128xf32>
      %80 = arith.addf %79, %78 : vector<16x128xf32>
      %81 = arith.divf %79, %80 : vector<16x128xf32>
      %82 = vector.extract_strided_slice %69 {offsets = [0, 256], sizes = [16, 128], strides = [1, 1]} : vector<16x512xf32> to vector<16x128xf32>
      %83 = math.tanh %82 : vector<16x128xf32>
      %84 = vector.extract_strided_slice %69 {offsets = [0, 384], sizes = [16, 128], strides = [1, 1]} : vector<16x512xf32> to vector<16x128xf32>
      %85 = arith.negf %84 : vector<16x128xf32>
      %86 = math.exp %85 : vector<16x128xf32>
      %cst_34 = arith.constant 1.000000e+00 : f32
      %87 = vector.broadcast %cst_34 : f32 to vector<16x128xf32>
      %88 = arith.addf %87, %86 : vector<16x128xf32>
      %89 = arith.divf %87, %88 : vector<16x128xf32>
      %90 = arith.mulf %81, %63 : vector<16x128xf32>
      %91 = arith.mulf %75, %83 : vector<16x128xf32>
      %92 = arith.addf %90, %91 : vector<16x128xf32>
      %93 = math.tanh %92 : vector<16x128xf32>
      %94 = arith.mulf %89, %93 : vector<16x128xf32>
      %95 = arith.addi %21, %c1_i32_28 : i32
      %96 = vector.broadcast %95 : i32 to vector<16x1xi32>
      %97 = arith.cmpi slt, %96, %10 : vector<16x1xi32>
      %98 = vector.shape_cast %97 : vector<16x1xi1> to vector<16x1xi1>
      %99 = vector.broadcast %98 : vector<16x1xi1> to vector<16x128xi1>
      %100 = arith.select %99, %94, %60 : vector<16x128xi1>, vector<16x128xf32>
      %101 = vector.shape_cast %97 : vector<16x1xi1> to vector<16x1xi1>
      %102 = vector.broadcast %101 : vector<16x1xi1> to vector<16x128xi1>
      %103 = arith.select %102, %92, %63 : vector<16x128xi1>, vector<16x128xf32>
      %c2_i32 = arith.constant 2 : i32
      %104 = arith.index_cast %c2_i32 : i32 to index
      %c0_35 = arith.constant 0 : index
      %c0_36 = arith.constant 0 : index
      %105 = vector.load %arg9[%104, %c0_35, %c0_36] : memref<8x16x512xf32, #tpu.memory_space<vmem>>, vector<1x16x512xf32>
      %106 = vector.shape_cast %105 : vector<1x16x512xf32> to vector<16x512xf32>
      %107 = arith.truncf %100 : vector<16x128xf32> to vector<16x128xbf16>
      %cst_37 = arith.constant dense<0.000000e+00> : vector<16x512xf32>
      %108 = tpu.matmul %107, %11, %cst_37 {dimension_numbers = #tpu.dot_dimension_numbers<[1], [0], [0], [1], [0, 0, 1, 1], [], []>} : vector<16x128xbf16>, vector<128x512xbf16>, vector<16x512xf32> -> vector<16x512xf32>
      %109 = arith.addf %106, %108 : vector<16x512xf32>
      %110 = vector.extract_strided_slice %109 {offsets = [0, 0], sizes = [16, 128], strides = [1, 1]} : vector<16x512xf32> to vector<16x128xf32>
      %111 = arith.negf %110 : vector<16x128xf32>
      %112 = math.exp %111 : vector<16x128xf32>
      %cst_38 = arith.constant 1.000000e+00 : f32
      %113 = vector.broadcast %cst_38 : f32 to vector<16x128xf32>
      %114 = arith.addf %113, %112 : vector<16x128xf32>
      %115 = arith.divf %113, %114 : vector<16x128xf32>
      %116 = vector.extract_strided_slice %109 {offsets = [0, 128], sizes = [16, 128], strides = [1, 1]} : vector<16x512xf32> to vector<16x128xf32>
      %117 = arith.negf %116 : vector<16x128xf32>
      %118 = math.exp %117 : vector<16x128xf32>
      %cst_39 = arith.constant 1.000000e+00 : f32
      %119 = vector.broadcast %cst_39 : f32 to vector<16x128xf32>
      %120 = arith.addf %119, %118 : vector<16x128xf32>
      %121 = arith.divf %119, %120 : vector<16x128xf32>
      %122 = vector.extract_strided_slice %109 {offsets = [0, 256], sizes = [16, 128], strides = [1, 1]} : vector<16x512xf32> to vector<16x128xf32>
      %123 = math.tanh %122 : vector<16x128xf32>
      %124 = vector.extract_strided_slice %109 {offsets = [0, 384], sizes = [16, 128], strides = [1, 1]} : vector<16x512xf32> to vector<16x128xf32>
      %125 = arith.negf %124 : vector<16x128xf32>
      %126 = math.exp %125 : vector<16x128xf32>
      %cst_40 = arith.constant 1.000000e+00 : f32
      %127 = vector.broadcast %cst_40 : f32 to vector<16x128xf32>
      %128 = arith.addf %127, %126 : vector<16x128xf32>
      %129 = arith.divf %127, %128 : vector<16x128xf32>
      %130 = arith.mulf %121, %103 : vector<16x128xf32>
      %131 = arith.mulf %115, %123 : vector<16x128xf32>
      %132 = arith.addf %130, %131 : vector<16x128xf32>
      %133 = math.tanh %132 : vector<16x128xf32>
      %134 = arith.mulf %129, %133 : vector<16x128xf32>
      %135 = arith.addi %21, %c2_i32 : i32
      %136 = vector.broadcast %135 : i32 to vector<16x1xi32>
      %137 = arith.cmpi slt, %136, %10 : vector<16x1xi32>
      %138 = vector.shape_cast %137 : vector<16x1xi1> to vector<16x1xi1>
      %139 = vector.broadcast %138 : vector<16x1xi1> to vector<16x128xi1>
      %140 = arith.select %139, %134, %100 : vector<16x128xi1>, vector<16x128xf32>
      %141 = vector.shape_cast %137 : vector<16x1xi1> to vector<16x1xi1>
      %142 = vector.broadcast %141 : vector<16x1xi1> to vector<16x128xi1>
      %143 = arith.select %142, %132, %103 : vector<16x128xi1>, vector<16x128xf32>
      %c3_i32 = arith.constant 3 : i32
      %144 = arith.index_cast %c3_i32 : i32 to index
      %c0_41 = arith.constant 0 : index
      %c0_42 = arith.constant 0 : index
      %145 = vector.load %arg9[%144, %c0_41, %c0_42] : memref<8x16x512xf32, #tpu.memory_space<vmem>>, vector<1x16x512xf32>
      %146 = vector.shape_cast %145 : vector<1x16x512xf32> to vector<16x512xf32>
      %147 = arith.truncf %140 : vector<16x128xf32> to vector<16x128xbf16>
      %cst_43 = arith.constant dense<0.000000e+00> : vector<16x512xf32>
      %148 = tpu.matmul %147, %11, %cst_43 {dimension_numbers = #tpu.dot_dimension_numbers<[1], [0], [0], [1], [0, 0, 1, 1], [], []>} : vector<16x128xbf16>, vector<128x512xbf16>, vector<16x512xf32> -> vector<16x512xf32>
      %149 = arith.addf %146, %148 : vector<16x512xf32>
      %150 = vector.extract_strided_slice %149 {offsets = [0, 0], sizes = [16, 128], strides = [1, 1]} : vector<16x512xf32> to vector<16x128xf32>
      %151 = arith.negf %150 : vector<16x128xf32>
      %152 = math.exp %151 : vector<16x128xf32>
      %cst_44 = arith.constant 1.000000e+00 : f32
      %153 = vector.broadcast %cst_44 : f32 to vector<16x128xf32>
      %154 = arith.addf %153, %152 : vector<16x128xf32>
      %155 = arith.divf %153, %154 : vector<16x128xf32>
      %156 = vector.extract_strided_slice %149 {offsets = [0, 128], sizes = [16, 128], strides = [1, 1]} : vector<16x512xf32> to vector<16x128xf32>
      %157 = arith.negf %156 : vector<16x128xf32>
      %158 = math.exp %157 : vector<16x128xf32>
      %cst_45 = arith.constant 1.000000e+00 : f32
      %159 = vector.broadcast %cst_45 : f32 to vector<16x128xf32>
      %160 = arith.addf %159, %158 : vector<16x128xf32>
      %161 = arith.divf %159, %160 : vector<16x128xf32>
      %162 = vector.extract_strided_slice %149 {offsets = [0, 256], sizes = [16, 128], strides = [1, 1]} : vector<16x512xf32> to vector<16x128xf32>
      %163 = math.tanh %162 : vector<16x128xf32>
      %164 = vector.extract_strided_slice %149 {offsets = [0, 384], sizes = [16, 128], strides = [1, 1]} : vector<16x512xf32> to vector<16x128xf32>
      %165 = arith.negf %164 : vector<16x128xf32>
      %166 = math.exp %165 : vector<16x128xf32>
      %cst_46 = arith.constant 1.000000e+00 : f32
      %167 = vector.broadcast %cst_46 : f32 to vector<16x128xf32>
      %168 = arith.addf %167, %166 : vector<16x128xf32>
      %169 = arith.divf %167, %168 : vector<16x128xf32>
      %170 = arith.mulf %161, %143 : vector<16x128xf32>
      %171 = arith.mulf %155, %163 : vector<16x128xf32>
      %172 = arith.addf %170, %171 : vector<16x128xf32>
      %173 = math.tanh %172 : vector<16x128xf32>
      %174 = arith.mulf %169, %173 : vector<16x128xf32>
      %175 = arith.addi %21, %c3_i32 : i32
      %176 = vector.broadcast %175 : i32 to vector<16x1xi32>
      %177 = arith.cmpi slt, %176, %10 : vector<16x1xi32>
      %178 = vector.shape_cast %177 : vector<16x1xi1> to vector<16x1xi1>
      %179 = vector.broadcast %178 : vector<16x1xi1> to vector<16x128xi1>
      %180 = arith.select %179, %174, %140 : vector<16x128xi1>, vector<16x128xf32>
      %181 = vector.shape_cast %177 : vector<16x1xi1> to vector<16x1xi1>
      %182 = vector.broadcast %181 : vector<16x1xi1> to vector<16x128xi1>
      %183 = arith.select %182, %172, %143 : vector<16x128xi1>, vector<16x128xf32>
      %c4_i32 = arith.constant 4 : i32
      %184 = arith.index_cast %c4_i32 : i32 to index
      %c0_47 = arith.constant 0 : index
      %c0_48 = arith.constant 0 : index
      %185 = vector.load %arg9[%184, %c0_47, %c0_48] : memref<8x16x512xf32, #tpu.memory_space<vmem>>, vector<1x16x512xf32>
      %186 = vector.shape_cast %185 : vector<1x16x512xf32> to vector<16x512xf32>
      %187 = arith.truncf %180 : vector<16x128xf32> to vector<16x128xbf16>
      %cst_49 = arith.constant dense<0.000000e+00> : vector<16x512xf32>
      %188 = tpu.matmul %187, %11, %cst_49 {dimension_numbers = #tpu.dot_dimension_numbers<[1], [0], [0], [1], [0, 0, 1, 1], [], []>} : vector<16x128xbf16>, vector<128x512xbf16>, vector<16x512xf32> -> vector<16x512xf32>
      %189 = arith.addf %186, %188 : vector<16x512xf32>
      %190 = vector.extract_strided_slice %189 {offsets = [0, 0], sizes = [16, 128], strides = [1, 1]} : vector<16x512xf32> to vector<16x128xf32>
      %191 = arith.negf %190 : vector<16x128xf32>
      %192 = math.exp %191 : vector<16x128xf32>
      %cst_50 = arith.constant 1.000000e+00 : f32
      %193 = vector.broadcast %cst_50 : f32 to vector<16x128xf32>
      %194 = arith.addf %193, %192 : vector<16x128xf32>
      %195 = arith.divf %193, %194 : vector<16x128xf32>
      %196 = vector.extract_strided_slice %189 {offsets = [0, 128], sizes = [16, 128], strides = [1, 1]} : vector<16x512xf32> to vector<16x128xf32>
      %197 = arith.negf %196 : vector<16x128xf32>
      %198 = math.exp %197 : vector<16x128xf32>
      %cst_51 = arith.constant 1.000000e+00 : f32
      %199 = vector.broadcast %cst_51 : f32 to vector<16x128xf32>
      %200 = arith.addf %199, %198 : vector<16x128xf32>
      %201 = arith.divf %199, %200 : vector<16x128xf32>
      %202 = vector.extract_strided_slice %189 {offsets = [0, 256], sizes = [16, 128], strides = [1, 1]} : vector<16x512xf32> to vector<16x128xf32>
      %203 = math.tanh %202 : vector<16x128xf32>
      %204 = vector.extract_strided_slice %189 {offsets = [0, 384], sizes = [16, 128], strides = [1, 1]} : vector<16x512xf32> to vector<16x128xf32>
      %205 = arith.negf %204 : vector<16x128xf32>
      %206 = math.exp %205 : vector<16x128xf32>
      %cst_52 = arith.constant 1.000000e+00 : f32
      %207 = vector.broadcast %cst_52 : f32 to vector<16x128xf32>
      %208 = arith.addf %207, %206 : vector<16x128xf32>
      %209 = arith.divf %207, %208 : vector<16x128xf32>
      %210 = arith.mulf %201, %183 : vector<16x128xf32>
      %211 = arith.mulf %195, %203 : vector<16x128xf32>
      %212 = arith.addf %210, %211 : vector<16x128xf32>
      %213 = math.tanh %212 : vector<16x128xf32>
      %214 = arith.mulf %209, %213 : vector<16x128xf32>
      %215 = arith.addi %21, %c4_i32 : i32
      %216 = vector.broadcast %215 : i32 to vector<16x1xi32>
      %217 = arith.cmpi slt, %216, %10 : vector<16x1xi32>
      %218 = vector.shape_cast %217 : vector<16x1xi1> to vector<16x1xi1>
      %219 = vector.broadcast %218 : vector<16x1xi1> to vector<16x128xi1>
      %220 = arith.select %219, %214, %180 : vector<16x128xi1>, vector<16x128xf32>
      %221 = vector.shape_cast %217 : vector<16x1xi1> to vector<16x1xi1>
      %222 = vector.broadcast %221 : vector<16x1xi1> to vector<16x128xi1>
      %223 = arith.select %222, %212, %183 : vector<16x128xi1>, vector<16x128xf32>
      %c5_i32 = arith.constant 5 : i32
      %224 = arith.index_cast %c5_i32 : i32 to index
      %c0_53 = arith.constant 0 : index
      %c0_54 = arith.constant 0 : index
      %225 = vector.load %arg9[%224, %c0_53, %c0_54] : memref<8x16x512xf32, #tpu.memory_space<vmem>>, vector<1x16x512xf32>
      %226 = vector.shape_cast %225 : vector<1x16x512xf32> to vector<16x512xf32>
      %227 = arith.truncf %220 : vector<16x128xf32> to vector<16x128xbf16>
      %cst_55 = arith.constant dense<0.000000e+00> : vector<16x512xf32>
      %228 = tpu.matmul %227, %11, %cst_55 {dimension_numbers = #tpu.dot_dimension_numbers<[1], [0], [0], [1], [0, 0, 1, 1], [], []>} : vector<16x128xbf16>, vector<128x512xbf16>, vector<16x512xf32> -> vector<16x512xf32>
      %229 = arith.addf %226, %228 : vector<16x512xf32>
      %230 = vector.extract_strided_slice %229 {offsets = [0, 0], sizes = [16, 128], strides = [1, 1]} : vector<16x512xf32> to vector<16x128xf32>
      %231 = arith.negf %230 : vector<16x128xf32>
      %232 = math.exp %231 : vector<16x128xf32>
      %cst_56 = arith.constant 1.000000e+00 : f32
      %233 = vector.broadcast %cst_56 : f32 to vector<16x128xf32>
      %234 = arith.addf %233, %232 : vector<16x128xf32>
      %235 = arith.divf %233, %234 : vector<16x128xf32>
      %236 = vector.extract_strided_slice %229 {offsets = [0, 128], sizes = [16, 128], strides = [1, 1]} : vector<16x512xf32> to vector<16x128xf32>
      %237 = arith.negf %236 : vector<16x128xf32>
      %238 = math.exp %237 : vector<16x128xf32>
      %cst_57 = arith.constant 1.000000e+00 : f32
      %239 = vector.broadcast %cst_57 : f32 to vector<16x128xf32>
      %240 = arith.addf %239, %238 : vector<16x128xf32>
      %241 = arith.divf %239, %240 : vector<16x128xf32>
      %242 = vector.extract_strided_slice %229 {offsets = [0, 256], sizes = [16, 128], strides = [1, 1]} : vector<16x512xf32> to vector<16x128xf32>
      %243 = math.tanh %242 : vector<16x128xf32>
      %244 = vector.extract_strided_slice %229 {offsets = [0, 384], sizes = [16, 128], strides = [1, 1]} : vector<16x512xf32> to vector<16x128xf32>
      %245 = arith.negf %244 : vector<16x128xf32>
      %246 = math.exp %245 : vector<16x128xf32>
      %cst_58 = arith.constant 1.000000e+00 : f32
      %247 = vector.broadcast %cst_58 : f32 to vector<16x128xf32>
      %248 = arith.addf %247, %246 : vector<16x128xf32>
      %249 = arith.divf %247, %248 : vector<16x128xf32>
      %250 = arith.mulf %241, %223 : vector<16x128xf32>
      %251 = arith.mulf %235, %243 : vector<16x128xf32>
      %252 = arith.addf %250, %251 : vector<16x128xf32>
      %253 = math.tanh %252 : vector<16x128xf32>
      %254 = arith.mulf %249, %253 : vector<16x128xf32>
      %255 = arith.addi %21, %c5_i32 : i32
      %256 = vector.broadcast %255 : i32 to vector<16x1xi32>
      %257 = arith.cmpi slt, %256, %10 : vector<16x1xi32>
      %258 = vector.shape_cast %257 : vector<16x1xi1> to vector<16x1xi1>
      %259 = vector.broadcast %258 : vector<16x1xi1> to vector<16x128xi1>
      %260 = arith.select %259, %254, %220 : vector<16x128xi1>, vector<16x128xf32>
      %261 = vector.shape_cast %257 : vector<16x1xi1> to vector<16x1xi1>
      %262 = vector.broadcast %261 : vector<16x1xi1> to vector<16x128xi1>
      %263 = arith.select %262, %252, %223 : vector<16x128xi1>, vector<16x128xf32>
      %c6_i32 = arith.constant 6 : i32
      %264 = arith.index_cast %c6_i32 : i32 to index
      %c0_59 = arith.constant 0 : index
      %c0_60 = arith.constant 0 : index
      %265 = vector.load %arg9[%264, %c0_59, %c0_60] : memref<8x16x512xf32, #tpu.memory_space<vmem>>, vector<1x16x512xf32>
      %266 = vector.shape_cast %265 : vector<1x16x512xf32> to vector<16x512xf32>
      %267 = arith.truncf %260 : vector<16x128xf32> to vector<16x128xbf16>
      %cst_61 = arith.constant dense<0.000000e+00> : vector<16x512xf32>
      %268 = tpu.matmul %267, %11, %cst_61 {dimension_numbers = #tpu.dot_dimension_numbers<[1], [0], [0], [1], [0, 0, 1, 1], [], []>} : vector<16x128xbf16>, vector<128x512xbf16>, vector<16x512xf32> -> vector<16x512xf32>
      %269 = arith.addf %266, %268 : vector<16x512xf32>
      %270 = vector.extract_strided_slice %269 {offsets = [0, 0], sizes = [16, 128], strides = [1, 1]} : vector<16x512xf32> to vector<16x128xf32>
      %271 = arith.negf %270 : vector<16x128xf32>
      %272 = math.exp %271 : vector<16x128xf32>
      %cst_62 = arith.constant 1.000000e+00 : f32
      %273 = vector.broadcast %cst_62 : f32 to vector<16x128xf32>
      %274 = arith.addf %273, %272 : vector<16x128xf32>
      %275 = arith.divf %273, %274 : vector<16x128xf32>
      %276 = vector.extract_strided_slice %269 {offsets = [0, 128], sizes = [16, 128], strides = [1, 1]} : vector<16x512xf32> to vector<16x128xf32>
      %277 = arith.negf %276 : vector<16x128xf32>
      %278 = math.exp %277 : vector<16x128xf32>
      %cst_63 = arith.constant 1.000000e+00 : f32
      %279 = vector.broadcast %cst_63 : f32 to vector<16x128xf32>
      %280 = arith.addf %279, %278 : vector<16x128xf32>
      %281 = arith.divf %279, %280 : vector<16x128xf32>
      %282 = vector.extract_strided_slice %269 {offsets = [0, 256], sizes = [16, 128], strides = [1, 1]} : vector<16x512xf32> to vector<16x128xf32>
      %283 = math.tanh %282 : vector<16x128xf32>
      %284 = vector.extract_strided_slice %269 {offsets = [0, 384], sizes = [16, 128], strides = [1, 1]} : vector<16x512xf32> to vector<16x128xf32>
      %285 = arith.negf %284 : vector<16x128xf32>
      %286 = math.exp %285 : vector<16x128xf32>
      %cst_64 = arith.constant 1.000000e+00 : f32
      %287 = vector.broadcast %cst_64 : f32 to vector<16x128xf32>
      %288 = arith.addf %287, %286 : vector<16x128xf32>
      %289 = arith.divf %287, %288 : vector<16x128xf32>
      %290 = arith.mulf %281, %263 : vector<16x128xf32>
      %291 = arith.mulf %275, %283 : vector<16x128xf32>
      %292 = arith.addf %290, %291 : vector<16x128xf32>
      %293 = math.tanh %292 : vector<16x128xf32>
      %294 = arith.mulf %289, %293 : vector<16x128xf32>
      %295 = arith.addi %21, %c6_i32 : i32
      %296 = vector.broadcast %295 : i32 to vector<16x1xi32>
      %297 = arith.cmpi slt, %296, %10 : vector<16x1xi32>
      %298 = vector.shape_cast %297 : vector<16x1xi1> to vector<16x1xi1>
      %299 = vector.broadcast %298 : vector<16x1xi1> to vector<16x128xi1>
      %300 = arith.select %299, %294, %260 : vector<16x128xi1>, vector<16x128xf32>
      %301 = vector.shape_cast %297 : vector<16x1xi1> to vector<16x1xi1>
      %302 = vector.broadcast %301 : vector<16x1xi1> to vector<16x128xi1>
      %303 = arith.select %302, %292, %263 : vector<16x128xi1>, vector<16x128xf32>
      %c7_i32 = arith.constant 7 : i32
      %304 = arith.index_cast %c7_i32 : i32 to index
      %c0_65 = arith.constant 0 : index
      %c0_66 = arith.constant 0 : index
      %305 = vector.load %arg9[%304, %c0_65, %c0_66] : memref<8x16x512xf32, #tpu.memory_space<vmem>>, vector<1x16x512xf32>
      %306 = vector.shape_cast %305 : vector<1x16x512xf32> to vector<16x512xf32>
      %307 = arith.truncf %300 : vector<16x128xf32> to vector<16x128xbf16>
      %cst_67 = arith.constant dense<0.000000e+00> : vector<16x512xf32>
      %308 = tpu.matmul %307, %11, %cst_67 {dimension_numbers = #tpu.dot_dimension_numbers<[1], [0], [0], [1], [0, 0, 1, 1], [], []>} : vector<16x128xbf16>, vector<128x512xbf16>, vector<16x512xf32> -> vector<16x512xf32>
      %309 = arith.addf %306, %308 : vector<16x512xf32>
      %310 = vector.extract_strided_slice %309 {offsets = [0, 0], sizes = [16, 128], strides = [1, 1]} : vector<16x512xf32> to vector<16x128xf32>
      %311 = arith.negf %310 : vector<16x128xf32>
      %312 = math.exp %311 : vector<16x128xf32>
      %cst_68 = arith.constant 1.000000e+00 : f32
      %313 = vector.broadcast %cst_68 : f32 to vector<16x128xf32>
      %314 = arith.addf %313, %312 : vector<16x128xf32>
      %315 = arith.divf %313, %314 : vector<16x128xf32>
      %316 = vector.extract_strided_slice %309 {offsets = [0, 128], sizes = [16, 128], strides = [1, 1]} : vector<16x512xf32> to vector<16x128xf32>
      %317 = arith.negf %316 : vector<16x128xf32>
      %318 = math.exp %317 : vector<16x128xf32>
      %cst_69 = arith.constant 1.000000e+00 : f32
      %319 = vector.broadcast %cst_69 : f32 to vector<16x128xf32>
      %320 = arith.addf %319, %318 : vector<16x128xf32>
      %321 = arith.divf %319, %320 : vector<16x128xf32>
      %322 = vector.extract_strided_slice %309 {offsets = [0, 256], sizes = [16, 128], strides = [1, 1]} : vector<16x512xf32> to vector<16x128xf32>
      %323 = math.tanh %322 : vector<16x128xf32>
      %324 = vector.extract_strided_slice %309 {offsets = [0, 384], sizes = [16, 128], strides = [1, 1]} : vector<16x512xf32> to vector<16x128xf32>
      %325 = arith.negf %324 : vector<16x128xf32>
      %326 = math.exp %325 : vector<16x128xf32>
      %cst_70 = arith.constant 1.000000e+00 : f32
      %327 = vector.broadcast %cst_70 : f32 to vector<16x128xf32>
      %328 = arith.addf %327, %326 : vector<16x128xf32>
      %329 = arith.divf %327, %328 : vector<16x128xf32>
      %330 = arith.mulf %321, %303 : vector<16x128xf32>
      %331 = arith.mulf %315, %323 : vector<16x128xf32>
      %332 = arith.addf %330, %331 : vector<16x128xf32>
      %333 = math.tanh %332 : vector<16x128xf32>
      %334 = arith.mulf %329, %333 : vector<16x128xf32>
      %335 = arith.addi %21, %c7_i32 : i32
      %336 = vector.broadcast %335 : i32 to vector<16x1xi32>
      %337 = arith.cmpi slt, %336, %10 : vector<16x1xi32>
      %338 = vector.shape_cast %337 : vector<16x1xi1> to vector<16x1xi1>
      %339 = vector.broadcast %338 : vector<16x1xi1> to vector<16x128xi1>
      %340 = arith.select %339, %334, %300 : vector<16x128xi1>, vector<16x128xf32>
      %341 = vector.shape_cast %337 : vector<16x1xi1> to vector<16x1xi1>
      %342 = vector.broadcast %341 : vector<16x1xi1> to vector<16x128xi1>
      %343 = arith.select %342, %332, %303 : vector<16x128xi1>, vector<16x128xf32>
      %c8_i32_71 = arith.constant 8 : i32
      %c0_72 = arith.constant 0 : index
      %c0_73 = arith.constant 0 : index
      %344 = vector.load %arg10[%c0_72, %c0_73] : memref<16x128xf32, #tpu.memory_space<vmem>>, vector<16x128xf32>
      tpu.vector_store %arg10[%c0_72, %c0_73], %340 {strides = array<i32>} : memref<16x128xf32, #tpu.memory_space<vmem>>, vector<16x128xf32>,
      %c0_74 = arith.constant 0 : index
      %c0_75 = arith.constant 0 : index
      %345 = vector.load %arg11[%c0_74, %c0_75] : memref<16x128xf32, #tpu.memory_space<vmem>>, vector<16x128xf32>
      tpu.vector_store %arg11[%c0_74, %c0_75], %343 {strides = array<i32>} : memref<16x128xf32, #tpu.memory_space<vmem>>, vector<16x128xf32>,
    } else {
    }
    %c1_i32 = arith.constant 1 : i32
    %7 = arith.cmpi eq, %arg1, %c1_i32 : i32
    %8 = arith.extui %7 : i1 to i32
    %c0_i32_2 = arith.constant 0 : i32
    %9 = arith.cmpi ne, %8, %c0_i32_2 : i32
    scf.if %9 {
      %c0_3 = arith.constant 0 : index
      %c0_4 = arith.constant 0 : index
      %10 = vector.load %arg10[%c0_3, %c0_4] : memref<16x128xf32, #tpu.memory_space<vmem>>, vector<16x128xf32>
      %c0_5 = arith.constant 0 : index
      %c0_6 = arith.constant 0 : index
      %11 = vector.load %arg8[%c0_5, %c0_6] : memref<16x128xf32, #tpu.memory_space<vmem>>, vector<16x128xf32>
      tpu.vector_store %arg8[%c0_5, %c0_6], %10 {strides = array<i32>} : memref<16x128xf32, #tpu.memory_space<vmem>>, vector<16x128xf32>,
    } else {
    }
    return
  }
  func.func @transform_0(%arg0: i32, %arg1: i32, %arg2: memref<1xi32, #tpu.memory_space<smem>>) -> (i32, i32) {
    %c0_i32 = arith.constant 0 : i32
    %c0_i32_0 = arith.constant 0 : i32
    return %arg0, %c0_i32 : i32, i32
  }
  func.func @transform_1(%arg0: i32, %arg1: i32, %arg2: memref<1xi32, #tpu.memory_space<smem>>) -> (i32, i32, i32) {
    %c0_i32 = arith.constant 0 : i32
    %c0_i32_0 = arith.constant 0 : i32
    return %arg1, %arg0, %c0_i32 : i32, i32, i32
  }
  func.func @transform_2(%arg0: i32, %arg1: i32, %arg2: memref<1xi32, #tpu.memory_space<smem>>) -> (i32, i32) {
    %c0_i32 = arith.constant 0 : i32
    %c0_i32_0 = arith.constant 0 : i32
    %c0_i32_1 = arith.constant 0 : i32
    return %c0_i32, %c0_i32_0 : i32, i32
  }
  func.func @transform_3(%arg0: i32, %arg1: i32, %arg2: memref<1xi32, #tpu.memory_space<smem>>) -> (i32, i32) {
    %c0_i32 = arith.constant 0 : i32
    %c0_i32_0 = arith.constant 0 : i32
    %c0_i32_1 = arith.constant 0 : i32
    return %c0_i32, %c0_i32_0 : i32, i32
  }
  func.func @transform_4(%arg0: i32, %arg1: i32, %arg2: memref<1xi32, #tpu.memory_space<smem>>) -> (i32, i32) {
    %c0_i32 = arith.constant 0 : i32
    %c0_i32_0 = arith.constant 0 : i32
    %c0_i32_1 = arith.constant 0 : i32
    return %c0_i32, %c0_i32_0 : i32, i32
  }
  func.func @transform_5(%arg0: i32, %arg1: i32, %arg2: memref<1xi32, #tpu.memory_space<smem>>) -> (i32, i32) {
    %c0_i32 = arith.constant 0 : i32
    %c0_i32_0 = arith.constant 0 : i32
    return %arg0, %c0_i32 : i32, i32
  }
}

</mosaic_0001>

<bundles_post_ra>
// kernel: tpu_custom_call.1
= control target key start
LH: loop header
LB: loop body
LE: loop exit
PB: predicated region body
PF: predicated region fallthrough
CT: control target
= control target key end

     0   :  { %s5467_s0 = inlined_call_operand.<no memory space> [shape: s32[1], index: 0, kind: input, shape index: {}]   ;;  %s5468_s1 = inlined_call_operand.vmem [shape: s32[32,1], index: 1, kind: input, shape index: {}]   ;;  %s5469_s2 = inlined_call_operand.hbm [shape: bf16[16,32,128], index: 2, kind: input, shape index: {}]   ;;  %s5470_s3 = inlined_call_operand.hbm [shape: bf16[128,512], index: 3, kind: input, shape index: {}]   ;;  %s5471_s4 = inlined_call_operand.hbm [shape: bf16[128,512], index: 4, kind: input, shape index: {}]   ;;  %s5472_s5 = inlined_call_operand.vmem [shape: f32[1,512], index: 5, kind: input, shape index: {}]   ;;  %s5473_s6 = inlined_call_operand.hbm [shape: f32[32,128], index: 6, kind: output, shape index: {}]  }
   0x1   :  { %5524 = sst [smem:[#allocation97_spill]] %s5470_s3 }
   0x2   :  { %5525 = sst [smem:[#allocation98_spill]] %s5471_s4 }
   0x3   :  { %11 = sst [smem:[#allocation6]] %s5467_s0 }
   0x4   :  { %12 = vsyncpa [#allocation8], 0 }
   0x5   :  { %14 = vsyncpa [#allocation8 + $0x1], 0 }
   0x6   :  { %15 = vsyncpa [#allocation11], 0 }
   0x7   :  { %16 = vsyncpa [#allocation9], 0 }
   0x8   :  { %18 = vsyncpa [#allocation9 + $0x1], 0  ;;  %s4050_s23 = smov 0   ;;  %s4052_s24 = smov 0  }
   0x9   :  { %s4054_s25 = smov 0   ;;  %s4056_s26 = smov 0  }
   0xa   :  { %s4058_s27 = smov 0   ;;  %s4060_s28 = smov 0  }
   0xb   :  { %s4062_s29 = smov 0   ;;  %s4064_s0 = smov 0  }
   0xc   :  { %s4066_s30 = smov 0   ;;  %s4068_s7 = smov 0  }
   0xd   :  { %s4070_s8 = smov 0  }
   0xe LB: > { %5526 = sst [smem:[#allocation20_spill]] %s3964_s25  ;;  %s2973_s9 = sadd.s32 4294967295, %s3996_s8   ;;  %s3996_s8 = sphi %s4070_s8, %s24_s8   ;;  %s3992_s7 = sphi %s4068_s7, %s5734_s7   ;;  %s3988_s30 = sphi %s4066_s30, %s5733_s30   ;;  %s3984_s0 = sphi %s4064_s0, %s5732_s0   ;;  %s3980_s29 = sphi %s4062_s29, %s5731_s29   ;;  %s3976_s28 = sphi %s4060_s28, %s5739_s28   ;;  %s3972_s27 = sphi %s4058_s27, %s5738_s27   ;;  %s3968_s26 = sphi %s4056_s26, %s5737_s26   ;;  %s3964_s25 = sphi %s4054_s25, %s5729_s25   ;;  %s3960_s24 = sphi %s4052_s24, %s5736_s24   ;;  %s3956_s23 = sphi %s4050_s23, %s5735_s23  }
   0xf   : > { %5527 = sst [smem:[#allocation21_spill]] %s3988_s30  ;;  %s2974_s10 = sadd.s32 4294967294, %s3996_s8  }
  0x10   : > { %5528 = sst [smem:[#allocation22_spill]] %s3992_s7  ;;  %s33_s11 = sadd.s32 1, %s3988_s30 }
  0x11   : > { %s36_s12 = sadd.s32 1, %s3992_s7  ;;  %p34_p0 = scmp.ge.s32.totalorder %s33_s11, 2 }
  0x12   : > { %s71_s13 = sadd.s32 1, %s3976_s28  ;;  %p78_p1 = scmp.ne.s32.totalorder %s3976_s28, %s3972_s27 }
  0x13   : > { %p79_p2 = scmp.eq.s32.totalorder %s3996_s8, 0  ;;  %s5741_s11 = smov (%p34_p0, %s33_s11), 0 }
  0x14   : > { %5529 = sst [smem:[#allocation23_spill]] %s5741_s11  ;;  %s5743_s12 = smov (!%p34_p0, %s36_s12), %s3992_s7 }
  0x15   : > { %s66_s14 = ssub.s32 %s3988_s30, %s5741_s11  ;;  %p4116_p3 = por %p79_p2, %p78_p1 }
  0x16   : > { %p38_p4 = scmp.ge.s32.totalorder %s5743_s12, 2  ;;  %p84_p5 = scmp.ne.s32.totalorder %s3972_s27, %s3968_s26 }
  0x17   : > { %p4121_p6 = scmp.eq.s32.totalorder %s2973_s9, 0  ;;  %s160_s17 = sadd.s32 1, %s3964_s25 }
  0x18   : > { %s5745_s12 = smov (%p38_p4, %s5743_s12), 0  ;;  %p170_p8 = scmp.ne.s32.totalorder %s3964_s25, %s3960_s24 }
  0x19   : > { %5532 = sst [smem:[#allocation24_spill]] %s5745_s12  ;;  %p4130_p7 = por %p4121_p6, %p84_p5 }
  0x1a   : > { %s67_s19 = ssub.s32 %s3992_s7, %s5745_s12  ;;  %p171_p9 = scmp.eq.s32.totalorder %s2973_s9, 3 }
  0x1b   : > { %s68_s20 = sor.u32 %s67_s19, %s66_s14  ;;  %p158_p10 = scmp.eq.s32.totalorder %s67_s19, 0 }
  0x1c   : > { %p69_p11 = scmp.eq.s32.totalorder %s68_s20, 0  ;;  %p4138_p12 = por %p171_p9, %p170_p8 }
  0x1d   : > { %s4143_s22 = scalar_select %p158_p10, %s3964_s25, %s160_s17  }
  0x1e   : > { %s4146_s26 = scalar_select %p69_p11, %s3976_s28, %s71_s13  }
  0x1f   : > { %5535 = sst [smem:[#allocation25_spill]] %s4143_s22  ;;  %p176_p13 = scmp.ne.s32.totalorder %s3960_s24, %s3956_s23 }
  0x20   : > { %5536 = sst [smem:[#allocation26_spill]] %s4146_s26  ;;  %p177_p0 = scmp.eq.s32.totalorder %s2974_s10, 3 }
  0x21   : > { %p2975_p1 = scmp.ge.s32.totalorder %s3996_s8, 1  ;;  %p184_p2 = scmp.lt.s32.totalorder %s3996_s8, 5 }
  0x22   : > { %p4152_p4 = por %p177_p0, %p176_p13  ;;  %s5540_s3 = sld [smem:[#allocation97_spill]] }
  0x23   : > { %p4156_p5 = pnand %p2975_p1, %p184_p2  ;;  %s3998_s13 = smov [#allocation10]  }
  0x24   : > { %s5537_s11 = scalar_select %p4152_p4, 1, 0 }
  0x25   : > { %p3431_p8 = pneg %p4156_p5  ;;  %s197_s10 = sshll.u32 %s3998_s13, 4  ;;  %s198_s10 = int_to_ptr.vmem [resolvable:$true] %s197_s10 }
  0x26   : > { %5538 = sst [smem:[#allocation27_spill]] %s5537_s11  ;;  %s3999_s22 = smov 256  }
  0x27   : > { %p3432_p9 = pnand %p3431_p8, %p4121_p6  ;;  %s5541_s4 = sld [smem:[#allocation98_spill]] }
  0x28   : > { %s195_s17 = sshll.u32 %s5540_s3, 4  ;;  %s4000_s25 = smov 16   ;;  %s196_s17 = int_to_ptr.hbm [resolvable:$true] %s195_s17 }
  0x29   : > { %3434 = dma.hbm_to_vmem [thread:$0]  (!%p3432_p9), %s196_s17, 4096, %s198_s10, [#allocation11], %s3999_s22, %s3999_s22, %s4000_s25  }
  0x2a   : > { %s4001_s11 = smov [#allocation12]   ;;  %p2978_p10 = scmp.ge.s32.totalorder %s3996_s8, 4 }
  0x2b   : > { %s211_s14 = sshll.u32 %s4001_s11, 4  ;;  %s212_s14 = int_to_ptr.vmem [resolvable:$true] %s211_s14 }
  0x2c   : > { %224 = sbr.rel (%p2978_p10) target bundleno = 65 (0x41), region = 28 }
  0x2d   : > { %s209_s26 = sshll.u32 %s5541_s4, 4  ;;  %s210_s26 = int_to_ptr.hbm [resolvable:$true] %s209_s26 }
  0x2e   : > { %3437 = dma.hbm_to_vmem [thread:$0]  (!%p3432_p9), %s210_s26, 4096, %s212_s14, [#allocation11], %s3999_s22, %s3999_s22, %s4000_s25  }
  0x31   : > { %s237_s19 = sand.u32 1, %s3976_s28   ;;  %s2981_s12 = sshll.u32 %s3992_s7, 1 }
  0x32   : > { %s2979_s13 = sshll.u32 %s237_s19, 6  ;;  %s3338_s20 = sshll.u32 %s3988_s30, 5 }
  0x33   : > { %s247_s3 = sadd.s32 %s3338_s20, %s2981_s12  ;;  %s241_s11 = scalar_lea.vmem [#allocation7], %s2979_s13 }
  0x34   : > { %s2983_s17 = sshll.u32 %s247_s3, 2  ;;  %s264_s25 = sshll.u32 %s241_s11, 4  ;;  %s265_s25 = int_to_ptr.vmem [resolvable:$true] %s264_s25 }
  0x35   : > { %s249_s10 = scalar_lea.hbm %s5469_s2, %s2983_s17  ;;  %s4002_s4 = smov 256  }
  0x36   : > { %s3416_s14 = scalar_select %p4116_p3, [#allocation0], [#allocation16] }
  0x37   : > { %3417 = sst [smem:[#allocation15]] (%p4116_p3), %s4002_s4  ;;  %s262_s30 = sshll.u32 %s249_s10, 4  ;;  %s263_s30 = int_to_ptr.hbm [resolvable:$true] %s262_s30 }
  0x38   : > { %s254_s7 = sld [smem:[%s3416_s14]]   ;;  %s4003_s12 = smov 128  }
  0x39   : > { %3418 = sst [smem:[#allocation15 + $0x1]] (%p4116_p3), %s4003_s12  ;;  %s4004_s3 = smov 2  }
  0x3a   : > { %3419 = sst [smem:[#allocation15 + $0x2]] (%p4116_p3), %s4004_s3  ;;  %s4005_s13 = smov 64  }
  0x3b   : > { %3420 = sst [smem:[#allocation15 + $0x3]] (%p4116_p3), %s4005_s13  ;;  %s4006_s17 = smov 4  }
  0x3c   : > { %3421 = sst [smem:[#allocation15 + $0x4]] (%p4116_p3), %s4005_s13  ;;  %s238_s11 = scalar_lea.sflag [#allocation8], %s237_s19 }
  0x3d   : > { %3422 = sst [smem:[#allocation15 + $0x5]] (%p4116_p3), %s4006_s17  ;;  %s4007_s22 = smov [#allocation14]  }
  0x3e   : > { %s2984_s20 = sshll.u32 %s254_s7, 26 }
  0x3f   : > { %s2985_s4 = sadd.s32 134217728, %s2984_s20 }
  0x40   : > { %3423 = dma.general (%p4116_p3), %s263_s30, 1024, %s265_s25, %s238_s11, %s4007_s22, [#allocation15], %s2985_s4, 0  }
  0x41 PF: > { %289 = sbr.rel (%p4156_p5) target bundleno = 1758 (0x6de), region = 40  ;;  %s291_s26 = sand.u32 (!%p4156_p5), 1, %s3972_s27  }
  0x42   : > { %s2987_s10 = sshll.u32 (!%p4156_p5), %s291_s26, 6  ;;  %s292_s14 = scalar_lea.sflag (!%p4156_p5), [#allocation8], %s291_s26 }
  0x43   : > { %s4196_s12 = scalar_lea.vmem (!%p4156_p5), [#allocation7], %s2987_s10 }
  0x46   : > { %3943 = dma.done.wait (%p4130_p7), %s292_s14, 1024  }
  0x47   : > { %3945 = vsyncadd (%p4130_p7), %s292_s14, 4294966272 }
  0x48   : > { %3947 = dma.done.wait (%p4121_p6), [#allocation11], 8192  }
  0x49   : > { %3949 = vsyncadd (%p4121_p6), [#allocation11], 4294959104  ;;  %s335_s30 = sand.u32 1, %s3960_s24   ;;  %s2991_s7 = sshll.u32 %s3984_s0, 1 }
  0x4a   : > { %s2990_s15 = sshll.u32 %s335_s30, 4  ;;  %p339_p3 = scmp.lt.s32.totalorder %s2991_s7, 3 }
  0x4b   : > { %s4215_s3 = scalar_lea.vmem [#allocation13], %s2990_s15  ;;  %p2993_p7 = scmp.ne.s32.totalorder %s3980_s29, 0 }
  0x4c   : > { %s5747_s7 = smov (!%p339_p3, %s2991_s7), 3 }
  0x4d   : > { %s2992_s9 = sshll.u32 %s5747_s7, 3  ;;  %350 = sbr.rel (%p2993_p7) target bundleno = 87 (0x57), region = 56 }
  0x4e   : > { %s4213_s18 = scalar_lea.vmem %s5468_s1, %s2992_s9 }
  0x52   : > { %v4008_v0 = vmov 0.0  }
  0x53   : > { %351 = vst [vmem:[#allocation3] sm:$0xff] %v4008_v0 }
  0x54   : > { %352 = vst [vmem:[#allocation3 + $0x8] sm:$0xff] %v4008_v0 }
  0x55   : > { %353 = vst [vmem:[#allocation4 + $0x8] sm:$0xff] %v4008_v0 }
  0x56   : > { %354 = vst [vmem:[#allocation4] sm:$0xff] %v4008_v0 }
  0x57 PF: > { %s355_s16 = sld [smem:[#allocation6]] }
  0x5d   : > { %p2994_p6 = scmp.ge.s32.totalorder %s3980_s29, %s355_s16 }
  0x5f   : > { %359 = sbr.rel (%p2994_p6) target bundleno = 1732 (0x6c4), region = 60 }
  0x64   : > { %v3141_v1 = vld [vmem:[#allocation10 + $0xe0] sm:$0xf]  ;;  %v3409_v2 = vld [vmem:[#allocation10 + $0xec] sm:$0xf0]  ;;  %v3407_v3 = vld [vmem:[#allocation10 + $0xe4] sm:$0xf] }
  0x65   : > { %v3142_v4 = vor.u32 %v3409_v2, %v3141_v1  ;;  %v3143_v5 = vld [vmem:[#allocation10 + $0xf0] sm:$0xf0]  ;;  %v3149_v6 = vld [vmem:[#allocation10 + $0xe8] sm:$0xf]  ;;  %v3410_v7 = vld [vmem:[#allocation10 + $0xf4] sm:$0xf0] }
  0x66   : > { %v3146_v8 = vor.u32 %v3407_v3, %v3143_v5  ;;  %v3150_v9 = vor.u32 %v3410_v7, %v3149_v6  ;;  %v3408_v10 = vld [vmem:[#allocation10 + $0xec] sm:$0xf]  ;;  %v3151_v11 = vld [vmem:[#allocation10 + $0xf8] sm:$0xf0]  ;;  %v3125_v12 = vld [vmem:[#allocation10 + $0xc0] sm:$0xf] }
  0x67   : > { %660 = vmatpush.bf16.msra.mxu0 %v3142_v4  ;;  %v3154_v13 = vor.u32 %v3408_v10, %v3151_v11  ;;  %v3405_v14 = vld [vmem:[#allocation10 + $0xcc] sm:$0xf0]  ;;  %v3403_v15 = vld [vmem:[#allocation10 + $0xc4] sm:$0xf]  ;;  %v3127_v16 = vld [vmem:[#allocation10 + $0xd0] sm:$0xf0] }
  0x68   : > { %709 = vmatpush.bf16.msra.mxu1 %v3146_v8  ;;  %758 = vmatpush.bf16.msra.mxu2 %v3150_v9  ;;  %v3126_v17 = vor.u32 %v3405_v14, %v3125_v12  ;;  %v3130_v18 = vor.u32 %v3403_v15, %v3127_v16  ;;  %v3133_v19 = vld [vmem:[#allocation10 + $0xc8] sm:$0xf]  ;;  %v3406_v20 = vld [vmem:[#allocation10 + $0xd4] sm:$0xf0]  ;;  %v3404_v21 = vld [vmem:[#allocation10 + $0xcc] sm:$0xf] }
  0x69   : > { %807 = vmatpush.bf16.msra.mxu3 %v3154_v13  ;;  %v3134_v22 = vor.u32 %v3406_v20, %v3133_v19  ;;  %v3135_v23 = vld [vmem:[#allocation10 + $0xd8] sm:$0xf0]  ;;  %v3109_v24 = vld [vmem:[#allocation10 + $0xa0] sm:$0xf]  ;;  %v3401_v25 = vld [vmem:[#allocation10 + $0xac] sm:$0xf0] }
  0x6a   : > { %v3138_v26 = vor.u32 %v3404_v21, %v3135_v23  ;;  %v3399_v27 = vld [vmem:[#allocation10 + $0xa4] sm:$0xf]  ;;  %v3111_v28 = vld [vmem:[#allocation10 + $0xb0] sm:$0xf0]  ;;  %v3117_v29 = vld [vmem:[#allocation10 + $0xa8] sm:$0xf]  ;;  %v3110_v30 = vor.u32 %v3401_v25, %v3109_v24 }
  0x6b   : > { %661 = vmatpush.bf16.msra.mxu0 %v3126_v17  ;;  %v3402_v31 = vld [vmem:[#allocation10 + $0xb4] sm:$0xf0]  ;;  %v3400_v32 = vld [vmem:[#allocation10 + $0xac] sm:$0xf]  ;;  %v3119_v33 = vld [vmem:[#allocation10 + $0xb8] sm:$0xf0]  ;;  %v3114_v34 = vor.u32 %v3399_v27, %v3111_v28 }
  0x6c   : > { %710 = vmatpush.bf16.msra.mxu1 %v3130_v18  ;;  %759 = vmatpush.bf16.msra.mxu2 %v3134_v22  ;;  %v3118_v35 = vor.u32 %v3402_v31, %v3117_v29  ;;  %v3093_v36 = vld [vmem:[#allocation10 + $0x80] sm:$0xf]  ;;  %v3397_v37 = vld [vmem:[#allocation10 + $0x8c] sm:$0xf0]  ;;  %v3395_v38 = vld [vmem:[#allocation10 + $0x84] sm:$0xf]  ;;  %v3122_v39 = vor.u32 %v3400_v32, %v3119_v33 }
  0x6d   : > { %808 = vmatpush.bf16.msra.mxu3 %v3138_v26  ;;  %v3095_v40 = vld [vmem:[#allocation10 + $0x90] sm:$0xf0]  ;;  %v3101_v41 = vld [vmem:[#allocation10 + $0x88] sm:$0xf]  ;;  %v3398_v42 = vld [vmem:[#allocation10 + $0x94] sm:$0xf0]  ;;  %v3094_v45 = vor.u32 %v3397_v37, %v3093_v36 }
  0x6e   : > { %v3396_v43 = vld [vmem:[#allocation10 + $0x8c] sm:$0xf]  ;;  %v3103_v44 = vld [vmem:[#allocation10 + $0x98] sm:$0xf0]  ;;  %v3098_v46 = vor.u32 %v3395_v38, %v3095_v40  ;;  %v3102_v47 = vor.u32 %v3398_v42, %v3101_v41  ;;  %v3077_v48 = vld [vmem:[#allocation10 + $0x60] sm:$0xf] }
  0x6f   : > { %662 = vmatpush.bf16.msra.mxu0 %v3110_v30  ;;  %v3393_v49 = vld [vmem:[#allocation10 + $0x6c] sm:$0xf0]  ;;  %v3391_v50 = vld [vmem:[#allocation10 + $0x64] sm:$0xf]  ;;  %v3106_v51 = vor.u32 %v3396_v43, %v3103_v44  ;;  %v3079_v52 = vld [vmem:[#allocation10 + $0x70] sm:$0xf0] }
  0x70   : > { %711 = vmatpush.bf16.msra.mxu1 %v3114_v34  ;;  %760 = vmatpush.bf16.msra.mxu2 %v3118_v35  ;;  %v3085_v53 = vld [vmem:[#allocation10 + $0x68] sm:$0xf]  ;;  %v3394_v54 = vld [vmem:[#allocation10 + $0x74] sm:$0xf0]  ;;  %v3392_v55 = vld [vmem:[#allocation10 + $0x6c] sm:$0xf]  ;;  %v3078_v57 = vor.u32 %v3393_v49, %v3077_v48  ;;  %v3082_v58 = vor.u32 %v3391_v50, %v3079_v52 }
  0x71   : > { %809 = vmatpush.bf16.msra.mxu3 %v3122_v39  ;;  %v3087_v56 = vld [vmem:[#allocation10 + $0x78] sm:$0xf0]  ;;  %v3086_v59 = vor.u32 %v3394_v54, %v3085_v53  ;;  %v3061_v60 = vld [vmem:[#allocation10 + $0x40] sm:$0xf]  ;;  %v3389_v61 = vld [vmem:[#allocation10 + $0x4c] sm:$0xf0] }
  0x72   : > { %v3387_v62 = vld [vmem:[#allocation10 + $0x44] sm:$0xf]  ;;  %v3090_v63 = vor.u32 %v3392_v55, %v3087_v56  ;;  %v3063_v0 = vld [vmem:[#allocation10 + $0x50] sm:$0xf0]  ;;  %v3069_v1 = vld [vmem:[#allocation10 + $0x48] sm:$0xf]  ;;  %v3062_v5 = vor.u32 %v3389_v61, %v3061_v60 }
  0x73   : > { %663 = vmatpush.bf16.msra.mxu0 %v3094_v45  ;;  %v3390_v2 = vld [vmem:[#allocation10 + $0x54] sm:$0xf0]  ;;  %v3388_v3 = vld [vmem:[#allocation10 + $0x4c] sm:$0xf]  ;;  %v3071_v4 = vld [vmem:[#allocation10 + $0x58] sm:$0xf0]  ;;  %v3066_v6 = vor.u32 %v3387_v62, %v3063_v0 }
  0x74   : > { %712 = vmatpush.bf16.msra.mxu1 %v3098_v46  ;;  %761 = vmatpush.bf16.msra.mxu2 %v3102_v47  ;;  %v3070_v7 = vor.u32 %v3390_v2, %v3069_v1  ;;  %v3045_v8 = vld [vmem:[#allocation10 + $0x20] sm:$0xf]  ;;  %v3385_v9 = vld [vmem:[#allocation10 + $0x2c] sm:$0xf0]  ;;  %v3383_v10 = vld [vmem:[#allocation10 + $0x24] sm:$0xf]  ;;  %v3074_v11 = vor.u32 %v3388_v3, %v3071_v4 }
  0x75   : > { %810 = vmatpush.bf16.msra.mxu3 %v3106_v51  ;;  %v3047_v12 = vld [vmem:[#allocation10 + $0x30] sm:$0xf0]  ;;  %v3053_v13 = vld [vmem:[#allocation10 + $0x28] sm:$0xf]  ;;  %v3386_v14 = vld [vmem:[#allocation10 + $0x34] sm:$0xf0]  ;;  %v3046_v17 = vor.u32 %v3385_v9, %v3045_v8 }
  0x76   : > { %v3384_v15 = vld [vmem:[#allocation10 + $0x2c] sm:$0xf]  ;;  %v3055_v16 = vld [vmem:[#allocation10 + $0x38] sm:$0xf0]  ;;  %v3029_v18 = vld [vmem:[#allocation10] sm:$0xf]  ;;  %v3050_v19 = vor.u32 %v3383_v10, %v3047_v12  ;;  %v3054_v20 = vor.u32 %v3386_v14, %v3053_v13 }
  0x77   : > { %664 = vmatpush.bf16.msra.mxu0 %v3078_v57  ;;  %v3381_v21 = vld [vmem:[#allocation10 + $0xc] sm:$0xf0]  ;;  %v3379_v22 = vld [vmem:[#allocation10 + $0x4] sm:$0xf]  ;;  %v3031_v23 = vld [vmem:[#allocation10 + $0x10] sm:$0xf0]  ;;  %v3058_v24 = vor.u32 %v3384_v15, %v3055_v16 }
  0x78   : > { %713 = vmatpush.bf16.msra.mxu1 %v3082_v58  ;;  %762 = vmatpush.bf16.msra.mxu2 %v3086_v59  ;;  %v3037_v25 = vld [vmem:[#allocation10 + $0x8] sm:$0xf]  ;;  %v3382_v26 = vld [vmem:[#allocation10 + $0x14] sm:$0xf0]  ;;  %v3380_v27 = vld [vmem:[#allocation10 + $0xc] sm:$0xf]  ;;  %v3030_v31 = vor.u32 %v3381_v21, %v3029_v18  ;;  %v3034_v34 = vor.u32 %v3379_v22, %v3031_v23 }
  0x79   : > { %811 = vmatpush.bf16.msra.mxu3 %v3090_v63  ;;  %v3039_v28 = vld [vmem:[#allocation10 + $0x18] sm:$0xf0]  ;;  %v3270_v29 = vld [vmem:[#allocation12 + $0xe0] sm:$0xf]  ;;  %v3369_v30 = vld [vmem:[#allocation12 + $0xec] sm:$0xf0]  ;;  %v3038_v35 = vor.u32 %v3382_v26, %v3037_v25 }
  0x7a   : > { %v3367_v32 = vld [vmem:[#allocation12 + $0xe4] sm:$0xf]  ;;  %v3272_v33 = vld [vmem:[#allocation12 + $0xf0] sm:$0xf0]  ;;  %v3042_v37 = vor.u32 %v3380_v27, %v3039_v28  ;;  %v4220_v38 = vor.u32 %v3369_v30, %v3270_v29  ;;  %v3368_v39 = vld [vmem:[#allocation12 + $0xec] sm:$0xf] }
  0x7b   : > { %665 = vmatpush.bf16.msra.mxu0 %v3062_v5  ;;  %v3371_v36 = vld [vmem:[%s4196_s12] sm:$0xff]  ;;  %v3278_v40 = vld [vmem:[#allocation12 + $0xe8] sm:$0xf]  ;;  %v3370_v41 = vld [vmem:[#allocation12 + $0xf4] sm:$0xf0]  ;;  %v4222_v42 = vor.u32 %v3367_v32, %v3272_v33  ;;  %s4339_s13 = sshll.u32 %s3980_s29, 3 }
  0x7c   : > { %714 = vmatpush.bf16.msra.mxu1 %v3066_v6  ;;  %763 = vmatpush.bf16.msra.mxu2 %v3070_v7  ;;  %v3280_v43 = vld [vmem:[#allocation12 + $0xf8] sm:$0xf0]  ;;  %v3254_v44 = vld [vmem:[#allocation12 + $0xc0] sm:$0xf]  ;;  %v3365_v45 = vld [vmem:[#allocation12 + $0xcc] sm:$0xf0]  ;;  %v4224_v48 = vor.u32 %v3370_v41, %v3278_v40 }
  0x7d   : > { %812 = vmatpush.bf16.msra.mxu3 %v3074_v11  ;;  %v3363_v46 = vld [vmem:[#allocation12 + $0xc4] sm:$0xf]  ;;  %v3256_v47 = vld [vmem:[#allocation12 + $0xd0] sm:$0xf0]  ;;  %v4227_v49 = vor.u32 %v3368_v39, %v3280_v43  ;;  %v4229_v50 = vor.u32 %v3365_v45, %v3254_v44  ;;  %v3262_v51 = vld [vmem:[#allocation12 + $0xc8] sm:$0xf] }
  0x7e   : > { %v3366_v52 = vld [vmem:[#allocation12 + $0xd4] sm:$0xf0]  ;;  %v4232_v53 = vor.u32 %v3363_v46, %v3256_v47  ;;  %v3364_v54 = vld [vmem:[#allocation12 + $0xcc] sm:$0xf]  ;;  %v3264_v55 = vld [vmem:[#allocation12 + $0xd8] sm:$0xf0] }
  0x7f   : > { %666 = vmatpush.bf16.msra.mxu0 %v3046_v17  ;;  %v4235_v56 = vor.u32 %v3366_v52, %v3262_v51  ;;  %v3238_v57 = vld [vmem:[#allocation12 + $0xa0] sm:$0xf]  ;;  %v3361_v58 = vld [vmem:[#allocation12 + $0xac] sm:$0xf0]  ;;  %v3359_v59 = vld [vmem:[#allocation12 + $0xa4] sm:$0xf]  ;;  %v4239_v60 = vor.u32 %v3364_v54, %v3264_v55 }
  0x80   : > { %715 = vmatpush.bf16.msra.mxu1 %v3050_v19  ;;  %764 = vmatpush.bf16.msra.mxu2 %v3054_v20  ;;  %v4241_v61 = vor.u32 %v3361_v58, %v3238_v57  ;;  %v3240_v62 = vld [vmem:[#allocation12 + $0xb0] sm:$0xf0]  ;;  %v3360_v63 = vld [vmem:[#allocation12 + $0xac] sm:$0xf]  ;;  %v3248_v1 = vld [vmem:[#allocation12 + $0xb8] sm:$0xf0] }
  0x81   : > { %813 = vmatpush.bf16.msra.mxu3 %v3058_v24  ;;  %v4244_v0 = vor.u32 %v3359_v59, %v3240_v62  ;;  %v3246_v2 = vld [vmem:[#allocation12 + $0xa8] sm:$0xf]  ;;  %v3362_v3 = vld [vmem:[#allocation12 + $0xb4] sm:$0xf0]  ;;  %v4251_v5 = vor.u32 %v3360_v63, %v3248_v1  ;;  %v3222_v7 = vld [vmem:[#allocation12 + $0x80] sm:$0xf] }
  0x82   : > { %v4247_v4 = vor.u32 %v3362_v3, %v3246_v2  ;;  %v3372_v6 = vld [vmem:[%s4196_s12 + $0x8] sm:$0xff]  ;;  %v3357_v8 = vld [vmem:[#allocation12 + $0x8c] sm:$0xf0]  ;;  %v3355_v9 = vld [vmem:[#allocation12 + $0x84] sm:$0xf]  ;;  %s1937_s20 = sadd.s32 3, %s4339_s13 }
  0x83   : > { %667 = vmatpush.bf16.msra.mxu0 %v3030_v31  ;;  %v4257_v10 = vor.u32 %v3357_v8, %v3222_v7  ;;  %v3224_v11 = vld [vmem:[#allocation12 + $0x90] sm:$0xf0]  ;;  %v3356_v12 = vld [vmem:[#allocation12 + $0x8c] sm:$0xf]  ;;  %v3232_v13 = vld [vmem:[#allocation12 + $0x98] sm:$0xf0] }
  0x84   : > { %716 = vmatpush.bf16.msra.mxu1 %v3034_v34  ;;  %765 = vmatpush.bf16.msra.mxu2 %v3038_v35  ;;  %v4259_v14 = vor.u32 %v3355_v9, %v3224_v11  ;;  %v4261_v15 = vor.u32 %v3356_v12, %v3232_v13  ;;  %v3230_v16 = vld [vmem:[#allocation12 + $0x88] sm:$0xf]  ;;  %v3358_v17 = vld [vmem:[#allocation12 + $0x94] sm:$0xf0]  ;;  %v3373_v19 = vld [vmem:[%s4196_s12 + $0x10] sm:$0xff]  ;;  %s2155_s17 = sadd.s32 4, %s4339_s13 }
  0x85   : > { %814 = vmatpush.bf16.msra.mxu3 %v3042_v37  ;;  %v4264_v18 = vor.u32 %v3358_v17, %v3230_v16  ;;  %v3206_v20 = vld [vmem:[#allocation12 + $0x60] sm:$0xf]  ;;  %v3353_v21 = vld [vmem:[#allocation12 + $0x6c] sm:$0xf0]  ;;  %v3351_v22 = vld [vmem:[#allocation12 + $0x64] sm:$0xf] }
  0x86   : > { %668 = vmatmul.bf16.vlgmr.msra.gmra.mxu0 %v3371_v36  ;;  %v4270_v23 = vor.u32 %v3353_v21, %v3206_v20  ;;  %v3208_v24 = vld [vmem:[#allocation12 + $0x70] sm:$0xf0]  ;;  %v3352_v25 = vld [vmem:[#allocation12 + $0x6c] sm:$0xf]  ;;  %v3216_v26 = vld [vmem:[#allocation12 + $0x78] sm:$0xf0] }
  0x87   : > { %1094 = vmatpush.bf16.msrb.mxu0 %v4220_v38  ;;  %717 = vmatmul.bf16.vlgmr.msra.gmra.mxu1 %v3371_v36  ;;  %v4272_v27 = vor.u32 %v3351_v22, %v3208_v24  ;;  %v4274_v28 = vor.u32 %v3352_v25, %v3216_v26  ;;  %v3214_v29 = vld [vmem:[#allocation12 + $0x68] sm:$0xf]  ;;  %v3354_v30 = vld [vmem:[#allocation12 + $0x74] sm:$0xf0]  ;;  %v3190_v33 = vld [vmem:[#allocation12 + $0x40] sm:$0xf] }
  0x88   : > { %1108 = vmatpush.bf16.msrb.mxu1 %v4222_v42  ;;  %766 = vmatmul.bf16.vlgmr.msra.gmra.mxu2 %v3371_v36  ;;  %v4277_v31 = vor.u32 %v3354_v30, %v3214_v29  ;;  %v3374_v32 = vld [vmem:[%s4196_s12 + $0x18] sm:$0xff]  ;;  %v3349_v34 = vld [vmem:[#allocation12 + $0x4c] sm:$0xf0]  ;;  %v3347_v35 = vld [vmem:[#allocation12 + $0x44] sm:$0xf]  ;;  %v1284_v29 = vstv %s4339_s13  ;;  %v5480_v30 = vmov 0  }
  0x89   : > { %815 = vmatmul.bf16.vlgmr.msra.gmra.mxu3 %v3371_v36  ;;  %1122 = vmatpush.bf16.msrb.mxu2 %v4224_v48  ;;  %v4283_v36 = vor.u32 %v3349_v34, %v3190_v33  ;;  %v3192_v37 = vld [vmem:[#allocation12 + $0x50] sm:$0xf0]  ;;  %v3348_v39 = vld [vmem:[#allocation12 + $0x4c] sm:$0xf]  ;;  %v3200_v40 = vld [vmem:[#allocation12 + $0x58] sm:$0xf0] }
  0x8a   : > { %1136 = vmatpush.bf16.msrb.mxu3 %v4227_v49  ;;  %v4285_v41 = vor.u32 %v3347_v35, %v3192_v37  ;;  %v4287_v43 = vor.u32 %v3348_v39, %v3200_v40  ;;  %v3198_v44 = vld [vmem:[#allocation12 + $0x48] sm:$0xf]  ;;  %v3350_v45 = vld [vmem:[#allocation12 + $0x54] sm:$0xf0]  ;;  %v3375_v47 = vld [vmem:[%s4196_s12 + $0x20] sm:$0xff]  ;;  %3549 = vset.pattern.permute.xlu0 %v5480_v30  ;;  %v4378_v40 = vstv %s1937_s20  ;;  %s2591_s4 = sadd.s32 6, %s4339_s13 }
  0x8b   : > { %1095 = vmatpush.bf16.msrb.mxu0 %v4229_v50  ;;  %v4290_v46 = vor.u32 %v3350_v45, %v3198_v44  ;;  %v3174_v51 = vld [vmem:[#allocation12 + $0x20] sm:$0xf]  ;;  %v3345_v52 = vld [vmem:[#allocation12 + $0x2c] sm:$0xf0]  ;;  %v3343_v54 = vld [vmem:[#allocation12 + $0x24] sm:$0xf]  ;;  %3550 = vset.pattern.permute.xlu1 %v5480_v30 }
  0x8c   : > { %1109 = vmatpush.bf16.msrb.mxu1 %v4232_v53  ;;  %v4296_v55 = vor.u32 %v3345_v52, %v3174_v51  ;;  %v3176_v57 = vld [vmem:[#allocation12 + $0x30] sm:$0xf0]  ;;  %v3344_v58 = vld [vmem:[#allocation12 + $0x2c] sm:$0xf]  ;;  %v3184_v59 = vld [vmem:[#allocation12 + $0x38] sm:$0xf0]  ;;  %3551 = vset.pattern.permute.xlu2 %v5480_v30  ;;  %v4394_v52 = vstv %s2155_s17 }
  0x8d   : > { %1123 = vmatpush.bf16.msrb.mxu2 %v4235_v56  ;;  %v4298_v62 = vor.u32 %v3343_v54, %v3176_v57  ;;  %v4300_v63 = vor.u32 %v3344_v58, %v3184_v59  ;;  %v3182_v1 = vld [vmem:[#allocation12 + $0x28] sm:$0xf]  ;;  %v3346_v2 = vld [vmem:[#allocation12 + $0x34] sm:$0xf0]  ;;  %v3158_v7 = vld [vmem:[#allocation12] sm:$0xf] }
  0x8e   : > { %1137 = vmatpush.bf16.msrb.mxu3 %v4239_v60  ;;  %v4303_v3 = vor.u32 %v3346_v2, %v3182_v1  ;;  %v3341_v8 = vld [vmem:[#allocation12 + $0xc] sm:$0xf0]  ;;  %v3339_v9 = vld [vmem:[#allocation12 + $0x4] sm:$0xf]  ;;  %v3160_v12 = vld [vmem:[#allocation12 + $0x10] sm:$0xf0]  ;;  %v4415_v2 = vstv %s2591_s4 }
  0x8f   : > { %1096 = vmatpush.bf16.msrb.mxu0 %v4241_v61  ;;  %5542 = vst [vmem:[#allocation28_spill] sm:$0xff] %v4298_v62  ;;  %v4309_v11 = vor.u32 %v3341_v8, %v3158_v7  ;;  %v3340_v13 = vld [vmem:[#allocation12 + $0xc] sm:$0xf]  ;;  %v3168_v16 = vld [vmem:[#allocation12 + $0x18] sm:$0xf0]  ;;  %v4311_v17 = vor.u32 %v3339_v9, %v3160_v12  ;;  %v3377_v20 = vld [vmem:[%s4196_s12 + $0x30] sm:$0xff] }
  0x90   : > { %1110 = vmatpush.bf16.msrb.mxu1 %v4244_v0  ;;  %5543 = vst [vmem:[#allocation29_spill] sm:$0xff] %v4300_v63  ;;  %v3166_v21 = vld [vmem:[#allocation12 + $0x8] sm:$0xf]  ;;  %v3342_v22 = vld [vmem:[#allocation12 + $0x14] sm:$0xf0]  ;;  %v4346_v26 = vld [vmem:[%s4213_s18] sm:$0xff] }
  0x91   : > { %1124 = vmatpush.bf16.msrb.mxu2 %v4247_v4  ;;  %5544 = vst [vmem:[#allocation30_spill] sm:$0xff] %v4303_v3  ;;  %v4325_v24 = vor.u32 %v3342_v22, %v3166_v21  ;;  %v3378_v25 = vld [vmem:[%s4196_s12 + $0x38] sm:$0xff]  ;;  %vm1285_vm0 = vcmp.lt.s32.totalorder %v1284_v29, %v4346_v26  ;;  %v4360_v33 = vld [vmem:[%s4213_s18 + $0x8] sm:$0xff]  ;;  %v4371_v35 = vld [vmem:[#allocation3] sm:$0xff]  ;;  %vm1939_vm2 = vcmp.lt.s32.totalorder %v4378_v40, %v4346_v26  ;;  %s2809_s11 = sadd.s32 7, %s4339_s13  ;;  %s1501_s10 = sadd.s32 1, %s4339_s13 }
  0x92   : > { %1138 = vmatpush.bf16.msrb.mxu3 %v4251_v5  ;;  %5545 = vst [vmem:[#allocation31_spill] sm:$0xff] %v4309_v11  ;;  %vm1286_vm1 = vcmp.lt.s32.totalorder %v1284_v29, %v4360_v33  ;;  %v4373_v37 = vld [vmem:[#allocation3 + $0x8] sm:$0xff]  ;;  %vm2158_vm3 = vcmp.lt.s32.totalorder %v4394_v52, %v4360_v33  ;;  %vm2593_vm4 = vcmp.lt.s32.totalorder %v4415_v2, %v4346_v26  ;;  %s2373_s14 = sadd.s32 5, %s4339_s13 }
  0x93   : > { %1097 = vmatpush.bf16.msrb.mxu0 %v4257_v10  ;;  %5546 = vst [vmem:[#allocation32_spill] sm:$0xff] %v4311_v17  ;;  %v1288_v34 = vsel %vm1286_vm1, 1, %v5480_v30  ;;  %v933_v39 = vpack.c.bf16 %v4373_v37, %v4371_v35  ;;  %v2160_v59 = vsel %vm2158_vm3, 1, %v5480_v30  ;;  %v2595_v9 = vsel %vm2593_vm4, 1, %v5480_v30 }
  0x94   : > { %1111 = vmatpush.bf16.msrb.mxu1 %v4259_v14  ;;  %5548 = vst [vmem:[#allocation34_spill] sm:$0xff] %v4325_v24 }
  0x95   : > { %1125 = vmatpush.bf16.msrb.mxu2 %v4264_v18  ;;  %5549 = vst [vmem:[#allocation35_spill] sm:$0xff] %v4394_v52 }
  0x96   : > { %673 = vmatmul.bf16.gmra.mxu0 %v3372_v6  ;;  %1139 = vmatpush.bf16.msrb.mxu3 %v4261_v15 }
  0x97   : > { %722 = vmatmul.bf16.gmra.mxu1 %v3372_v6  ;;  %1098 = vmatpush.bf16.msrb.mxu0 %v4270_v23 }
  0x98   : > { %771 = vmatmul.bf16.gmra.mxu2 %v3372_v6  ;;  %1112 = vmatpush.bf16.msrb.mxu1 %v4272_v27 }
  0x99   : > { %820 = vmatmul.bf16.gmra.mxu3 %v3372_v6  ;;  %1126 = vmatpush.bf16.msrb.mxu2 %v4277_v31  ;;  %v3376_v6 = vld [vmem:[%s4196_s12 + $0x28] sm:$0xff]  ;;  %s1719_s12 = sadd.s32 2, %s4339_s13 }
  0x9a   : > { %1140 = vmatpush.bf16.msrb.mxu3 %v4274_v28 }
  0x9b   : > { %1099 = vmatpush.bf16.msrb.mxu0 %v4283_v36 }
  0x9c   : > { %1113 = vmatpush.bf16.msrb.mxu1 %v4285_v41 }
  0x9d   : > { %1127 = vmatpush.bf16.msrb.mxu2 %v4290_v46 }
  0x9e   : > { %1141 = vmatpush.bf16.msrb.mxu3 %v4287_v43 }
  0x9f   : > { %1100 = vmatpush.bf16.msrb.mxu0 %v4296_v55 }
  0xa0   : > { %1114 = vmatpush.bf16.msrb.mxu1 %v4298_v62 }
  0xa1   : > { %1128 = vmatpush.bf16.msrb.mxu2 %v4303_v3 }
  0xa2   : > { %1142 = vmatpush.bf16.msrb.mxu3 %v4300_v63 }
  0xa3   : > { %1101 = vmatpush.bf16.msrb.mxu0 %v4309_v11 }
  0xa4   : > { %1115 = vmatpush.bf16.msrb.mxu1 %v4311_v17 }
  0xa5   : > { %1129 = vmatpush.bf16.msrb.mxu2 %v4325_v24 }
  0xa6   : > { %678 = vmatmul.bf16.gmra.mxu0 %v3373_v19 }
  0xa7   : > { %727 = vmatmul.bf16.gmra.mxu1 %v3373_v19  ;;  %1311 = vmatpush.bf16.msra.mxu0 %v4220_v38 }
  0xa8   : > { %776 = vmatmul.bf16.gmra.mxu2 %v3373_v19  ;;  %1325 = vmatpush.bf16.msra.mxu1 %v4222_v42 }
  0xa9   : > { %825 = vmatmul.bf16.gmra.mxu3 %v3373_v19  ;;  %v4313_v19 = vor.u32 %v3340_v13, %v3168_v16  ;;  %1339 = vmatpush.bf16.msra.mxu2 %v4224_v48  ;;  %v4437_v13 = vstv %s2809_s11 }
  0xaa   : > { %5553 = vst [vmem:[#allocation39_spill] sm:$0xff] %v4437_v13  ;;  %vm2812_vm5 = vcmp.lt.s32.totalorder %v4437_v13, %v4360_v33 }
  0xab   : > { %5547 = vst [vmem:[#allocation33_spill] sm:$0xff] %v4313_v19  ;;  %1143 = vmatpush.bf16.msrb.mxu3 %v4313_v19  ;;  %1312 = vmatpush.bf16.msra.mxu0 %v4229_v50  ;;  %v2814_v22 = vsel %vm2812_vm5, 1, %v5480_v30 }
  0xac   : > { %1326 = vmatpush.bf16.msra.mxu1 %v4232_v53 }
  0xad   : > { %1340 = vmatpush.bf16.msra.mxu2 %v4235_v56 }
  0xaf   : > { %1353 = vmatpush.bf16.msra.mxu3 %v4227_v49  ;;  %1313 = vmatpush.bf16.msra.mxu0 %v4241_v61 }
  0xb0   : > { %1327 = vmatpush.bf16.msra.mxu1 %v4244_v0 }
  0xb1   : > { %1341 = vmatpush.bf16.msra.mxu2 %v4247_v4 }
  0xb3   : > { %1354 = vmatpush.bf16.msra.mxu3 %v4239_v60  ;;  %1314 = vmatpush.bf16.msra.mxu0 %v4257_v10 }
  0xb4   : > { %1328 = vmatpush.bf16.msra.mxu1 %v4259_v14 }
  0xb5   : > { %1342 = vmatpush.bf16.msra.mxu2 %v4264_v18 }
  0xb6   : > { %683 = vmatmul.bf16.gmra.mxu0 %v3374_v32 }
  0xb7   : > { %732 = vmatmul.bf16.gmra.mxu1 %v3374_v32  ;;  %1355 = vmatpush.bf16.msra.mxu3 %v4251_v5 }
  0xb8   : > { %781 = vmatmul.bf16.gmra.mxu2 %v3374_v32  ;;  %1315 = vmatpush.bf16.msra.mxu0 %v4270_v23 }
  0xb9   : > { %830 = vmatmul.bf16.gmra.mxu3 %v3374_v32  ;;  %1329 = vmatpush.bf16.msra.mxu1 %v4272_v27  ;;  %v1287_v32 = vsel %vm1285_vm0, 1, %v5480_v30 }
  0xba   : > { %1290 = vperm.xlu0 %3549, %v1287_v32   ;;  %1343 = vmatpush.bf16.msra.mxu2 %v4277_v31 }
  0xbb   : > { %1356 = vmatpush.bf16.msra.mxu3 %v4261_v15 }
  0xbc   : > { %1316 = vmatpush.bf16.msra.mxu0 %v4283_v36 }
  0xbd   : > { %1330 = vmatpush.bf16.msra.mxu1 %v4285_v41 }
  0xbe   : > { %1344 = vmatpush.bf16.msra.mxu2 %v4290_v46 }
  0xbf   : > { %1357 = vmatpush.bf16.msra.mxu3 %v4274_v28 }
  0xc0   : > { %1317 = vmatpush.bf16.msra.mxu0 %v4296_v55 }
  0xc1   : > { %1331 = vmatpush.bf16.msra.mxu1 %v4298_v62 }
  0xc2   : > { %1293 = vperm.xlu0 %3549, %v1288_v34   ;;  %1345 = vmatpush.bf16.msra.mxu2 %v4303_v3 }
  0xc3   : > { %1358 = vmatpush.bf16.msra.mxu3 %v4287_v43 }
  0xc4   : > { %1318 = vmatpush.bf16.msra.mxu0 %v4309_v11 }
  0xc5   : > { %1332 = vmatpush.bf16.msra.mxu1 %v4311_v17 }
  0xc6   : > { %688 = vmatmul.bf16.gmra.mxu0 %v3375_v47  ;;  %1346 = vmatpush.bf16.msra.mxu2 %v4325_v24 }
  0xc7   : > { %737 = vmatmul.bf16.gmra.mxu1 %v3375_v47  ;;  %1359 = vmatpush.bf16.msra.mxu3 %v4300_v63 }
  0xc8   : > { %786 = vmatmul.bf16.gmra.mxu2 %v3375_v47 }
  0xc9   : > { %835 = vmatmul.bf16.gmra.mxu3 %v3375_v47  ;;  %v1941_v47 = vsel %vm1939_vm2, 1, %v5480_v30 }
  0xca   : > { %1944 = vperm.xlu0 %3549, %v1941_v47  }
  0xcb   : > { %1360 = vmatpush.bf16.msra.mxu3 %v4313_v19 }
  0xd2   : > { %2165 = vperm.xlu0 %3549, %v2160_v59  }
  0xd6   : > { %693 = vmatmul.bf16.gmra.mxu0 %v3376_v6 }
  0xd7   : > { %742 = vmatmul.bf16.gmra.mxu1 %v3376_v6 }
  0xd8   : > { %791 = vmatmul.bf16.gmra.mxu2 %v3376_v6 }
  0xd9   : > { %840 = vmatmul.bf16.gmra.mxu3 %v3376_v6 }
  0xda   : > { %2598 = vperm.xlu0 %3549, %v2595_v9  }
  0xe2   : > { %2819 = vperm.xlu0 %3549, %v2814_v22  }
  0xe6   : > { %698 = vmatmul.bf16.gmra.mxu0 %v3377_v20 }
  0xe7   : > { %747 = vmatmul.bf16.gmra.mxu1 %v3377_v20 }
  0xe8   : > { %796 = vmatmul.bf16.gmra.mxu2 %v3377_v20 }
  0xe9   : > { %845 = vmatmul.bf16.gmra.mxu3 %v3377_v20 }
  0xf6   : > { %703 = vmatmul.bf16.gmra.mxu0 %v3378_v25 }
  0xf7   : > { %752 = vmatmul.bf16.gmra.mxu1 %v3378_v25 }
  0xf8   : > { %801 = vmatmul.bf16.gmra.mxu2 %v3378_v25 }
  0xf9   : > { %850 = vmatmul.bf16.gmra.mxu3 %v3378_v25 }
 0x103   : > { %v4381_v44 = vpop.f32.mrf.mxu0 }
 0x104   : > { %v4385_v45 = vpop.f32.mrf.mxu1 }
 0x106   : > { %1102 = vmatmul.bf16.vlgmr.msrb.gmra.mxu0 %v933_v39 }
 0x107   : > { %1116 = vmatmul.bf16.vlgmr.msrb.gmra.mxu1 %v933_v39  ;;  %1529 = vmatpush.bf16.msrb.mxu0 %v4220_v38 }
 0x108   : > { %1130 = vmatmul.bf16.vlgmr.msrb.gmra.mxu2 %v933_v39  ;;  %1543 = vmatpush.bf16.msrb.mxu1 %v4222_v42 }
 0x109   : > { %1144 = vmatmul.bf16.vlgmr.msrb.gmra.mxu3 %v933_v39  ;;  %1557 = vmatpush.bf16.msrb.mxu2 %v4224_v48 }
 0x10a   : > { %1571 = vmatpush.bf16.msrb.mxu3 %v4227_v49 }
 0x10b   : > { %v4392_v51 = vpop.f32.mrf.mxu2  ;;  %v4399_v57 = vpop.f32.mrf.mxu0  ;;  %1530 = vmatpush.bf16.msrb.mxu0 %v4229_v50 }
 0x10c   : > { %v4397_v54 = vpop.f32.mrf.mxu3  ;;  %v4403_v58 = vpop.f32.mrf.mxu1  ;;  %1544 = vmatpush.bf16.msrb.mxu1 %v4232_v53 }
 0x10d   : > { %1558 = vmatpush.bf16.msrb.mxu2 %v4235_v56 }
 0x10e   : > { %1572 = vmatpush.bf16.msrb.mxu3 %v4239_v60 }
 0x10f   : > { %1531 = vmatpush.bf16.msrb.mxu0 %v4241_v61 }
 0x110   : > { %1545 = vmatpush.bf16.msrb.mxu1 %v4244_v0 }
 0x111   : > { %1559 = vmatpush.bf16.msrb.mxu2 %v4247_v4 }
 0x112   : > { %1573 = vmatpush.bf16.msrb.mxu3 %v4251_v5 }
 0x113   : > { %v4413_v1 = vpop.f32.mrf.mxu2  ;;  %v4421_v7 = vpop.f32.mrf.mxu0  ;;  %1532 = vmatpush.bf16.msrb.mxu0 %v4257_v10 }
 0x114   : > { %v4419_v6 = vpop.f32.mrf.mxu3  ;;  %5550 = vst [vmem:[#allocation36_spill] sm:$0xff] %v4421_v7  ;;  %v4425_v8 = vpop.f32.mrf.mxu1  ;;  %1546 = vmatpush.bf16.msrb.mxu1 %v4259_v14 }
 0x115   : > { %5551 = vst [vmem:[#allocation37_spill] sm:$0xff] %v4425_v8  ;;  %1560 = vmatpush.bf16.msrb.mxu2 %v4264_v18 }
 0x116   : > { %1574 = vmatpush.bf16.msrb.mxu3 %v4261_v15 }
 0x117   : > { %1533 = vmatpush.bf16.msrb.mxu0 %v4270_v23 }
 0x118   : > { %1547 = vmatpush.bf16.msrb.mxu1 %v4272_v27 }
 0x119   : > { %1561 = vmatpush.bf16.msrb.mxu2 %v4277_v31 }
 0x11a   : > { %1575 = vmatpush.bf16.msrb.mxu3 %v4274_v28 }
 0x11b   : > { %v4435_v12 = vpop.f32.mrf.mxu2  ;;  %v4443_v20 = vpop.f32.mrf.mxu0  ;;  %1534 = vmatpush.bf16.msrb.mxu0 %v4283_v36 }
 0x11c   : > { %5552 = vst [vmem:[#allocation38_spill] sm:$0xff] %v4435_v12  ;;  %v4441_v16 = vpop.f32.mrf.mxu3  ;;  %v4447_v21 = vpop.f32.mrf.mxu1  ;;  %1548 = vmatpush.bf16.msrb.mxu1 %v4285_v41 }
 0x11d   : > { %5554 = vst [vmem:[#allocation40_spill] sm:$0xff] %v4441_v16  ;;  %1562 = vmatpush.bf16.msrb.mxu2 %v4290_v46 }
 0x11e   : > { %5555 = vst [vmem:[#allocation41_spill] sm:$0xff] %v4443_v20  ;;  %1576 = vmatpush.bf16.msrb.mxu3 %v4287_v43 }
 0x11f   : > { %5556 = vst [vmem:[#allocation42_spill] sm:$0xff] %v4447_v21  ;;  %1535 = vmatpush.bf16.msrb.mxu0 %v4296_v55 }
 0x120   : > { %1549 = vmatpush.bf16.msrb.mxu1 %v4298_v62 }
 0x121   : > { %1563 = vmatpush.bf16.msrb.mxu2 %v4303_v3 }
 0x122   : > { %1577 = vmatpush.bf16.msrb.mxu3 %v4300_v63 }
 0x123   : > { %v4456_v25 = vpop.f32.mrf.mxu2  ;;  %v4462_v32 = vpop.f32.mrf.mxu0  ;;  %1536 = vmatpush.bf16.msrb.mxu0 %v4309_v11 }
 0x124   : > { %5557 = vst [vmem:[#allocation43_spill] sm:$0xff] %v4456_v25  ;;  %v4460_v29 = vpop.f32.mrf.mxu3  ;;  %v4464_v34 = vpop.f32.mrf.mxu1  ;;  %1550 = vmatpush.bf16.msrb.mxu1 %v4311_v17 }
 0x125   : > { %5558 = vst [vmem:[#allocation44_spill] sm:$0xff] %v4460_v29  ;;  %1564 = vmatpush.bf16.msrb.mxu2 %v4325_v24  ;;  %v5611_v24 = vmov 0  }
 0x126   : > { %5559 = vst [vmem:[#allocation45_spill] sm:$0xff] %v4462_v32  ;;  %1578 = vmatpush.bf16.msrb.mxu3 %v4313_v19 }
 0x127   : > { %5560 = vst [vmem:[#allocation46_spill] sm:$0xff] %v4464_v34 }
 0x12b   : > { %v4470_v39 = vpop.f32.mrf.mxu2  ;;  %v4474_v59 = vpop.f32.mrf.mxu0 }
 0x12c   : > { %5561 = vst [vmem:[#allocation47_spill] sm:$0xff] %v4470_v39  ;;  %v4472_v47 = vpop.f32.mrf.mxu3  ;;  %v4476_v9 = vpop.f32.mrf.mxu1 }
 0x12d   : > { %5562 = vst [vmem:[#allocation48_spill] sm:$0xff] %v4472_v47 }
 0x12e   : > { %5563 = vst [vmem:[#allocation49_spill] sm:$0xff] %v4474_v59 }
 0x12f   : > { %5564 = vst [vmem:[#allocation50_spill] sm:$0xff] %v4476_v9 }
 0x133   : > { %v4478_v22 = vpop.f32.mrf.mxu2  ;;  %v4482_v34 = vpop.f32.mrf.mxu0 }
 0x134   : > { %5565 = vst [vmem:[#allocation51_spill] sm:$0xff] %v4478_v22  ;;  %v4480_v30 = vpop.f32.mrf.mxu3  ;;  %v4484_v32 = vpop.f32.mrf.mxu1 }
 0x135   : > { %5566 = vst [vmem:[#allocation52_spill] sm:$0xff] %v4480_v30 }
 0x136   : > { %5567 = vst [vmem:[#allocation53_spill] sm:$0xff] %v4482_v34 }
 0x137   : > { %5568 = vst [vmem:[#allocation54_spill] sm:$0xff] %v4484_v32 }
 0x13b   : > { %v4486_v13 = vpop.f32.mrf.mxu2  ;;  %v4490_v25 = vpop.f32.mrf.mxu0 }
 0x13c   : > { %5569 = vst [vmem:[#allocation55_spill] sm:$0xff] %v4486_v13  ;;  %v4488_v52 = vpop.f32.mrf.mxu3  ;;  %v4492_v39 = vpop.f32.mrf.mxu1 }
 0x13d   : > { %5570 = vst [vmem:[#allocation56_spill] sm:$0xff] %v4488_v52 }
 0x13e   : > { %5571 = vst [vmem:[#allocation57_spill] sm:$0xff] %v4490_v25 }
 0x13f   : > { %5572 = vst [vmem:[#allocation58_spill] sm:$0xff] %v4492_v39 }
 0x143   : > { %v4494_v47 = vpop.f32.mrf.mxu2  ;;  %v4498_v9 = vpop.f32.mrf.mxu0 }
 0x144   : > { %5573 = vst [vmem:[#allocation59_spill] sm:$0xff] %v4494_v47  ;;  %v4496_v59 = vpop.f32.mrf.mxu3  ;;  %v4500_v22 = vpop.f32.mrf.mxu1 }
 0x145   : > { %5574 = vst [vmem:[#allocation60_spill] sm:$0xff] %v4496_v59 }
 0x146   : > { %5575 = vst [vmem:[#allocation61_spill] sm:$0xff] %v4498_v9 }
 0x147   : > { %5576 = vst [vmem:[#allocation62_spill] sm:$0xff] %v4500_v22 }
 0x14b   : > { %v4502_v30 = vpop.f32.mrf.mxu2  ;;  %v4506_v32 = vpop.f32.mrf.mxu0 }
 0x14c   : > { %5577 = vst [vmem:[#allocation63_spill] sm:$0xff] %v4502_v30  ;;  %v4504_v34 = vpop.f32.mrf.mxu3  ;;  %v4508_v13 = vpop.f32.mrf.mxu1 }
 0x14d   : > { %5578 = vst [vmem:[#allocation64_spill] sm:$0xff] %v4504_v34 }
 0x14e   : > { %5579 = vst [vmem:[#allocation65_spill] sm:$0xff] %v4506_v32 }
 0x14f   : > { %5580 = vst [vmem:[#allocation66_spill] sm:$0xff] %v4508_v13 }
 0x153   : > { %v4510_v52 = vpop.f32.mrf.mxu2  ;;  %v4514_v39 = vpop.f32.mrf.mxu0 }
 0x154   : > { %5581 = vst [vmem:[#allocation67_spill] sm:$0xff] %v4510_v52  ;;  %v4512_v25 = vpop.f32.mrf.mxu3  ;;  %v4516_v47 = vpop.f32.mrf.mxu1 }
 0x155   : > { %5582 = vst [vmem:[#allocation68_spill] sm:$0xff] %v4512_v25 }
 0x156   : > { %5583 = vst [vmem:[#allocation69_spill] sm:$0xff] %v4514_v39 }
 0x157   : > { %5584 = vst [vmem:[#allocation70_spill] sm:$0xff] %v4516_v47 }
 0x15b   : > { %v4518_v59 = vpop.f32.mrf.mxu2  ;;  %v4522_v22 = vpop.f32.mrf.mxu0 }
 0x15c   : > { %5585 = vst [vmem:[#allocation71_spill] sm:$0xff] %v4518_v59  ;;  %v4520_v9 = vpop.f32.mrf.mxu3  ;;  %v4524_v30 = vpop.f32.mrf.mxu1 }
 0x15d   : > { %5586 = vst [vmem:[#allocation72_spill] sm:$0xff] %v4520_v9 }
 0x15e   : > { %5587 = vst [vmem:[#allocation73_spill] sm:$0xff] %v4522_v22 }
 0x15f   : > { %5588 = vst [vmem:[#allocation74_spill] sm:$0xff] %v4524_v30 }
 0x163   : > { %v4526_v34 = vpop.f32.mrf.mxu2  ;;  %v4530_v13 = vpop.f32.mrf.mxu0 }
 0x164   : > { %5589 = vst [vmem:[#allocation75_spill] sm:$0xff] %v4526_v34  ;;  %v4528_v32 = vpop.f32.mrf.mxu3  ;;  %v4532_v52 = vpop.f32.mrf.mxu1 }
 0x165   : > { %5590 = vst [vmem:[#allocation76_spill] sm:$0xff] %v4528_v32 }
 0x166   : > { %5591 = vst [vmem:[#allocation77_spill] sm:$0xff] %v4530_v13 }
 0x167   : > { %5592 = vst [vmem:[#allocation78_spill] sm:$0xff] %v4532_v52 }
 0x16b   : > { %v4534_v25 = vpop.f32.mrf.mxu2  ;;  %v4538_v47 = vpop.f32.mrf.mxu0 }
 0x16c   : > { %5593 = vst [vmem:[#allocation79_spill] sm:$0xff] %v4534_v25  ;;  %v4536_v39 = vpop.f32.mrf.mxu3  ;;  %v4540_v59 = vpop.f32.mrf.mxu1  ;;  %v442_v25 = vld [vmem:[%s5472_s5] sm:$0xf] }
 0x16d   : > { %5594 = vst [vmem:[#allocation80_spill] sm:$0xff] %v4536_v39  ;;  %v4573_v12 = vperm.slane %v442_v25, 3 }
 0x16e   : > { %5595 = vst [vmem:[#allocation81_spill] sm:$0xff] %v4538_v47 }
 0x16f   : > { %5596 = vst [vmem:[#allocation82_spill] sm:$0xff] %v4540_v59  ;;  %v4561_v59 = vperm.slane %v442_v25, 0 }
 0x170   : > { %5609 = vst [vmem:[#allocation95_spill] sm:$0xff] %v4573_v12 }
 0x171   : > { %5605 = vst [vmem:[#allocation91_spill] sm:$0xff] %v4561_v59 }
 0x173   : > { %v4542_v9 = vpop.f32.mrf.mxu2  ;;  %v4546_v30 = vpop.f32.mrf.mxu0 }
 0x174   : > { %5597 = vst [vmem:[#allocation83_spill] sm:$0xff] %v4542_v9  ;;  %v4544_v22 = vpop.f32.mrf.mxu3  ;;  %v4548_v34 = vpop.f32.mrf.mxu1  ;;  %v4563_v9 = vperm.slane %v442_v25, 1 }
 0x175   : > { %5598 = vst [vmem:[#allocation84_spill] sm:$0xff] %v4544_v22 }
 0x176   : > { %5599 = vst [vmem:[#allocation85_spill] sm:$0xff] %v4546_v30  ;;  %v670_v30 = vadd.f32 %v4381_v44, %v4561_v59  ;;  %v817_v44 = vadd.f32 %v4397_v54, %v4573_v12 }
 0x177   : > { %5600 = vst [vmem:[#allocation86_spill] sm:$0xff] %v4548_v34 }
 0x178   : > { %5606 = vst [vmem:[#allocation92_spill] sm:$0xff] %v4563_v9 }
 0x17b   : > { %v4550_v32 = vpop.f32.mrf.mxu2  ;;  %v4557_v39 = vpop.f32.mrf.mxu0 }
 0x17c   : > { %5601 = vst [vmem:[#allocation87_spill] sm:$0xff] %v4550_v32  ;;  %v4555_v52 = vpop.f32.mrf.mxu3  ;;  %v4559_v47 = vpop.f32.mrf.mxu1  ;;  %v719_v32 = vadd.f32 %v4385_v45, %v4563_v9  ;;  %v672_v45 = vadd.f32 %v4399_v57, %v4561_v59 }
 0x17d   : > { %5602 = vst [vmem:[#allocation88_spill] sm:$0xff] %v4555_v52 }
 0x17e   : > { %5603 = vst [vmem:[#allocation89_spill] sm:$0xff] %v4557_v39 }
 0x17f   : > { %5604 = vst [vmem:[#allocation90_spill] sm:$0xff] %v4559_v47 }
 0x183   : > { %v1103_v22 = vpop.f32.mrf.mxu0  ;;  %v4571_v52 = vpop.f32.mrf.mxu2 }
 0x184   : > { %v4569_v34 = vpop.f32.mrf.mxu3  ;;  %v1150_v13 = vadd.f32 %v1103_v22, %v670_v30  ;;  %v1117_v29 = vpop.f32.mrf.mxu1  ;;  %5608 = vst [vmem:[#allocation94_spill] sm:$0xff] %v4571_v52 }
 0x185   : > { %5607 = vst [vmem:[#allocation93_spill] sm:$0xff] %v4569_v34  ;;  %v1151_v39 = vadd.f32 %v1117_v29, %v719_v32  ;;  %v721_v34 = vadd.f32 %v4403_v58, %v4563_v9  ;;  %v4581_v32 = vperm.slane %v442_v25, 2 }
 0x186   : > { %v3284_v47 = vmul.f32 -1.442695, %v1150_v13 }
 0x187   : > { %v3286_v21 = vmul.f32 -1.442695, %v1151_v39  ;;  %5610 = vst [vmem:[#allocation96_spill] sm:$0xff] %v4581_v32  ;;  %v768_v58 = vadd.f32 %v4392_v51, %v4581_v32 }
 0x188   : > { %3552 = vpow2.f32 %v3284_v47 }
 0x189   : > { %3554 = vpow2.f32 %v3286_v21 }
 0x18b   : > { %v1105_v22 = vpop.f32.mrf.mxu0  ;;  %v1131_v8 = vpop.f32.mrf.mxu2 }
 0x18c   : > { %v1145_v30 = vpop.f32.mrf.mxu3  ;;  %v1154_v52 = vadd.f32 %v1105_v22, %v672_v45  ;;  %v1119_v29 = vpop.f32.mrf.mxu1  ;;  %v1152_v25 = vadd.f32 %v1131_v8, %v768_v58 }
 0x18d   : > { %v1153_v20 = vadd.f32 %v1145_v30, %v817_v44  ;;  %v1155_v13 = vadd.f32 %v1119_v29, %v721_v34  ;;  %v819_v44 = vadd.f32 %v4419_v6, %v4573_v12 }
 0x18e   : > { %v3553_v39 = vpop.eup %3552  ;;  %v3285_v54 = vmul.f32 -1.442695, %v1154_v52 }
 0x18f   : > { %v3288_v47 = vmul.f32 -1.442695, %v1153_v20  ;;  %v3555_v21 = vpop.eup %3554  ;;  %v1164_v16 = vadd.f32 1.0, %v3553_v39  ;;  %v3287_v57 = vmul.f32 -1.442695, %v1155_v13  ;;  %v770_v39 = vadd.f32 %v4413_v1, %v4581_v32 }
 0x190   : > { %v1202_v7 = vadd.f32 1.0, %v3555_v21 }
 0x191   : > { %3556 = vpow2.f32 %v3288_v47  ;;  %vm1171_vm8 = vweird.f32 %v1164_v16 }
 0x192   : > { %3558 = vrcp.f32 %v1164_v16  ;;  %vm1209_vm9 = vweird.f32 %v1202_v7 }
 0x193   : > { %3560 = vrcp.f32 %v1202_v7  ;;  %v1133_v8 = vpop.f32.mrf.mxu2 }
 0x194   : > { %3562 = vpow2.f32 %v3285_v54  ;;  %v1147_v34 = vpop.f32.mrf.mxu3  ;;  %v1175_v54 = vand.u32 2147483647, %v1164_v16  ;;  %v1156_v1 = vadd.f32 %v1133_v8, %v770_v39  ;;  %v4604_v8 = vld [vmem:[#allocation4 + $0x8] sm:$0xff] }
 0x195   : > { %3564 = vpow2.f32 %v3287_v57  ;;  %v1157_v20 = vadd.f32 %v1147_v34, %v819_v44  ;;  %v1177_v57 = vand.u32 2147483648, %v1164_v16  ;;  %v1213_v34 = vand.u32 2147483647, %v1202_v7 }
 0x196   : > { %3566 = vtanh.f32 %v1152_v25  ;;  %v1215_v25 = vand.u32 2147483648, %v1202_v7  ;;  %vm1176_vm10 = vcmp.eq.f32.partialorder %v1175_v54, 8.507059e+37  ;;  %v4608_v54 = vpop.permute.xlu0 %1290 }
 0x197   : > { %v3557_v45 = vpop.eup %3556  ;;  %v3289_v30 = vmul.f32 -1.442695, %v1157_v20  ;;  %vm1214_vm13 = vcmp.eq.f32.partialorder %v1213_v34, 8.507059e+37  ;;  %vm1295_vm15 = vcmp.eq.s32.totalorder %v4608_v54, 1  ;;  %v5616_v54 = vld [vmem:[#allocation29_spill] sm:$0xff] }
 0x198   : > { %v3559_v22 = vpop.eup %3558  ;;  %v4587_v52 = vadd.f32 1.0, %v3557_v45 }
 0x199   : > { %v3561_v29 = vpop.eup %3560  ;;  %v1167_v13 = vmul.f32 %v3559_v22, %v1164_v16  ;;  %3568 = vpow2.f32 %v3289_v30  ;;  %vm1172_vm6 = vweird.f32 %v3559_v22 }
 0x19a   : > { %v3563_v51 = vpop.eup %3562  ;;  %v1205_v6 = vmul.f32 %v3561_v29, %v1202_v7  ;;  %3570 = vrcp.f32 %v4587_v52  ;;  %vm1210_vm7 = vweird.f32 %v3561_v29  ;;  %vm1173_vm11 = vmor %vm1171_vm8, %vm1172_vm6  ;;  %v1255_v9 = vand.u32 2147483648, %v4587_v52 }
 0x19b   : > { %v3565_v47 = vpop.eup %3564  ;;  %v1168_v21 = vsub.f32 1.0, %v1167_v13  ;;  %v4592_v58 = vadd.f32 1.0, %v3563_v51  ;;  %vm1211_vm12 = vmor %vm1209_vm9, %vm1210_vm7  ;;  %vm1249_vm14 = vweird.f32 %v4587_v52 }
 0x19c   : > { %v1206_v44 = vsub.f32 1.0, %v1205_v6  ;;  %v4594_v20 = vadd.f32 1.0, %v3565_v47  ;;  %v3567_v30 = vpop.eup %3566  ;;  %v1178_v6 = vor.u32 1.1754944e-38, %v1177_v57  ;;  %v1216_v47 = vor.u32 1.1754944e-38, %v1215_v25 }
 0x19d   : > { %v1169_v45 = vmul.f32 %v3559_v22, %v1168_v21  ;;  %3572 = vrcp.f32 %v4592_v58  ;;  %vm1186_vm6 = vweird.f32 %v4592_v58 }
 0x19e   : > { %v1207_v32 = vmul.f32 %v3561_v29, %v1206_v44  ;;  %3574 = vrcp.f32 %v4594_v20  ;;  %v1228_v19 = vand.u32 2147483647, %v4594_v20  ;;  %vm1224_vm4 = vweird.f32 %v4594_v20 }
 0x19f   : > { %v3569_v13 = vpop.eup %3568  ;;  %v1170_v51 = vadd.f32 %v3559_v22, %v1169_v45  ;;  %3576 = vtanh.f32 %v1156_v1  ;;  %v1256_v1 = vor.u32 1.1754944e-38, %v1255_v9 }
 0x1a0   : > { %v4598_v12 = vpop.eup %3570  ;;  %v1208_v21 = vadd.f32 %v3561_v29, %v1207_v32  ;;  %v4602_v39 = vadd.f32 1.0, %v3569_v13  ;;  %v1253_v32 = vand.u32 2147483647, %v4587_v52 }
 0x1a1   : > { %v1174_v16 = vsel %vm1173_vm11, %v3559_v22, %v1170_v51  ;;  %v1245_v7 = vmul.f32 %v4598_v12, %v4587_v52  ;;  %vm1250_vm0 = vweird.f32 %v4598_v12 }
 0x1a2   : > { %v1179_v57 = vsel %vm1176_vm10, %v1178_v6, %v1174_v16  ;;  %v1212_v44 = vsel %vm1211_vm12, %v3561_v29, %v1208_v21  ;;  %3578 = vrcp.f32 %v4602_v39  ;;  %v1230_v29 = vand.u32 2147483648, %v4594_v20  ;;  %vm4629_vm3 = vmor %vm1249_vm14, %vm1250_vm0 }
 0x1a3   : > { %v3573_v25 = vpop.eup %3572  ;;  %v1217_v45 = vsel %vm1214_vm13, %v1216_v47, %v1212_v44  ;;  %v1276_v13 = vmul.f32 %v3567_v30, %v1179_v57  ;;  %v1246_v59 = vsub.f32 1.0, %v1245_v7  ;;  %v1190_v16 = vand.u32 2147483647, %v4592_v58 }
 0x1a4   : > { %v3575_v22 = vpop.eup %3574  ;;  %v1274_v34 = vmul.f32 %v1217_v45, %v4604_v8  ;;  %v1182_v51 = vmul.f32 %v3573_v25, %v4592_v58  ;;  %v1192_v30 = vand.u32 2147483648, %v4592_v58  ;;  %v1502_v57 = vstv %s1501_s10 }
 0x1a5   : > { %v1247_v6 = vmul.f32 %v4598_v12, %v1246_v59  ;;  %v1220_v21 = vmul.f32 %v3575_v22, %v4594_v20  ;;  %v3577_v44 = vpop.eup %3576  ;;  %vm1503_vm1 = vcmp.lt.s32.totalorder %v1502_v57, %v4346_v26  ;;  %vm1187_vm2 = vweird.f32 %v3573_v25  ;;  %v924_v20 = vld [vmem:[#allocation4] sm:$0xff] }
 0x1a6   : > { %v1278_v47 = vadd.f32 %v1276_v13, %v1274_v34  ;;  %v1183_v7 = vsub.f32 1.0, %v1182_v51  ;;  %v1505_v17 = vsel %vm1503_vm1, 1, %v5611_v24  ;;  %vm1225_vm5 = vweird.f32 %v3575_v22  ;;  %vm1188_vm8 = vmor %vm1186_vm6, %vm1187_vm2 }
 0x1a7   : > { %v1248_v9 = vadd.f32 %v4598_v12, %v1247_v6  ;;  %v1221_v45 = vsub.f32 1.0, %v1220_v21  ;;  %1508 = vperm.xlu1 %3550, %v1505_v17   ;;  %vm1504_vm7 = vcmp.lt.s32.totalorder %v1502_v57, %v4360_v33  ;;  %v1231_v52 = vor.u32 1.1754944e-38, %v1230_v29  ;;  %vm1226_vm10 = vmor %vm1224_vm4, %vm1225_vm5 }
 0x1a8   : > { %3580 = vtanh.f32 %v1278_v47  ;;  %v1184_v59 = vmul.f32 %v3573_v25, %v1183_v7  ;;  %v3579_v11 = vpop.eup %3578  ;;  %v1193_v7 = vor.u32 1.1754944e-38, %v1192_v30  ;;  %vm1254_vm9 = vcmp.eq.f32.partialorder %v1253_v32, 8.507059e+37  ;;  %v1294_v32 = vpop.permute.xlu0 %1293 }
 0x1a9   : > { %v1222_v34 = vmul.f32 %v3575_v22, %v1221_v45  ;;  %v1260_v6 = vmul.f32 %v3579_v11, %v4602_v39  ;;  %v1252_v21 = vsel %vm4629_vm3, %v4598_v12, %v1248_v9  ;;  %vm1191_vm11 = vcmp.eq.f32.partialorder %v1190_v16, 8.507059e+37 }
 0x1aa   : > { %v1185_v51 = vadd.f32 %v3573_v25, %v1184_v59  ;;  %vm1229_vm12 = vcmp.eq.f32.partialorder %v1228_v19, 8.507059e+37  ;;  %v1257_v3 = vsel %vm1254_vm9, %v1256_v1, %v1252_v21  ;;  %v1506_v62 = vsel %vm1504_vm7, 1, %v5611_v24  ;;  %v5617_v21 = vld [vmem:[#allocation31_spill] sm:$0xff] }
 0x1ab   : > { %v1223_v63 = vadd.f32 %v3575_v22, %v1222_v34  ;;  %v1261_v17 = vsub.f32 1.0, %v1260_v6  ;;  %v4644_v29 = vsel %vm1295_vm15, %v1278_v47, %v4604_v8  ;;  %vm1296_vm13 = vcmp.eq.s32.totalorder %v1294_v32, 1 }
 0x1ac   : > { %v1189_v45 = vsel %vm1188_vm8, %v3573_v25, %v1185_v51  ;;  %vm1265_vm14 = vweird.f32 %v3579_v11  ;;  %vm1940_vm0 = vcmp.lt.s32.totalorder %v4378_v40, %v4360_v33  ;;  %vm1264_vm1 = vweird.f32 %v4602_v39 }
 0x1ad   : > { %v1194_v58 = vsel %vm1191_vm11, %v1193_v7, %v1189_v45  ;;  %v1227_v59 = vsel %vm1226_vm10, %v3575_v22, %v1223_v63  ;;  %v1262_v57 = vmul.f32 %v3579_v11, %v1261_v17  ;;  %v1270_v22 = vand.u32 2147483648, %v4602_v39  ;;  %vm1266_vm2 = vmor %vm1264_vm1, %vm1265_vm14  ;;  %v5619_v7 = vld [vmem:[#allocation34_spill] sm:$0xff]  ;;  %v5621_v45 = vld [vmem:[#allocation91_spill] sm:$0xff] }
 0x1ae   : > { %v3581_v13 = vpop.eup %3580  ;;  %v1232_v12 = vsel %vm1229_vm12, %v1231_v52, %v1227_v59  ;;  %v1277_v9 = vmul.f32 %v3577_v44, %v1194_v58  ;;  %v1268_v8 = vand.u32 2147483647, %v4602_v39  ;;  %v4656_v47 = vstv %s2373_s14  ;;  %v5618_v52 = vld [vmem:[#allocation32_spill] sm:$0xff] }
 0x1af   : > { %v1275_v25 = vmul.f32 %v1232_v12, %v924_v20  ;;  %v1282_v16 = vmul.f32 %v3581_v13, %v1257_v3  ;;  %1511 = vperm.xlu1 %3550, %v1506_v62   ;;  %v1263_v63 = vadd.f32 %v3579_v11, %v1262_v57  ;;  %v1942_v62 = vsel %vm1940_vm0, 1, %v5611_v24  ;;  %v5622_v17 = vld [vmem:[#allocation36_spill] sm:$0xff]  ;;  %v5624_v13 = vld [vmem:[#allocation37_spill] sm:$0xff] }
 0x1b0   : > { %v1271_v30 = vor.u32 1.1754944e-38, %v1270_v22  ;;  %vm1269_vm3 = vcmp.eq.f32.partialorder %v1268_v8, 8.507059e+37  ;;  %vm2375_vm4 = vcmp.lt.s32.totalorder %v4656_v47, %v4346_v26  ;;  %v675_v58 = vadd.f32 %v5622_v17, %v5621_v45  ;;  %v5623_v59 = vld [vmem:[#allocation92_spill] sm:$0xff] }
 0x1b1   : > { %v1279_v19 = vadd.f32 %v1277_v9, %v1275_v25  ;;  %v1267_v3 = vsel %vm1266_vm2, %v3579_v11, %v1263_v63  ;;  %v4663_v39 = vsel %vm1295_vm15, %v1282_v16, %v4371_v35  ;;  %v2377_v6 = vsel %vm2375_vm4, 1, %v5611_v24  ;;  %v5625_v63 = vld [vmem:[#allocation95_spill] sm:$0xff]  ;;  %v5626_v22 = vld [vmem:[#allocation40_spill] sm:$0xff] }
 0x1b2   : > { %v1272_v34 = vsel %vm1269_vm3, %v1271_v30, %v1267_v3  ;;  %vm2594_vm15 = vcmp.lt.s32.totalorder %v4415_v2, %v4360_v33  ;;  %v5615_v2 = vld [vmem:[#allocation30_spill] sm:$0xff]  ;;  %v724_v12 = vadd.f32 %v5624_v13, %v5623_v59  ;;  %v822_v8 = vadd.f32 %v5626_v22, %v5625_v63  ;;  %v5627_v3 = vld [vmem:[#allocation41_spill] sm:$0xff] }
 0x1b3   : > { %3582 = vtanh.f32 %v1279_v19  ;;  %v4650_v1 = vsel %vm1296_vm13, %v1279_v19, %v924_v20  ;;  %v2596_v35 = vsel %vm2594_vm15, 1, %v5611_v24  ;;  %v5620_v20 = vld [vmem:[#allocation33_spill] sm:$0xff]  ;;  %v5628_v30 = vld [vmem:[#allocation42_spill] sm:$0xff] }
 0x1b4   : > { %v5630_v22 = vld [vmem:[#allocation38_spill] sm:$0xff] }
 0x1b7   : > { %1947 = vperm.xlu1 %3550, %v1942_v62   ;;  %v677_v62 = vadd.f32 %v5627_v3, %v5621_v45 }
 0x1b9   : > { %v3583_v44 = vpop.eup %3582 }
 0x1ba   : > { %v1283_v40 = vmul.f32 %v3583_v44, %v1272_v34  ;;  %v726_v44 = vadd.f32 %v5628_v30, %v5623_v59  ;;  %v5631_v30 = vld [vmem:[#allocation44_spill] sm:$0xff] }
 0x1bc   : > { %v4667_v11 = vsel %vm1296_vm13, %v1283_v40, %v4373_v37  ;;  %v5614_v37 = vld [vmem:[#allocation28_spill] sm:$0xff] }
 0x1bd   : > { %v1310_v51 = vpack.c.bf16 %v4667_v11, %v4663_v39 }
 0x1bf   : > { %1319 = vmatmul.bf16.vlgmr.msra.gmra.mxu0 %v1310_v51  ;;  %1333 = vmatmul.bf16.vlgmr.msra.gmra.mxu1 %v1310_v51 }
 0x1c0   : > { %1347 = vmatmul.bf16.vlgmr.msra.gmra.mxu2 %v1310_v51  ;;  %1361 = vmatmul.bf16.vlgmr.msra.gmra.mxu3 %v1310_v51 }
 0x1c1   : > { %2380 = vperm.xlu1 %3550, %v2377_v6   ;;  %1747 = vmatpush.bf16.msra.mxu0 %v4220_v38 }
 0x1c2   : > { %1761 = vmatpush.bf16.msra.mxu1 %v4222_v42  ;;  %1775 = vmatpush.bf16.msra.mxu2 %v4224_v48 }
 0x1c3   : > { %1789 = vmatpush.bf16.msra.mxu3 %v4227_v49 }
 0x1c5   : > { %1748 = vmatpush.bf16.msra.mxu0 %v4229_v50 }
 0x1c6   : > { %1762 = vmatpush.bf16.msra.mxu1 %v4232_v53  ;;  %1776 = vmatpush.bf16.msra.mxu2 %v4235_v56 }
 0x1c7   : > { %1790 = vmatpush.bf16.msra.mxu3 %v4239_v60 }
 0x1c9   : > { %2601 = vperm.xlu1 %3550, %v2596_v35   ;;  %1749 = vmatpush.bf16.msra.mxu0 %v4241_v61 }
 0x1ca   : > { %1763 = vmatpush.bf16.msra.mxu1 %v4244_v0  ;;  %1777 = vmatpush.bf16.msra.mxu2 %v4247_v4 }
 0x1cb   : > { %1791 = vmatpush.bf16.msra.mxu3 %v4251_v5 }
 0x1cd   : > { %1750 = vmatpush.bf16.msra.mxu0 %v4257_v10 }
 0x1ce   : > { %1764 = vmatpush.bf16.msra.mxu1 %v4259_v14  ;;  %1778 = vmatpush.bf16.msra.mxu2 %v4264_v18 }
 0x1cf   : > { %1792 = vmatpush.bf16.msra.mxu3 %v4261_v15 }
 0x1d1   : > { %1751 = vmatpush.bf16.msra.mxu0 %v4270_v23 }
 0x1d2   : > { %1765 = vmatpush.bf16.msra.mxu1 %v4272_v27  ;;  %1779 = vmatpush.bf16.msra.mxu2 %v4277_v31 }
 0x1d3   : > { %1793 = vmatpush.bf16.msra.mxu3 %v4274_v28 }
 0x1d5   : > { %1752 = vmatpush.bf16.msra.mxu0 %v4283_v36 }
 0x1d6   : > { %1766 = vmatpush.bf16.msra.mxu1 %v4285_v41  ;;  %1780 = vmatpush.bf16.msra.mxu2 %v4290_v46 }
 0x1d7   : > { %1794 = vmatpush.bf16.msra.mxu3 %v4287_v43 }
 0x1d9   : > { %1753 = vmatpush.bf16.msra.mxu0 %v4296_v55 }
 0x1da   : > { %1767 = vmatpush.bf16.msra.mxu1 %v5614_v37  ;;  %1781 = vmatpush.bf16.msra.mxu2 %v5615_v2 }
 0x1db   : > { %1795 = vmatpush.bf16.msra.mxu3 %v5616_v54 }
 0x1dd   : > { %1754 = vmatpush.bf16.msra.mxu0 %v5617_v21 }
 0x1de   : > { %1768 = vmatpush.bf16.msra.mxu1 %v5618_v52  ;;  %1782 = vmatpush.bf16.msra.mxu2 %v5619_v7 }
 0x1df   : > { %1796 = vmatpush.bf16.msra.mxu3 %v5620_v20 }
 0x23c   : > { %v1320_v9 = vpop.f32.mrf.mxu0  ;;  %v1334_v57 = vpop.f32.mrf.mxu1 }
 0x23d   : > { %v1367_v32 = vadd.f32 %v1320_v9, %v675_v58  ;;  %v1368_v25 = vadd.f32 %v1334_v57, %v724_v12 }
 0x23f   : > { %v3290_v16 = vmul.f32 -1.442695, %v1367_v32  ;;  %v3292_v19 = vmul.f32 -1.442695, %v1368_v25 }
 0x241   : > { %3584 = vpow2.f32 %v3290_v16 }
 0x242   : > { %3586 = vpow2.f32 %v3292_v19  ;;  %v5629_v19 = vld [vmem:[#allocation96_spill] sm:$0xff] }
 0x243   : > { %v1362_v34 = vpop.f32.mrf.mxu3  ;;  %v1348_v58 = vpop.f32.mrf.mxu2  ;;  %v773_v3 = vadd.f32 %v5630_v22, %v5629_v19 }
 0x244   : > { %v1370_v40 = vadd.f32 %v1362_v34, %v822_v8  ;;  %v1322_v51 = vpop.f32.mrf.mxu0  ;;  %v1336_v6 = vpop.f32.mrf.mxu1 }
 0x245   : > { %v1371_v35 = vadd.f32 %v1322_v51, %v677_v62  ;;  %v1372_v17 = vadd.f32 %v1336_v6, %v726_v44  ;;  %v824_v62 = vadd.f32 %v5631_v30, %v5625_v63  ;;  %v1369_v44 = vadd.f32 %v1348_v58, %v773_v3 }
 0x246   : > { %v3294_v13 = vmul.f32 -1.442695, %v1370_v40 }
 0x247   : > { %v3585_v12 = vpop.eup %3584  ;;  %v3291_v9 = vmul.f32 -1.442695, %v1371_v35  ;;  %v3293_v25 = vmul.f32 -1.442695, %v1372_v17 }
 0x248   : > { %v3587_v57 = vpop.eup %3586  ;;  %v1381_v32 = vadd.f32 1.0, %v3585_v12  ;;  %3588 = vpow2.f32 %v3294_v13 }
 0x249   : > { %v1419_v16 = vadd.f32 1.0, %v3587_v57  ;;  %3590 = vpow2.f32 %v3291_v9  ;;  %v5632_v57 = vld [vmem:[#allocation43_spill] sm:$0xff] }
 0x24a   : > { %3592 = vrcp.f32 %v1381_v32  ;;  %v1392_v17 = vand.u32 2147483647, %v1381_v32  ;;  %v775_v22 = vadd.f32 %v5632_v57, %v5629_v19  ;;  %v1394_v45 = vand.u32 2147483648, %v1381_v32  ;;  %v4735_v19 = vpop.permute.xlu1 %1508 }
 0x24b   : > { %3594 = vrcp.f32 %v1419_v16  ;;  %v1364_v8 = vpop.f32.mrf.mxu3  ;;  %v1350_v12 = vpop.f32.mrf.mxu2  ;;  %v1430_v3 = vand.u32 2147483647, %v1419_v16  ;;  %vm1388_vm5 = vweird.f32 %v1381_v32  ;;  %vm1426_vm7 = vweird.f32 %v1419_v16 }
 0x24c   : > { %3596 = vpow2.f32 %v3293_v25  ;;  %v1374_v40 = vadd.f32 %v1364_v8, %v824_v62  ;;  %vm4731_vm6 = vcmp.eq.f32.partialorder %v1392_v17, 8.507059e+37  ;;  %v1395_v20 = vor.u32 1.1754944e-38, %v1394_v45 }
 0x24d   : > { %3598 = vtanh.f32 %v1369_v44  ;;  %v1432_v44 = vand.u32 2147483648, %v1419_v16  ;;  %vm1513_vm9 = vcmp.eq.s32.totalorder %v4735_v19, 1  ;;  %vm4740_vm11 = vcmp.eq.f32.partialorder %v1430_v3, 8.507059e+37  ;;  %v5643_v19 = vld [vmem:[#allocation31_spill] sm:$0xff] }
 0x24e   : > { %v3589_v34 = vpop.eup %3588  ;;  %v3295_v8 = vmul.f32 -1.442695, %v1374_v40 }
 0x24f   : > { %v3591_v51 = vpop.eup %3590  ;;  %v4721_v6 = vadd.f32 1.0, %v3589_v34  ;;  %v1373_v34 = vadd.f32 %v1350_v12, %v775_v22 }
 0x250   : > { %v3593_v35 = vpop.eup %3592  ;;  %v4723_v13 = vadd.f32 1.0, %v3591_v51 }
 0x251   : > { %v3595_v9 = vpop.eup %3594  ;;  %v1384_v59 = vmul.f32 %v3593_v35, %v1381_v32  ;;  %3600 = vrcp.f32 %v4721_v6  ;;  %vm1389_vm8 = vweird.f32 %v3593_v35  ;;  %vm1466_vm0 = vweird.f32 %v4721_v6 }
 0x252   : > { %v3597_v58 = vpop.eup %3596  ;;  %v1422_v25 = vmul.f32 %v3595_v9, %v1419_v16  ;;  %3602 = vrcp.f32 %v4723_v13  ;;  %vm1427_vm10 = vweird.f32 %v3595_v9  ;;  %vm1390_vm12 = vmor %vm1388_vm5, %vm1389_vm8  ;;  %v1409_v3 = vand.u32 2147483648, %v4723_v13 }
 0x253   : > { %v1385_v30 = vsub.f32 1.0, %v1384_v59  ;;  %v4729_v62 = vadd.f32 1.0, %v3597_v58  ;;  %v3599_v59 = vpop.eup %3598  ;;  %v1433_v58 = vor.u32 1.1754944e-38, %v1432_v44  ;;  %vm1428_vm14 = vmor %vm1426_vm7, %vm1427_vm10  ;;  %vm1403_vm1 = vweird.f32 %v4723_v13 }
 0x254   : > { %v1423_v51 = vsub.f32 1.0, %v1422_v25  ;;  %v1720_v25 = vstv %s1719_s12 }
 0x255   : > { %v1386_v63 = vmul.f32 %v3593_v35, %v1385_v30  ;;  %3604 = vrcp.f32 %v4729_v62  ;;  %vm1721_vm13 = vcmp.lt.s32.totalorder %v1720_v25, %v4346_v26  ;;  %vm1722_vm3 = vcmp.lt.s32.totalorder %v1720_v25, %v4360_v33 }
 0x256   : > { %v1424_v40 = vmul.f32 %v3595_v9, %v1423_v51  ;;  %3606 = vpow2.f32 %v3295_v8  ;;  %v1723_v52 = vsel %vm1721_vm13, 1, %v5611_v24  ;;  %vm1441_vm8 = vweird.f32 %v4729_v62 }
 0x257   : > { %v4744_v17 = vpop.eup %3600  ;;  %v1387_v22 = vadd.f32 %v3593_v35, %v1386_v63  ;;  %3608 = vtanh.f32 %v1373_v34  ;;  %v1472_v63 = vand.u32 2147483648, %v4721_v6  ;;  %1726 = vperm.xlu2 %3551, %v1723_v52  }
 0x258   : > { %v3603_v30 = vpop.eup %3602  ;;  %v1462_v45 = vmul.f32 %v4744_v17, %v4721_v6  ;;  %v1425_v51 = vadd.f32 %v3595_v9, %v1424_v40  ;;  %v1407_v40 = vand.u32 2147483647, %v4723_v13  ;;  %vm1467_vm4 = vweird.f32 %v4744_v17 }
 0x259   : > { %v1391_v7 = vsel %vm1390_vm12, %v3593_v35, %v1387_v22  ;;  %v1399_v8 = vmul.f32 %v3603_v30, %v4723_v13  ;;  %vm1404_vm2 = vweird.f32 %v3603_v30  ;;  %vm4783_vm7 = vmor %vm1466_vm0, %vm1467_vm4 }
 0x25a   : > { %v1396_v32 = vsel %vm4731_vm6, %v1395_v20, %v1391_v7  ;;  %v1463_v44 = vsub.f32 1.0, %v1462_v45  ;;  %v1429_v34 = vsel %vm1428_vm14, %v3595_v9, %v1425_v51  ;;  %v1410_v7 = vor.u32 1.1754944e-38, %v1409_v3  ;;  %vm1405_vm15 = vmor %vm1403_vm1, %vm1404_vm2 }
 0x25b   : > { %v3605_v26 = vpop.eup %3604  ;;  %v1493_v35 = vmul.f32 %v3599_v59, %v1396_v32  ;;  %v1400_v22 = vsub.f32 1.0, %v1399_v8  ;;  %v1434_v16 = vsel %vm4740_vm11, %v1433_v58, %v1429_v34  ;;  %v1445_v59 = vand.u32 2147483647, %v4729_v62 }
 0x25c   : > { %v3607_v21 = vpop.eup %3606  ;;  %v1437_v54 = vmul.f32 %v3605_v26, %v4729_v62  ;;  %v1464_v2 = vmul.f32 %v4744_v17, %v1463_v44  ;;  %v1491_v57 = vmul.f32 %v1434_v16, %v4644_v29  ;;  %v1447_v58 = vand.u32 2147483648, %v4729_v62 }
 0x25d   : > { %v3609_v20 = vpop.eup %3608  ;;  %v1401_v9 = vmul.f32 %v3603_v30, %v1400_v22  ;;  %v1460_v45 = vadd.f32 1.0, %v3607_v21  ;;  %vm1442_vm5 = vweird.f32 %v3605_v26  ;;  %v1470_v21 = vand.u32 2147483647, %v4721_v6 }
 0x25e   : > { %v1438_v51 = vsub.f32 1.0, %v1437_v54  ;;  %v1495_v12 = vadd.f32 %v1493_v35, %v1491_v57  ;;  %v1465_v8 = vadd.f32 %v4744_v17, %v1464_v2  ;;  %vm1408_vm6 = vcmp.eq.f32.partialorder %v1407_v40, 8.507059e+37  ;;  %vm1443_vm10 = vmor %vm1441_vm8, %vm1442_vm5 }
 0x25f   : > { %v1402_v32 = vadd.f32 %v3603_v30, %v1401_v9  ;;  %3610 = vrcp.f32 %v1460_v45  ;;  %v1724_v2 = vsel %vm1722_vm3, 1, %v5611_v24  ;;  %v1473_v44 = vor.u32 1.1754944e-38, %v1472_v63  ;;  %v3808_v9 = vld [vmem:[%s4213_s18] sm:$0xff] }
 0x260   : > { %3612 = vtanh.f32 %v1495_v12  ;;  %v4775_v52 = vsel %vm1513_vm9, %v1495_v12, %v4644_v29  ;;  %v1439_v54 = vmul.f32 %v3605_v26, %v1438_v51  ;;  %v1469_v13 = vsel %vm4783_vm7, %v4744_v17, %v1465_v8  ;;  %1729 = vperm.xlu2 %3551, %v1724_v2   ;;  %v5639_v51 = vld [vmem:[#allocation35_spill] sm:$0xff] }
 0x261   : > { %v1406_v33 = vsel %vm1405_vm15, %v3603_v30, %v1402_v32  ;;  %v1448_v30 = vor.u32 1.1754944e-38, %v1447_v58  ;;  %vm1446_vm11 = vcmp.eq.f32.partialorder %v1445_v59, 8.507059e+37  ;;  %vm1471_vm12 = vcmp.eq.f32.partialorder %v1470_v21, 8.507059e+37 }
 0x262   : > { %v1411_v3 = vsel %vm1408_vm6, %v1410_v7, %v1406_v33  ;;  %v1440_v29 = vadd.f32 %v3605_v26, %v1439_v54  ;;  %v1474_v16 = vsel %vm1471_vm12, %v1473_v44, %v1469_v13  ;;  %v1512_v7 = vpop.permute.xlu1 %1511  ;;  %vm2157_vm13 = vcmp.lt.s32.totalorder %v5639_v51, %v3808_v9  ;;  %v3809_v33 = vld [vmem:[%s4213_s18 + $0x8] sm:$0xff]  ;;  %v5645_v44 = vld [vmem:[#allocation34_spill] sm:$0xff] }
 0x263   : > { %v1494_v34 = vmul.f32 %v3609_v20, %v1411_v3  ;;  %vm1514_vm14 = vcmp.eq.s32.totalorder %v1512_v7, 1  ;;  %v2159_v59 = vsel %vm2157_vm13, 1, %v5611_v24  ;;  %v1485_v8 = vand.u32 2147483647, %v1460_v45 }
 0x264   : > { %v1444_v40 = vsel %vm1443_vm10, %v3605_v26, %v1440_v29  ;;  %v1487_v26 = vand.u32 2147483648, %v1460_v45  ;;  %vm1481_vm1 = vweird.f32 %v1460_v45  ;;  %vm2376_vm3 = vcmp.lt.s32.totalorder %v4656_v47, %v3809_v33  ;;  %v5640_v47 = vld [vmem:[#allocation39_spill] sm:$0xff] }
 0x265   : > { %v3611_v6 = vpop.eup %3610  ;;  %v1449_v35 = vsel %vm1446_vm11, %v1448_v30, %v1444_v40  ;;  %vm1486_vm4 = vcmp.eq.f32.partialorder %v1485_v8, 8.507059e+37  ;;  %v2378_v29 = vsel %vm2376_vm3, 1, %v5611_v24  ;;  %vm2811_vm15 = vcmp.lt.s32.totalorder %v5640_v47, %v3808_v9  ;;  %v5644_v30 = vld [vmem:[#allocation32_spill] sm:$0xff]  ;;  %v5647_v40 = vld [vmem:[#allocation91_spill] sm:$0xff] }
 0x266   : > { %v3613_v22 = vpop.eup %3612  ;;  %v1477_v57 = vmul.f32 %v3611_v6, %v1460_v45  ;;  %v1492_v62 = vmul.f32 %v1449_v35, %v4650_v1  ;;  %vm1482_vm0 = vweird.f32 %v3611_v6  ;;  %v1488_v21 = vor.u32 1.1754944e-38, %v1487_v26  ;;  %v5652_v26 = vld [vmem:[#allocation48_spill] sm:$0xff] }
 0x267   : > { %v1499_v17 = vmul.f32 %v3613_v22, %v1474_v16  ;;  %vm1483_vm2 = vmor %vm1481_vm1, %vm1482_vm0  ;;  %v5649_v22 = vld [vmem:[#allocation92_spill] sm:$0xff]  ;;  %v5650_v16 = vld [vmem:[#allocation46_spill] sm:$0xff] }
 0x268   : > { %v1478_v63 = vsub.f32 1.0, %v1477_v57  ;;  %v1496_v20 = vadd.f32 %v1494_v34, %v1492_v62  ;;  %2162 = vperm.xlu2 %3551, %v2159_v59   ;;  %v5646_v34 = vld [vmem:[#allocation33_spill] sm:$0xff]  ;;  %v729_v57 = vadd.f32 %v5650_v16, %v5649_v22 }
 0x26a   : > { %v1479_v12 = vmul.f32 %v3611_v6, %v1478_v63  ;;  %3614 = vtanh.f32 %v1496_v20  ;;  %v4797_v58 = vsel %vm1514_vm14, %v1496_v20, %v4650_v1  ;;  %v4805_v1 = vsel %vm1513_vm9, %v1499_v17, %v4663_v39  ;;  %v5651_v20 = vld [vmem:[#allocation95_spill] sm:$0xff] }
 0x26b   : > { %v2813_v39 = vsel %vm2811_vm15, 1, %v5611_v24  ;;  %v5641_v24 = vld [vmem:[#allocation30_spill] sm:$0xff]  ;;  %v827_v59 = vadd.f32 %v5652_v26, %v5651_v20  ;;  %v5657_v26 = vld [vmem:[#allocation47_spill] sm:$0xff] }
 0x26c   : > { %v1480_v32 = vadd.f32 %v3611_v6, %v1479_v12  ;;  %v5653_v12 = vld [vmem:[#allocation49_spill] sm:$0xff] }
 0x26d   : > { %v682_v8 = vadd.f32 %v5653_v12, %v5647_v40 }
 0x26e   : > { %v1484_v54 = vsel %vm1483_vm2, %v3611_v6, %v1480_v32  ;;  %v5648_v6 = vld [vmem:[#allocation45_spill] sm:$0xff]  ;;  %v5654_v32 = vld [vmem:[#allocation50_spill] sm:$0xff] }
 0x26f   : > { %v1489_v25 = vsel %vm1486_vm4, %v1488_v21, %v1484_v54  ;;  %v680_v35 = vadd.f32 %v5648_v6, %v5647_v40  ;;  %v731_v54 = vadd.f32 %v5654_v32, %v5649_v22 }
 0x270   : > { %v3615_v2 = vpop.eup %3614  ;;  %2383 = vperm.xlu2 %3551, %v2378_v29  }
 0x271   : > { %v1500_v3 = vmul.f32 %v3615_v2, %v1489_v25 }
 0x273   : > { %v4809_v45 = vsel %vm1514_vm14, %v1500_v3, %v4667_v11  ;;  %v5642_v11 = vld [vmem:[#allocation29_spill] sm:$0xff] }
 0x274   : > { %v1528_v13 = vpack.c.bf16 %v4809_v45, %v4805_v1 }
 0x276   : > { %1537 = vmatmul.bf16.vlgmr.msrb.gmra.mxu0 %v1528_v13  ;;  %1551 = vmatmul.bf16.vlgmr.msrb.gmra.mxu1 %v1528_v13 }
 0x277   : > { %1565 = vmatmul.bf16.vlgmr.msrb.gmra.mxu2 %v1528_v13  ;;  %1579 = vmatmul.bf16.vlgmr.msrb.gmra.mxu3 %v1528_v13 }
 0x278   : > { %1965 = vmatpush.bf16.msrb.mxu0 %v4220_v38  ;;  %1979 = vmatpush.bf16.msrb.mxu1 %v4222_v42 }
 0x279   : > { %1993 = vmatpush.bf16.msrb.mxu2 %v4224_v48  ;;  %2007 = vmatpush.bf16.msrb.mxu3 %v4227_v49 }
 0x27a   : > { %2816 = vperm.xlu2 %3551, %v2813_v39  }
 0x27c   : > { %1966 = vmatpush.bf16.msrb.mxu0 %v4229_v50  ;;  %1980 = vmatpush.bf16.msrb.mxu1 %v4232_v53 }
 0x27d   : > { %1994 = vmatpush.bf16.msrb.mxu2 %v4235_v56  ;;  %2008 = vmatpush.bf16.msrb.mxu3 %v4239_v60 }
 0x280   : > { %1967 = vmatpush.bf16.msrb.mxu0 %v4241_v61  ;;  %1981 = vmatpush.bf16.msrb.mxu1 %v4244_v0 }
 0x281   : > { %1995 = vmatpush.bf16.msrb.mxu2 %v4247_v4  ;;  %2009 = vmatpush.bf16.msrb.mxu3 %v4251_v5 }
 0x284   : > { %1968 = vmatpush.bf16.msrb.mxu0 %v4257_v10  ;;  %1982 = vmatpush.bf16.msrb.mxu1 %v4259_v14 }
 0x285   : > { %1996 = vmatpush.bf16.msrb.mxu2 %v4264_v18  ;;  %2010 = vmatpush.bf16.msrb.mxu3 %v4261_v15 }
 0x288   : > { %1969 = vmatpush.bf16.msrb.mxu0 %v4270_v23  ;;  %1983 = vmatpush.bf16.msrb.mxu1 %v4272_v27 }
 0x289   : > { %1997 = vmatpush.bf16.msrb.mxu2 %v4277_v31  ;;  %2011 = vmatpush.bf16.msrb.mxu3 %v4274_v28 }
 0x28c   : > { %1970 = vmatpush.bf16.msrb.mxu0 %v4283_v36  ;;  %1984 = vmatpush.bf16.msrb.mxu1 %v4285_v41 }
 0x28d   : > { %1998 = vmatpush.bf16.msrb.mxu2 %v4290_v46  ;;  %2012 = vmatpush.bf16.msrb.mxu3 %v4287_v43 }
 0x290   : > { %1971 = vmatpush.bf16.msrb.mxu0 %v4296_v55  ;;  %1985 = vmatpush.bf16.msrb.mxu1 %v5614_v37 }
 0x291   : > { %1999 = vmatpush.bf16.msrb.mxu2 %v5641_v24  ;;  %2013 = vmatpush.bf16.msrb.mxu3 %v5642_v11 }
 0x294   : > { %1972 = vmatpush.bf16.msrb.mxu0 %v5643_v19  ;;  %1986 = vmatpush.bf16.msrb.mxu1 %v5644_v30 }
 0x295   : > { %2000 = vmatpush.bf16.msrb.mxu2 %v5645_v44  ;;  %2014 = vmatpush.bf16.msrb.mxu3 %v5646_v34 }
 0x2f3   : > { %v1538_v7 = vpop.f32.mrf.mxu0  ;;  %v1552_v62 = vpop.f32.mrf.mxu1 }
 0x2f4   : > { %v1585_v9 = vadd.f32 %v1538_v7, %v680_v35  ;;  %v1586_v51 = vadd.f32 %v1552_v62, %v729_v57 }
 0x2f6   : > { %v3296_v17 = vmul.f32 -1.442695, %v1585_v9  ;;  %v3298_v63 = vmul.f32 -1.442695, %v1586_v51  ;;  %v5655_v9 = vld [vmem:[#allocation52_spill] sm:$0xff] }
 0x2f7   : > { %v829_v51 = vadd.f32 %v5655_v9, %v5651_v20 }
 0x2f8   : > { %3616 = vpow2.f32 %v3296_v17 }
 0x2f9   : > { %3618 = vpow2.f32 %v3298_v63  ;;  %v5656_v63 = vld [vmem:[#allocation96_spill] sm:$0xff] }
 0x2fa   : > { %v1580_v21 = vpop.f32.mrf.mxu3  ;;  %v1566_v16 = vpop.f32.mrf.mxu2 }
 0x2fb   : > { %v1588_v33 = vadd.f32 %v1580_v21, %v827_v59  ;;  %v1540_v2 = vpop.f32.mrf.mxu0  ;;  %v1554_v25 = vpop.f32.mrf.mxu1  ;;  %v778_v59 = vadd.f32 %v5657_v26, %v5656_v63 }
 0x2fc   : > { %v1589_v3 = vadd.f32 %v1540_v2, %v682_v8  ;;  %v1590_v29 = vadd.f32 %v1554_v25, %v731_v54 }
 0x2fd   : > { %v3300_v13 = vmul.f32 -1.442695, %v1588_v33  ;;  %v1587_v21 = vadd.f32 %v1566_v16, %v778_v59 }
 0x2fe   : > { %v3617_v47 = vpop.eup %3616  ;;  %v3297_v39 = vmul.f32 -1.442695, %v1589_v3  ;;  %v3299_v57 = vmul.f32 -1.442695, %v1590_v29  ;;  %v5658_v29 = vld [vmem:[#allocation51_spill] sm:$0xff] }
 0x2ff   : > { %v3619_v6 = vpop.eup %3618  ;;  %v1599_v35 = vadd.f32 1.0, %v3617_v47  ;;  %3620 = vpow2.f32 %v3300_v13  ;;  %v780_v13 = vadd.f32 %v5658_v29, %v5656_v63 }
 0x300   : > { %v1637_v7 = vadd.f32 1.0, %v3619_v6  ;;  %3622 = vpow2.f32 %v3297_v39 }
 0x301   : > { %3624 = vrcp.f32 %v1599_v35  ;;  %v1612_v9 = vand.u32 2147483648, %v1599_v35  ;;  %vm1606_vm6 = vweird.f32 %v1599_v35 }
 0x302   : > { %3626 = vrcp.f32 %v1637_v7  ;;  %v1582_v62 = vpop.f32.mrf.mxu3  ;;  %v1568_v39 = vpop.f32.mrf.mxu2  ;;  %v1648_v26 = vand.u32 2147483647, %v1637_v7  ;;  %v1650_v59 = vand.u32 2147483648, %v1637_v7  ;;  %vm1644_vm10 = vweird.f32 %v1637_v7 }
 0x303   : > { %3628 = vpow2.f32 %v3299_v57  ;;  %v1592_v12 = vadd.f32 %v1582_v62, %v829_v51  ;;  %v1610_v62 = vand.u32 2147483647, %v1599_v35  ;;  %v1591_v29 = vadd.f32 %v1568_v39, %v780_v13 }
 0x304   : > { %vm1649_vm12 = vcmp.eq.f32.partialorder %v1648_v26, 8.507059e+37  ;;  %v1651_v20 = vor.u32 1.1754944e-38, %v1650_v59 }
 0x305   : > { %v3621_v17 = vpop.eup %3620  ;;  %v3301_v6 = vmul.f32 -1.442695, %v1592_v12  ;;  %vm1611_vm8 = vcmp.eq.f32.partialorder %v1610_v62, 8.507059e+37 }
 0x306   : > { %v3623_v8 = vpop.eup %3622  ;;  %v4861_v32 = vadd.f32 1.0, %v3621_v17  ;;  %v4871_v17 = vpop.permute.xlu2 %1726 }
 0x307   : > { %v3625_v54 = vpop.eup %3624  ;;  %v4863_v33 = vadd.f32 1.0, %v3623_v8  ;;  %vm1731_vm5 = vcmp.eq.s32.totalorder %v4871_v17, 1 }
 0x308   : > { %v3627_v2 = vpop.eup %3626  ;;  %v1602_v25 = vmul.f32 %v3625_v54, %v1599_v35  ;;  %3630 = vrcp.f32 %v4861_v32  ;;  %vm1607_vm9 = vweird.f32 %v3625_v54  ;;  %vm1684_vm4 = vweird.f32 %v4861_v32 }
 0x309   : > { %v3629_v3 = vpop.eup %3628  ;;  %v1640_v47 = vmul.f32 %v3627_v2, %v1637_v7  ;;  %3632 = vrcp.f32 %v4863_v33  ;;  %vm1645_vm7 = vweird.f32 %v3627_v2  ;;  %vm1608_vm11 = vmor %vm1606_vm6, %vm1607_vm9  ;;  %v1627_v35 = vand.u32 2147483648, %v4863_v33 }
 0x30a   : > { %v1603_v57 = vsub.f32 1.0, %v1602_v25  ;;  %v4869_v51 = vadd.f32 1.0, %v3629_v3  ;;  %3634 = vtanh.f32 %v1587_v21  ;;  %v1613_v21 = vor.u32 1.1754944e-38, %v1612_v9  ;;  %vm1646_vm13 = vmor %vm1644_vm10, %vm1645_vm7 }
 0x30b   : > { %v1641_v16 = vsub.f32 1.0, %v1640_v47  ;;  %v1690_v9 = vand.u32 2147483648, %v4861_v32  ;;  %vm1621_vm14 = vweird.f32 %v4863_v33 }
 0x30c   : > { %v1604_v8 = vmul.f32 %v3625_v54, %v1603_v57  ;;  %3636 = vrcp.f32 %v4869_v51  ;;  %vm1659_vm6 = vweird.f32 %v4869_v51 }
 0x30d   : > { %v1642_v63 = vmul.f32 %v3627_v2, %v1641_v16  ;;  %3638 = vpow2.f32 %v3301_v6 }
 0x30e   : > { %v4875_v12 = vpop.eup %3630  ;;  %v1605_v25 = vadd.f32 %v3625_v54, %v1604_v8  ;;  %3640 = vtanh.f32 %v1591_v29  ;;  %v1625_v29 = vand.u32 2147483647, %v4863_v33 }
 0x30f   : > { %v3633_v3 = vpop.eup %3632  ;;  %v1680_v47 = vmul.f32 %v4875_v12, %v4861_v32  ;;  %v1643_v57 = vadd.f32 %v3627_v2, %v1642_v63  ;;  %vm1685_vm1 = vweird.f32 %v4875_v12 }
 0x310   : > { %v1609_v22 = vsel %vm1608_vm11, %v3625_v54, %v1605_v25  ;;  %v1617_v13 = vmul.f32 %v3633_v3, %v4863_v33  ;;  %v3635_v39 = vpop.eup %3634  ;;  %vm1622_vm0 = vweird.f32 %v3633_v3  ;;  %vm1626_vm15 = vcmp.eq.f32.partialorder %v1625_v29, 8.507059e+37  ;;  %vm4902_vm9 = vmor %vm1684_vm4, %vm1685_vm1 }
 0x311   : > { %v1614_v6 = vsel %vm1611_vm8, %v1613_v21, %v1609_v22  ;;  %v1681_v62 = vsub.f32 1.0, %v1680_v47  ;;  %v1647_v7 = vsel %vm1646_vm13, %v3627_v2, %v1643_v57  ;;  %v1628_v2 = vor.u32 1.1754944e-38, %v1627_v35  ;;  %vm1623_vm2 = vmor %vm1621_vm14, %vm1622_vm0 }
 0x312   : > { %v3637_v16 = vpop.eup %3636  ;;  %v1711_v8 = vmul.f32 %v3635_v39, %v1614_v6  ;;  %v1618_v40 = vsub.f32 1.0, %v1617_v13  ;;  %v1652_v63 = vsel %vm1649_vm12, %v1651_v20, %v1647_v7  ;;  %v1663_v13 = vand.u32 2147483647, %v4869_v51 }
 0x313   : > { %v3639_v54 = vpop.eup %3638  ;;  %v1655_v26 = vmul.f32 %v3637_v16, %v4869_v51  ;;  %v1682_v59 = vmul.f32 %v4875_v12, %v1681_v62  ;;  %v1709_v25 = vmul.f32 %v1652_v63, %v4775_v52  ;;  %v1665_v20 = vand.u32 2147483648, %v4869_v51 }
 0x314   : > { %v1619_v22 = vmul.f32 %v3633_v3, %v1618_v40  ;;  %v1678_v21 = vadd.f32 1.0, %v3639_v54  ;;  %v3641_v39 = vpop.eup %3640  ;;  %vm1660_vm3 = vweird.f32 %v3637_v16  ;;  %v1688_v35 = vand.u32 2147483647, %v4861_v32 }
 0x315   : > { %v1656_v47 = vsub.f32 1.0, %v1655_v26  ;;  %v1713_v57 = vadd.f32 %v1711_v8, %v1709_v25  ;;  %v1683_v6 = vadd.f32 %v4875_v12, %v1682_v59  ;;  %vm1661_vm7 = vmor %vm1659_vm6, %vm1660_vm3  ;;  %v1666_v33 = vor.u32 1.1754944e-38, %v1665_v20 }
 0x316   : > { %v1620_v62 = vadd.f32 %v3633_v3, %v1619_v22  ;;  %3642 = vrcp.f32 %v1678_v21  ;;  %v1691_v59 = vor.u32 1.1754944e-38, %v1690_v9  ;;  %vm1664_vm8 = vcmp.eq.f32.partialorder %v1663_v13, 8.507059e+37 }
 0x317   : > { %v1657_v7 = vmul.f32 %v3637_v16, %v1656_v47  ;;  %3644 = vtanh.f32 %v1713_v57  ;;  %v4895_v40 = vsel %vm1731_vm5, %v1713_v57, %v4775_v52  ;;  %v1687_v52 = vsel %vm4902_vm9, %v4875_v12, %v1683_v6 }
 0x318   : > { %v1624_v8 = vsel %vm1623_vm2, %v3633_v3, %v1620_v62  ;;  %vm1689_vm10 = vcmp.eq.f32.partialorder %v1688_v35, 8.507059e+37  ;;  %v1705_v12 = vand.u32 2147483648, %v1678_v21  ;;  %vm1699_vm13 = vweird.f32 %v1678_v21 }
 0x319   : > { %v1629_v54 = vsel %vm1626_vm15, %v1628_v2, %v1624_v8  ;;  %v1658_v26 = vadd.f32 %v3637_v16, %v1657_v7  ;;  %v1692_v47 = vsel %vm1689_vm10, %v1691_v59, %v1687_v52  ;;  %v1730_v2 = vpop.permute.xlu2 %1729 }
 0x31a   : > { %v1712_v25 = vmul.f32 %v3641_v39, %v1629_v54  ;;  %vm1732_vm11 = vcmp.eq.s32.totalorder %v1730_v2, 1  ;;  %v1706_v39 = vor.u32 1.1754944e-38, %v1705_v12  ;;  %v5666_v2 = vld [vmem:[#allocation56_spill] sm:$0xff] }
 0x31b   : > { %v1662_v22 = vsel %vm1661_vm7, %v3637_v16, %v1658_v26  ;;  %v1703_v16 = vand.u32 2147483647, %v1678_v21 }
 0x31c   : > { %v3643_v32 = vpop.eup %3642  ;;  %v1667_v3 = vsel %vm1664_vm8, %v1666_v33, %v1662_v22  ;;  %v5664_v33 = vld [vmem:[#allocation54_spill] sm:$0xff] }
 0x31d   : > { %v3645_v29 = vpop.eup %3644  ;;  %v1695_v57 = vmul.f32 %v3643_v32, %v1678_v21  ;;  %v1710_v62 = vmul.f32 %v1667_v3, %v4797_v58  ;;  %vm1700_vm12 = vweird.f32 %v3643_v32  ;;  %vm1704_vm0 = vcmp.eq.f32.partialorder %v1703_v16, 8.507059e+37  ;;  %v5663_v21 = vld [vmem:[#allocation92_spill] sm:$0xff] }
 0x31e   : > { %v1717_v51 = vmul.f32 %v3645_v29, %v1692_v47  ;;  %vm1701_vm14 = vmor %vm1699_vm13, %vm1700_vm12  ;;  %v734_v59 = vadd.f32 %v5664_v33, %v5663_v21 }
 0x31f   : > { %v1696_v7 = vsub.f32 1.0, %v1695_v57  ;;  %v1714_v8 = vadd.f32 %v1712_v25, %v1710_v62  ;;  %v5665_v57 = vld [vmem:[#allocation95_spill] sm:$0xff] }
 0x320   : > { %v4918_v26 = vsel %vm1731_vm5, %v1717_v51, %v4805_v1  ;;  %v5661_v1 = vld [vmem:[#allocation91_spill] sm:$0xff]  ;;  %v832_v62 = vadd.f32 %v5666_v2, %v5665_v57  ;;  %v5667_v51 = vld [vmem:[#allocation57_spill] sm:$0xff] }
 0x321   : > { %v1697_v6 = vmul.f32 %v3643_v32, %v1696_v7  ;;  %3646 = vtanh.f32 %v1714_v8  ;;  %v4913_v9 = vsel %vm1732_vm11, %v1714_v8, %v4797_v58  ;;  %v687_v7 = vadd.f32 %v5667_v51, %v5661_v1  ;;  %v5668_v8 = vld [vmem:[#allocation58_spill] sm:$0xff] }
 0x322   : > { %v736_v12 = vadd.f32 %v5668_v8, %v5663_v21 }
 0x323   : > { %v1698_v13 = vadd.f32 %v3643_v32, %v1697_v6 }
 0x325   : > { %v1702_v20 = vsel %vm1701_vm14, %v3643_v32, %v1698_v13 }
 0x326   : > { %v1707_v63 = vsel %vm1704_vm0, %v1706_v39, %v1702_v20 }
 0x327   : > { %v3647_v35 = vpop.eup %3646 }
 0x328   : > { %v1718_v54 = vmul.f32 %v3647_v35, %v1707_v63 }
 0x32a   : > { %v4922_v52 = vsel %vm1732_vm11, %v1718_v54, %v4809_v45  ;;  %v5662_v45 = vld [vmem:[#allocation53_spill] sm:$0xff] }
 0x32b   : > { %v1746_v58 = vpack.c.bf16 %v4922_v52, %v4918_v26  ;;  %v685_v17 = vadd.f32 %v5662_v45, %v5661_v1 }
 0x32d   : > { %1755 = vmatmul.bf16.vlgmr.msra.gmra.mxu0 %v1746_v58  ;;  %1769 = vmatmul.bf16.vlgmr.msra.gmra.mxu1 %v1746_v58 }
 0x32e   : > { %1783 = vmatmul.bf16.vlgmr.msra.gmra.mxu2 %v1746_v58  ;;  %1797 = vmatmul.bf16.vlgmr.msra.gmra.mxu3 %v1746_v58 }
 0x32f   : > { %2183 = vmatpush.bf16.msra.mxu0 %v4220_v38  ;;  %2197 = vmatpush.bf16.msra.mxu1 %v4222_v42 }
 0x330   : > { %2211 = vmatpush.bf16.msra.mxu2 %v4224_v48  ;;  %2225 = vmatpush.bf16.msra.mxu3 %v4227_v49 }
 0x333   : > { %2184 = vmatpush.bf16.msra.mxu0 %v4229_v50  ;;  %2198 = vmatpush.bf16.msra.mxu1 %v4232_v53 }
 0x334   : > { %2212 = vmatpush.bf16.msra.mxu2 %v4235_v56  ;;  %2226 = vmatpush.bf16.msra.mxu3 %v4239_v60 }
 0x337   : > { %2185 = vmatpush.bf16.msra.mxu0 %v4241_v61  ;;  %2199 = vmatpush.bf16.msra.mxu1 %v4244_v0 }
 0x338   : > { %2213 = vmatpush.bf16.msra.mxu2 %v4247_v4  ;;  %2227 = vmatpush.bf16.msra.mxu3 %v4251_v5 }
 0x33b   : > { %2186 = vmatpush.bf16.msra.mxu0 %v4257_v10  ;;  %2200 = vmatpush.bf16.msra.mxu1 %v4259_v14 }
 0x33c   : > { %2214 = vmatpush.bf16.msra.mxu2 %v4264_v18  ;;  %2228 = vmatpush.bf16.msra.mxu3 %v4261_v15 }
 0x33f   : > { %2187 = vmatpush.bf16.msra.mxu0 %v4270_v23  ;;  %2201 = vmatpush.bf16.msra.mxu1 %v4272_v27 }
 0x340   : > { %2215 = vmatpush.bf16.msra.mxu2 %v4277_v31  ;;  %2229 = vmatpush.bf16.msra.mxu3 %v4274_v28 }
 0x343   : > { %2188 = vmatpush.bf16.msra.mxu0 %v4283_v36  ;;  %2202 = vmatpush.bf16.msra.mxu1 %v4285_v41 }
 0x344   : > { %2216 = vmatpush.bf16.msra.mxu2 %v4290_v46  ;;  %2230 = vmatpush.bf16.msra.mxu3 %v4287_v43 }
 0x347   : > { %2189 = vmatpush.bf16.msra.mxu0 %v4296_v55  ;;  %2203 = vmatpush.bf16.msra.mxu1 %v5614_v37 }
 0x348   : > { %2217 = vmatpush.bf16.msra.mxu2 %v5641_v24  ;;  %2231 = vmatpush.bf16.msra.mxu3 %v5642_v11 }
 0x34b   : > { %2190 = vmatpush.bf16.msra.mxu0 %v5643_v19  ;;  %2204 = vmatpush.bf16.msra.mxu1 %v5644_v30 }
 0x34c   : > { %2218 = vmatpush.bf16.msra.mxu2 %v5645_v44  ;;  %2232 = vmatpush.bf16.msra.mxu3 %v5646_v34 }
 0x3aa   : > { %v1756_v25 = vpop.f32.mrf.mxu0  ;;  %v1770_v22 = vpop.f32.mrf.mxu1 }
 0x3ab   : > { %v1803_v32 = vadd.f32 %v1756_v25, %v685_v17  ;;  %v1804_v3 = vadd.f32 %v1770_v22, %v734_v59  ;;  %v5669_v22 = vld [vmem:[#allocation96_spill] sm:$0xff] }
 0x3ad   : > { %v3302_v29 = vmul.f32 -1.442695, %v1803_v32  ;;  %v3304_v47 = vmul.f32 -1.442695, %v1804_v3  ;;  %v5670_v32 = vld [vmem:[#allocation55_spill] sm:$0xff] }
 0x3ae   : > { %v783_v3 = vadd.f32 %v5670_v32, %v5669_v22 }
 0x3af   : > { %3648 = vpow2.f32 %v3302_v29 }
 0x3b0   : > { %3650 = vpow2.f32 %v3304_v47  ;;  %v5671_v47 = vld [vmem:[#allocation60_spill] sm:$0xff] }
 0x3b1   : > { %v1798_v6 = vpop.f32.mrf.mxu3  ;;  %v1784_v33 = vpop.f32.mrf.mxu2  ;;  %v834_v2 = vadd.f32 %v5671_v47, %v5665_v57 }
 0x3b2   : > { %v1806_v16 = vadd.f32 %v1798_v6, %v832_v62  ;;  %v1758_v13 = vpop.f32.mrf.mxu0  ;;  %v1772_v20 = vpop.f32.mrf.mxu1  ;;  %v1805_v51 = vadd.f32 %v1784_v33, %v783_v3 }
 0x3b3   : > { %v1807_v39 = vadd.f32 %v1758_v13, %v687_v7  ;;  %v1808_v35 = vadd.f32 %v1772_v20, %v736_v12 }
 0x3b4   : > { %v3306_v63 = vmul.f32 -1.442695, %v1806_v16 }
 0x3b5   : > { %v3649_v54 = vpop.eup %3648  ;;  %v3303_v58 = vmul.f32 -1.442695, %v1807_v39  ;;  %v3305_v59 = vmul.f32 -1.442695, %v1808_v35  ;;  %v5672_v35 = vld [vmem:[#allocation59_spill] sm:$0xff] }
 0x3b6   : > { %v3651_v45 = vpop.eup %3650  ;;  %v1817_v17 = vadd.f32 1.0, %v3649_v54  ;;  %3652 = vpow2.f32 %v3306_v63  ;;  %v785_v63 = vadd.f32 %v5672_v35, %v5669_v22 }
 0x3b7   : > { %v1855_v25 = vadd.f32 1.0, %v3651_v45  ;;  %3654 = vpow2.f32 %v3303_v58 }
 0x3b8   : > { %3656 = vrcp.f32 %v1817_v17  ;;  %v1828_v58 = vand.u32 2147483647, %v1817_v17  ;;  %v1830_v47 = vand.u32 2147483648, %v1817_v17  ;;  %vm1824_vm3 = vweird.f32 %v1817_v17 }
 0x3b9   : > { %3658 = vrcp.f32 %v1855_v25  ;;  %v1800_v29 = vpop.f32.mrf.mxu3  ;;  %v1786_v45 = vpop.f32.mrf.mxu2  ;;  %vm1862_vm2 = vweird.f32 %v1855_v25 }
 0x3ba   : > { %3660 = vpow2.f32 %v3305_v59  ;;  %v1810_v12 = vadd.f32 %v1800_v29, %v834_v2  ;;  %v1868_v29 = vand.u32 2147483648, %v1855_v25  ;;  %v1866_v2 = vand.u32 2147483647, %v1855_v25 }
 0x3bb   : > { %vm1829_vm15 = vcmp.eq.f32.partialorder %v1828_v58, 8.507059e+37 }
 0x3bc   : > { %v3653_v62 = vpop.eup %3652  ;;  %v3307_v32 = vmul.f32 -1.442695, %v1810_v12  ;;  %v1831_v12 = vor.u32 1.1754944e-38, %v1830_v47  ;;  %vm1867_vm7 = vcmp.eq.f32.partialorder %v1866_v2, 8.507059e+37 }
 0x3bd   : > { %v3655_v7 = vpop.eup %3654  ;;  %v4972_v8 = vadd.f32 1.0, %v3653_v62 }
 0x3be   : > { %v3657_v6 = vpop.eup %3656  ;;  %v4974_v16 = vadd.f32 1.0, %v3655_v7  ;;  %v1809_v7 = vadd.f32 %v1786_v45, %v785_v63  ;;  %v1869_v63 = vor.u32 1.1754944e-38, %v1868_v29 }
 0x3bf   : > { %v3659_v13 = vpop.eup %3658  ;;  %v1820_v20 = vmul.f32 %v3657_v6, %v1817_v17  ;;  %3662 = vrcp.f32 %v4972_v8  ;;  %vm1825_vm5 = vweird.f32 %v3657_v6  ;;  %vm1902_vm8 = vweird.f32 %v4972_v8 }
 0x3c0   : > { %v3661_v39 = vpop.eup %3660  ;;  %v1858_v54 = vmul.f32 %v3659_v13, %v1855_v25  ;;  %3664 = vtanh.f32 %v1805_v51  ;;  %vm1863_vm1 = vweird.f32 %v3659_v13  ;;  %vm1826_vm4 = vmor %vm1824_vm3, %vm1825_vm5  ;;  %vm1839_vm10 = vweird.f32 %v4974_v16 }
 0x3c1   : > { %v1821_v33 = vsub.f32 1.0, %v1820_v20  ;;  %3666 = vrcp.f32 %v4974_v16  ;;  %v4980_v59 = vadd.f32 1.0, %v3661_v39  ;;  %v4985_v39 = vpop.permute.xlu0 %1944  ;;  %vm1864_vm6 = vmor %vm1862_vm2, %vm1863_vm1 }
 0x3c2   : > { %v1859_v3 = vsub.f32 1.0, %v1858_v54  ;;  %vm1949_vm9 = vcmp.eq.s32.totalorder %v4985_v39, 1 }
 0x3c3   : > { %v1822_v62 = vmul.f32 %v3657_v6, %v1821_v33  ;;  %3668 = vrcp.f32 %v4980_v59  ;;  %vm1877_vm14 = vweird.f32 %v4980_v59 }
 0x3c4   : > { %v1860_v35 = vmul.f32 %v3659_v13, %v1859_v3  ;;  %3670 = vpow2.f32 %v3307_v32 }
 0x3c5   : > { %v4983_v22 = vpop.eup %3662  ;;  %v1823_v51 = vadd.f32 %v3657_v6, %v1822_v62  ;;  %3672 = vtanh.f32 %v1809_v7  ;;  %v1843_v7 = vand.u32 2147483647, %v4974_v16 }
 0x3c6   : > { %v3665_v20 = vpop.eup %3664  ;;  %v1861_v54 = vadd.f32 %v3659_v13, %v1860_v35  ;;  %v1898_v33 = vmul.f32 %v4983_v22, %v4972_v8  ;;  %v1908_v35 = vand.u32 2147483648, %v4972_v8  ;;  %vm1903_vm12 = vweird.f32 %v4983_v22 }
 0x3c7   : > { %v3667_v57 = vpop.eup %3666  ;;  %v1827_v25 = vsel %vm1826_vm4, %v3657_v6, %v1823_v51  ;;  %v1845_v51 = vand.u32 2147483648, %v4974_v16  ;;  %vm5010_vm5 = vmor %vm1902_vm8, %vm1903_vm12  ;;  %vm1844_vm1 = vcmp.eq.f32.partialorder %v1843_v7, 8.507059e+37 }
 0x3c8   : > { %v1832_v17 = vsel %vm1829_vm15, %v1831_v12, %v1827_v25  ;;  %v1865_v45 = vsel %vm1864_vm6, %v3659_v13, %v1861_v54  ;;  %v1899_v32 = vsub.f32 1.0, %v1898_v33  ;;  %v1835_v3 = vmul.f32 %v3667_v57, %v4974_v16 }
 0x3c9   : > { %v3669_v58 = vpop.eup %3668  ;;  %v1870_v47 = vsel %vm1867_vm7, %v1869_v63, %v1865_v45  ;;  %v1929_v62 = vmul.f32 %v3665_v20, %v1832_v17  ;;  %v1883_v13 = vand.u32 2147483648, %v4980_v59  ;;  %vm1840_vm11 = vweird.f32 %v3667_v57 }
 0x3ca   : > { %v1927_v21 = vmul.f32 %v1870_v47, %v4895_v40  ;;  %v1900_v1 = vmul.f32 %v4983_v22, %v1899_v32  ;;  %v1836_v29 = vsub.f32 1.0, %v1835_v3  ;;  %v1873_v6 = vmul.f32 %v3669_v58, %v4980_v59  ;;  %v3671_v2 = vpop.eup %3670  ;;  %vm1841_vm0 = vmor %vm1839_vm10, %vm1840_vm11 }
 0x3cb   : > { %v3673_v33 = vpop.eup %3672  ;;  %v1881_v25 = vand.u32 2147483647, %v4980_v59  ;;  %v1896_v17 = vadd.f32 1.0, %v3671_v2  ;;  %vm1878_vm13 = vweird.f32 %v3669_v58  ;;  %v1906_v3 = vand.u32 2147483647, %v4972_v8 }
 0x3cc   : > { %v1931_v20 = vadd.f32 %v1929_v62, %v1927_v21  ;;  %v1874_v12 = vsub.f32 1.0, %v1873_v6  ;;  %v1837_v54 = vmul.f32 %v3667_v57, %v1836_v29  ;;  %v1901_v63 = vadd.f32 %v4983_v22, %v1900_v1  ;;  %vm1879_vm2 = vmor %vm1877_vm14, %vm1878_vm13 }
 0x3cd   : > { %v1846_v21 = vor.u32 1.1754944e-38, %v1845_v51  ;;  %v1884_v59 = vor.u32 1.1754944e-38, %v1883_v13  ;;  %v1909_v8 = vor.u32 1.1754944e-38, %v1908_v35  ;;  %vm1882_vm3 = vcmp.eq.f32.partialorder %v1881_v25, 8.507059e+37 }
 0x3ce   : > { %3674 = vtanh.f32 %v1931_v20  ;;  %v1875_v45 = vmul.f32 %v3669_v58, %v1874_v12  ;;  %v1838_v32 = vadd.f32 %v3667_v57, %v1837_v54  ;;  %v5017_v29 = vsel %vm1949_vm9, %v1931_v20, %v4895_v40  ;;  %v1948_v20 = vpop.permute.xlu1 %1947 }
 0x3cf   : > { %3676 = vrcp.f32 %v1896_v17  ;;  %5675 = vst [vmem:[#allocation28_spill] sm:$0xff] %v5017_v29  ;;  %v1905_v16 = vsel %vm5010_vm5, %v4983_v22, %v1901_v63  ;;  %vm1907_vm4 = vcmp.eq.f32.partialorder %v1906_v3, 8.507059e+37  ;;  %vm1950_vm15 = vcmp.eq.s32.totalorder %v1948_v20, 1 }
 0x3d0   : > { %v1842_v47 = vsel %vm1841_vm0, %v3667_v57, %v1838_v32  ;;  %v1876_v62 = vadd.f32 %v3669_v58, %v1875_v45  ;;  %v1910_v54 = vsel %vm1907_vm4, %v1909_v8, %v1905_v16  ;;  %vm1917_vm7 = vweird.f32 %v1896_v17  ;;  %v5679_v16 = vld [vmem:[#allocation62_spill] sm:$0xff] }
 0x3d1   : > { %v1847_v6 = vsel %vm1844_vm1, %v1846_v21, %v1842_v47 }
 0x3d2   : > { %v1880_v2 = vsel %vm1879_vm2, %v3669_v58, %v1876_v62  ;;  %v1930_v51 = vmul.f32 %v3673_v33, %v1847_v6  ;;  %v1923_v58 = vand.u32 2147483648, %v1896_v17  ;;  %v1921_v33 = vand.u32 2147483647, %v1896_v17 }
 0x3d3   : > { %v1885_v57 = vsel %vm1882_vm3, %v1884_v59, %v1880_v2 }
 0x3d4   : > { %v3675_v7 = vpop.eup %3674  ;;  %v1928_v12 = vmul.f32 %v1885_v57, %v4913_v9  ;;  %v1924_v25 = vor.u32 1.1754944e-38, %v1923_v58  ;;  %vm1922_vm10 = vcmp.eq.f32.partialorder %v1921_v33, 8.507059e+37 }
 0x3d5   : > { %v3677_v45 = vpop.eup %3676  ;;  %v1935_v40 = vmul.f32 %v3675_v7, %v1910_v54  ;;  %v5681_v54 = vld [vmem:[#allocation64_spill] sm:$0xff] }
 0x3d6   : > { %v1932_v32 = vadd.f32 %v1930_v51, %v1928_v12  ;;  %v1913_v29 = vmul.f32 %v3677_v45, %v1896_v17  ;;  %vm1918_vm6 = vweird.f32 %v3677_v45  ;;  %v5678_v17 = vld [vmem:[#allocation92_spill] sm:$0xff]  ;;  %v5680_v12 = vld [vmem:[#allocation95_spill] sm:$0xff] }
 0x3d7   : > { %vm1919_vm8 = vmor %vm1917_vm7, %vm1918_vm6  ;;  %v5030_v62 = vsel %vm1949_vm9, %v1935_v40, %v4918_v26  ;;  %v5676_v26 = vld [vmem:[#allocation91_spill] sm:$0xff]  ;;  %v739_v59 = vadd.f32 %v5679_v16, %v5678_v17  ;;  %v5682_v40 = vld [vmem:[#allocation65_spill] sm:$0xff] }
 0x3d8   : > { %3678 = vtanh.f32 %v1932_v32  ;;  %v1914_v22 = vsub.f32 1.0, %v1913_v29  ;;  %v5025_v35 = vsel %vm1950_vm15, %v1932_v32, %v4913_v9  ;;  %v692_v20 = vadd.f32 %v5682_v40, %v5676_v26  ;;  %v5683_v32 = vld [vmem:[#allocation66_spill] sm:$0xff] }
 0x3da   : > { %v1915_v13 = vmul.f32 %v3677_v45, %v1914_v22  ;;  %v741_v22 = vadd.f32 %v5683_v32, %v5678_v17 }
 0x3dc   : > { %v1916_v63 = vadd.f32 %v3677_v45, %v1915_v13 }
 0x3de   : > { %v3679_v3 = vpop.eup %3678  ;;  %v1920_v21 = vsel %vm1919_vm8, %v3677_v45, %v1916_v63  ;;  %v837_v45 = vadd.f32 %v5681_v54, %v5680_v12 }
 0x3df   : > { %v1925_v1 = vsel %vm1922_vm10, %v1924_v25, %v1920_v21 }
 0x3e0   : > { %v1936_v47 = vmul.f32 %v3679_v3, %v1925_v1 }
 0x3e2   : > { %v5034_v9 = vsel %vm1950_vm15, %v1936_v47, %v4922_v52  ;;  %v5677_v52 = vld [vmem:[#allocation61_spill] sm:$0xff] }
 0x3e3   : > { %v1964_v29 = vpack.c.bf16 %v5034_v9, %v5030_v62  ;;  %v690_v39 = vadd.f32 %v5677_v52, %v5676_v26 }
 0x3e5   : > { %1973 = vmatmul.bf16.vlgmr.msrb.gmra.mxu0 %v1964_v29  ;;  %1987 = vmatmul.bf16.vlgmr.msrb.gmra.mxu1 %v1964_v29 }
 0x3e6   : > { %2001 = vmatmul.bf16.vlgmr.msrb.gmra.mxu2 %v1964_v29  ;;  %2015 = vmatmul.bf16.vlgmr.msrb.gmra.mxu3 %v1964_v29 }
 0x3e7   : > { %2401 = vmatpush.bf16.msrb.mxu0 %v4220_v38  ;;  %2415 = vmatpush.bf16.msrb.mxu1 %v4222_v42 }
 0x3e8   : > { %2429 = vmatpush.bf16.msrb.mxu2 %v4224_v48  ;;  %2443 = vmatpush.bf16.msrb.mxu3 %v4227_v49 }
 0x3eb   : > { %2402 = vmatpush.bf16.msrb.mxu0 %v4229_v50  ;;  %2416 = vmatpush.bf16.msrb.mxu1 %v4232_v53 }
 0x3ec   : > { %2430 = vmatpush.bf16.msrb.mxu2 %v4235_v56  ;;  %2444 = vmatpush.bf16.msrb.mxu3 %v4239_v60 }
 0x3ef   : > { %2403 = vmatpush.bf16.msrb.mxu0 %v4241_v61  ;;  %2417 = vmatpush.bf16.msrb.mxu1 %v4244_v0 }
 0x3f0   : > { %2431 = vmatpush.bf16.msrb.mxu2 %v4247_v4  ;;  %2445 = vmatpush.bf16.msrb.mxu3 %v4251_v5 }
 0x3f3   : > { %2404 = vmatpush.bf16.msrb.mxu0 %v4257_v10  ;;  %2418 = vmatpush.bf16.msrb.mxu1 %v4259_v14 }
 0x3f4   : > { %2432 = vmatpush.bf16.msrb.mxu2 %v4264_v18  ;;  %2446 = vmatpush.bf16.msrb.mxu3 %v4261_v15 }
 0x3f7   : > { %2405 = vmatpush.bf16.msrb.mxu0 %v4270_v23  ;;  %2419 = vmatpush.bf16.msrb.mxu1 %v4272_v27 }
 0x3f8   : > { %2433 = vmatpush.bf16.msrb.mxu2 %v4277_v31  ;;  %2447 = vmatpush.bf16.msrb.mxu3 %v4274_v28 }
 0x3fb   : > { %2406 = vmatpush.bf16.msrb.mxu0 %v4283_v36  ;;  %2420 = vmatpush.bf16.msrb.mxu1 %v4285_v41 }
 0x3fc   : > { %2434 = vmatpush.bf16.msrb.mxu2 %v4290_v46  ;;  %2448 = vmatpush.bf16.msrb.mxu3 %v4287_v43 }
 0x3ff   : > { %2407 = vmatpush.bf16.msrb.mxu0 %v4296_v55  ;;  %2421 = vmatpush.bf16.msrb.mxu1 %v5614_v37 }
 0x400   : > { %2435 = vmatpush.bf16.msrb.mxu2 %v5641_v24  ;;  %2449 = vmatpush.bf16.msrb.mxu3 %v5642_v11 }
 0x403   : > { %2408 = vmatpush.bf16.msrb.mxu0 %v5643_v19  ;;  %2422 = vmatpush.bf16.msrb.mxu1 %v5644_v30 }
 0x404   : > { %2436 = vmatpush.bf16.msrb.mxu2 %v5645_v44  ;;  %2450 = vmatpush.bf16.msrb.mxu3 %v5646_v34 }
 0x462   : > { %v1974_v6 = vpop.f32.mrf.mxu0  ;;  %v1988_v8 = vpop.f32.mrf.mxu1 }
 0x463   : > { %v2021_v2 = vadd.f32 %v1974_v6, %v690_v39  ;;  %v2022_v51 = vadd.f32 %v1988_v8, %v739_v59  ;;  %v5684_v6 = vld [vmem:[#allocation96_spill] sm:$0xff]  ;;  %v5685_v8 = vld [vmem:[#allocation63_spill] sm:$0xff] }
 0x465   : > { %v3308_v57 = vmul.f32 -1.442695, %v2021_v2  ;;  %v3310_v7 = vmul.f32 -1.442695, %v2022_v51  ;;  %v788_v2 = vadd.f32 %v5685_v8, %v5684_v6 }
 0x467   : > { %3680 = vpow2.f32 %v3308_v57  ;;  %v5686_v57 = vld [vmem:[#allocation68_spill] sm:$0xff] }
 0x468   : > { %3682 = vpow2.f32 %v3310_v7  ;;  %v839_v7 = vadd.f32 %v5686_v57, %v5680_v12  ;;  %v5688_v12 = vld [vmem:[#allocation28_spill] sm:$0xff] }
 0x469   : > { %v2016_v58 = vpop.f32.mrf.mxu3  ;;  %v2002_v39 = vpop.f32.mrf.mxu2 }
 0x46a   : > { %v2024_v13 = vadd.f32 %v2016_v58, %v837_v45  ;;  %v1976_v33 = vpop.f32.mrf.mxu0  ;;  %v1990_v63 = vpop.f32.mrf.mxu1  ;;  %v2023_v45 = vadd.f32 %v2002_v39, %v788_v2 }
 0x46b   : > { %v2025_v25 = vadd.f32 %v1976_v33, %v692_v20  ;;  %v2026_v3 = vadd.f32 %v1990_v63, %v741_v22 }
 0x46c   : > { %v3312_v21 = vmul.f32 -1.442695, %v2024_v13 }
 0x46d   : > { %v3681_v1 = vpop.eup %3680  ;;  %v3309_v47 = vmul.f32 -1.442695, %v2025_v25  ;;  %v3311_v16 = vmul.f32 -1.442695, %v2026_v3  ;;  %v5687_v25 = vld [vmem:[#allocation67_spill] sm:$0xff] }
 0x46e   : > { %v3683_v29 = vpop.eup %3682  ;;  %v2035_v52 = vadd.f32 1.0, %v3681_v1  ;;  %3684 = vpow2.f32 %v3312_v21  ;;  %v790_v3 = vadd.f32 %v5687_v25, %v5684_v6 }
 0x46f   : > { %v2073_v59 = vadd.f32 1.0, %v3683_v29  ;;  %3686 = vpow2.f32 %v3309_v47 }
 0x470   : > { %3688 = vrcp.f32 %v2035_v52  ;;  %v2046_v1 = vand.u32 2147483647, %v2035_v52  ;;  %vm2042_vm13 = vweird.f32 %v2035_v52 }
 0x471   : > { %3690 = vrcp.f32 %v2073_v59  ;;  %v2018_v51 = vpop.f32.mrf.mxu3  ;;  %v2004_v47 = vpop.f32.mrf.mxu2  ;;  %v2086_v2 = vand.u32 2147483648, %v2073_v59  ;;  %v2084_v57 = vand.u32 2147483647, %v2073_v59  ;;  %vm2080_vm12 = vweird.f32 %v2073_v59 }
 0x472   : > { %3692 = vpow2.f32 %v3311_v16  ;;  %v2028_v32 = vadd.f32 %v2018_v51, %v839_v7  ;;  %v2048_v51 = vand.u32 2147483648, %v2035_v52  ;;  %vm2047_vm0 = vcmp.eq.f32.partialorder %v2046_v1, 8.507059e+37 }
 0x473   : > { %vm2085_vm2 = vcmp.eq.f32.partialorder %v2084_v57, 8.507059e+37 }
 0x474   : > { %v3685_v54 = vpop.eup %3684  ;;  %v3313_v16 = vmul.f32 -1.442695, %v2028_v32  ;;  %v2049_v32 = vor.u32 1.1754944e-38, %v2048_v51 }
 0x475   : > { %v3687_v40 = vpop.eup %3686  ;;  %v5084_v20 = vadd.f32 1.0, %v3685_v54  ;;  %v2027_v54 = vadd.f32 %v2004_v47, %v790_v3  ;;  %v2087_v3 = vor.u32 1.1754944e-38, %v2086_v2 }
 0x476   : > { %v3689_v22 = vpop.eup %3688  ;;  %v5086_v58 = vadd.f32 1.0, %v3687_v40 }
 0x477   : > { %v3691_v13 = vpop.eup %3690  ;;  %v2038_v33 = vmul.f32 %v3689_v22, %v2035_v52  ;;  %3694 = vrcp.f32 %v5084_v20  ;;  %vm2043_vm9 = vweird.f32 %v3689_v22  ;;  %vm2120_vm3 = vweird.f32 %v5084_v20 }
 0x478   : > { %v3693_v63 = vpop.eup %3692  ;;  %v2076_v21 = vmul.f32 %v3691_v13, %v2073_v59  ;;  %3696 = vtanh.f32 %v2023_v45  ;;  %vm2081_vm11 = vweird.f32 %v3691_v13  ;;  %vm2044_vm14 = vmor %vm2042_vm13, %vm2043_vm9  ;;  %vm2057_vm4 = vweird.f32 %v5086_v58 }
 0x479   : > { %v2039_v29 = vsub.f32 1.0, %v2038_v33  ;;  %3698 = vrcp.f32 %v5086_v58  ;;  %v5092_v39 = vadd.f32 1.0, %v3693_v63  ;;  %v5097_v63 = vpop.permute.xlu2 %2162  ;;  %vm2082_vm1 = vmor %vm2080_vm12, %vm2081_vm11 }
 0x47a   : > { %v2077_v8 = vsub.f32 1.0, %v2076_v21  ;;  %vm2167_vm5 = vcmp.eq.s32.totalorder %v5097_v63, 1  ;;  %v5701_v63 = vld [vmem:[#allocation71_spill] sm:$0xff] }
 0x47b   : > { %v2040_v7 = vmul.f32 %v3689_v22, %v2039_v29  ;;  %3700 = vrcp.f32 %v5092_v39  ;;  %vm2095_vm8 = vweird.f32 %v5092_v39 }
 0x47c   : > { %v2078_v40 = vmul.f32 %v3691_v13, %v2077_v8  ;;  %3702 = vpow2.f32 %v3313_v16 }
 0x47d   : > { %v5095_v25 = vpop.eup %3694  ;;  %v2041_v45 = vadd.f32 %v3689_v22, %v2040_v7  ;;  %3704 = vtanh.f32 %v2027_v54  ;;  %v2061_v54 = vand.u32 2147483647, %v5086_v58 }
 0x47e   : > { %v3697_v33 = vpop.eup %3696  ;;  %v2079_v21 = vadd.f32 %v3691_v13, %v2078_v40  ;;  %v2116_v29 = vmul.f32 %v5095_v25, %v5084_v20  ;;  %v2126_v40 = vand.u32 2147483648, %v5084_v20  ;;  %vm2121_vm6 = vweird.f32 %v5095_v25 }
 0x47f   : > { %v3699_v6 = vpop.eup %3698  ;;  %v2045_v59 = vsel %vm2044_vm14, %v3689_v22, %v2041_v45  ;;  %v2063_v45 = vand.u32 2147483648, %v5086_v58  ;;  %vm5122_vm9 = vmor %vm2120_vm3, %vm2121_vm6  ;;  %vm2062_vm11 = vcmp.eq.f32.partialorder %v2061_v54, 8.507059e+37 }
 0x480   : > { %v2050_v52 = vsel %vm2047_vm0, %v2049_v32, %v2045_v59  ;;  %v2083_v47 = vsel %vm2082_vm1, %v3691_v13, %v2079_v21  ;;  %v2117_v16 = vsub.f32 1.0, %v2116_v29  ;;  %v2053_v8 = vmul.f32 %v3699_v6, %v5086_v58 }
 0x481   : > { %v3701_v1 = vpop.eup %3700  ;;  %v2088_v51 = vsel %vm2085_vm2, %v2087_v3, %v2083_v47  ;;  %v2147_v7 = vmul.f32 %v3697_v33, %v2050_v52  ;;  %v2101_v13 = vand.u32 2147483648, %v5092_v39  ;;  %vm2058_vm15 = vweird.f32 %v3699_v6 }
 0x482   : > { %v2145_v17 = vmul.f32 %v2088_v51, %v5688_v12  ;;  %v2118_v26 = vmul.f32 %v5095_v25, %v2117_v16  ;;  %v2054_v2 = vsub.f32 1.0, %v2053_v8  ;;  %v2091_v22 = vmul.f32 %v3701_v1, %v5092_v39  ;;  %v3703_v57 = vpop.eup %3702  ;;  %vm2059_vm10 = vmor %vm2057_vm4, %vm2058_vm15 }
 0x483   : > { %v3705_v29 = vpop.eup %3704  ;;  %v2099_v59 = vand.u32 2147483647, %v5092_v39  ;;  %v2114_v52 = vadd.f32 1.0, %v3703_v57  ;;  %vm2096_vm7 = vweird.f32 %v3701_v1  ;;  %v2124_v8 = vand.u32 2147483647, %v5084_v20 }
 0x484   : > { %v2149_v33 = vadd.f32 %v2147_v7, %v2145_v17  ;;  %v2092_v32 = vsub.f32 1.0, %v2091_v22  ;;  %v2055_v21 = vmul.f32 %v3699_v6, %v2054_v2  ;;  %v2119_v3 = vadd.f32 %v5095_v25, %v2118_v26  ;;  %vm2097_vm12 = vmor %vm2095_vm8, %vm2096_vm7 }
 0x485   : > { %v2064_v17 = vor.u32 1.1754944e-38, %v2063_v45  ;;  %v2102_v39 = vor.u32 1.1754944e-38, %v2101_v13  ;;  %v2127_v20 = vor.u32 1.1754944e-38, %v2126_v40  ;;  %vm2100_vm13 = vcmp.eq.f32.partialorder %v2099_v59, 8.507059e+37 }
 0x486   : > { %3706 = vtanh.f32 %v2149_v33  ;;  %v2093_v47 = vmul.f32 %v3701_v1, %v2092_v32  ;;  %v2056_v16 = vadd.f32 %v3699_v6, %v2055_v21  ;;  %v5129_v2 = vsel %vm2167_vm5, %v2149_v33, %v5688_v12  ;;  %v2166_v33 = vpop.permute.xlu0 %2165 }
 0x487   : > { %3708 = vrcp.f32 %v2114_v52  ;;  %5691 = vst [vmem:[#allocation36_spill] sm:$0xff] %v5129_v2  ;;  %v2123_v58 = vsel %vm5122_vm9, %v5095_v25, %v2119_v3  ;;  %vm2125_vm14 = vcmp.eq.f32.partialorder %v2124_v8, 8.507059e+37  ;;  %vm2168_vm0 = vcmp.eq.s32.totalorder %v2166_v33, 1 }
 0x488   : > { %v2060_v51 = vsel %vm2059_vm10, %v3699_v6, %v2056_v16  ;;  %v2094_v7 = vadd.f32 %v3701_v1, %v2093_v47  ;;  %v2128_v21 = vsel %vm2125_vm14, %v2127_v20, %v2123_v58  ;;  %vm2135_vm2 = vweird.f32 %v2114_v52 }
 0x489   : > { %v2065_v22 = vsel %vm2062_vm11, %v2064_v17, %v2060_v51 }
 0x48a   : > { %v2098_v57 = vsel %vm2097_vm12, %v3701_v1, %v2094_v7  ;;  %v2148_v45 = vmul.f32 %v3705_v29, %v2065_v22  ;;  %v2141_v1 = vand.u32 2147483648, %v2114_v52  ;;  %v2139_v29 = vand.u32 2147483647, %v2114_v52 }
 0x48b   : > { %v2103_v6 = vsel %vm2100_vm13, %v2102_v39, %v2098_v57  ;;  %v5702_v39 = vld [vmem:[#allocation76_spill] sm:$0xff] }
 0x48c   : > { %v3707_v54 = vpop.eup %3706  ;;  %v2146_v32 = vmul.f32 %v2103_v6, %v5025_v35  ;;  %v2142_v59 = vor.u32 1.1754944e-38, %v2141_v1  ;;  %vm2140_vm4 = vcmp.eq.f32.partialorder %v2139_v29, 8.507059e+37 }
 0x48d   : > { %v3709_v47 = vpop.eup %3708  ;;  %v2153_v12 = vmul.f32 %v3707_v54, %v2128_v21 }
 0x48e   : > { %v2150_v16 = vadd.f32 %v2148_v45, %v2146_v32  ;;  %v2131_v2 = vmul.f32 %v3709_v47, %v2114_v52  ;;  %vm2136_vm1 = vweird.f32 %v3709_v47 }
 0x48f   : > { %vm2137_vm3 = vmor %vm2135_vm2, %vm2136_vm1  ;;  %v5142_v7 = vsel %vm2167_vm5, %v2153_v12, %v5030_v62 }
 0x490   : > { %3710 = vtanh.f32 %v2150_v16  ;;  %v2132_v25 = vsub.f32 1.0, %v2131_v2  ;;  %v5137_v40 = vsel %vm2168_vm0, %v2150_v16, %v5025_v35  ;;  %v5703_v16 = vld [vmem:[#allocation75_spill] sm:$0xff] }
 0x492   : > { %v2133_v13 = vmul.f32 %v3709_v47, %v2132_v25 }
 0x494   : > { %v2134_v3 = vadd.f32 %v3709_v47, %v2133_v13 }
 0x496   : > { %v3711_v8 = vpop.eup %3710  ;;  %v2138_v17 = vsel %vm2137_vm3, %v3709_v47, %v2134_v3 }
 0x497   : > { %v2143_v26 = vsel %vm2140_vm4, %v2142_v59, %v2138_v17 }
 0x498   : > { %v2154_v51 = vmul.f32 %v3711_v8, %v2143_v26 }
 0x49a   : > { %v5146_v35 = vsel %vm2168_vm0, %v2154_v51, %v5034_v9  ;;  %v5700_v9 = vld [vmem:[#allocation96_spill] sm:$0xff] }
 0x49b   : > { %v2182_v2 = vpack.c.bf16 %v5146_v35, %v5142_v7  ;;  %v793_v52 = vadd.f32 %v5701_v63, %v5700_v9  ;;  %v795_v25 = vadd.f32 %v5703_v16, %v5700_v9 }
 0x49d   : > { %2191 = vmatmul.bf16.vlgmr.msra.gmra.mxu0 %v2182_v2  ;;  %2205 = vmatmul.bf16.vlgmr.msra.gmra.mxu1 %v2182_v2 }
 0x49e   : > { %2219 = vmatmul.bf16.vlgmr.msra.gmra.mxu2 %v2182_v2  ;;  %2233 = vmatmul.bf16.vlgmr.msra.gmra.mxu3 %v2182_v2 }
 0x49f   : > { %2619 = vmatpush.bf16.msra.mxu0 %v4220_v38  ;;  %2633 = vmatpush.bf16.msra.mxu1 %v4222_v42  ;;  %v5692_v38 = vld [vmem:[#allocation91_spill] sm:$0xff]  ;;  %v5693_v42 = vld [vmem:[#allocation69_spill] sm:$0xff] }
 0x4a0   : > { %2647 = vmatpush.bf16.msra.mxu2 %v4224_v48  ;;  %2661 = vmatpush.bf16.msra.mxu3 %v4227_v49  ;;  %v695_v48 = vadd.f32 %v5693_v42, %v5692_v38  ;;  %v5694_v49 = vld [vmem:[#allocation92_spill] sm:$0xff] }
 0x4a3   : > { %2620 = vmatpush.bf16.msra.mxu0 %v4229_v50  ;;  %2634 = vmatpush.bf16.msra.mxu1 %v4232_v53  ;;  %v5695_v50 = vld [vmem:[#allocation70_spill] sm:$0xff] }
 0x4a4   : > { %2648 = vmatpush.bf16.msra.mxu2 %v4235_v56  ;;  %2662 = vmatpush.bf16.msra.mxu3 %v4239_v60  ;;  %v744_v53 = vadd.f32 %v5695_v50, %v5694_v49 }
 0x4a7   : > { %2621 = vmatpush.bf16.msra.mxu0 %v4241_v61  ;;  %2635 = vmatpush.bf16.msra.mxu1 %v4244_v0 }
 0x4a8   : > { %2649 = vmatpush.bf16.msra.mxu2 %v4247_v4  ;;  %2663 = vmatpush.bf16.msra.mxu3 %v4251_v5 }
 0x4ab   : > { %2622 = vmatpush.bf16.msra.mxu0 %v4257_v10  ;;  %2636 = vmatpush.bf16.msra.mxu1 %v4259_v14  ;;  %v5696_v10 = vld [vmem:[#allocation95_spill] sm:$0xff]  ;;  %v5697_v14 = vld [vmem:[#allocation72_spill] sm:$0xff] }
 0x4ac   : > { %2650 = vmatpush.bf16.msra.mxu2 %v4264_v18  ;;  %2664 = vmatpush.bf16.msra.mxu3 %v4261_v15  ;;  %v842_v15 = vadd.f32 %v5697_v14, %v5696_v10  ;;  %v5698_v18 = vld [vmem:[#allocation73_spill] sm:$0xff]  ;;  %v844_v22 = vadd.f32 %v5702_v39, %v5696_v10 }
 0x4af   : > { %2623 = vmatpush.bf16.msra.mxu0 %v4270_v23  ;;  %2637 = vmatpush.bf16.msra.mxu1 %v4272_v27  ;;  %v697_v23 = vadd.f32 %v5698_v18, %v5692_v38  ;;  %v5699_v27 = vld [vmem:[#allocation74_spill] sm:$0xff] }
 0x4b0   : > { %2651 = vmatpush.bf16.msra.mxu2 %v4277_v31  ;;  %2665 = vmatpush.bf16.msra.mxu3 %v4274_v28  ;;  %v746_v28 = vadd.f32 %v5699_v27, %v5694_v49 }
 0x4b3   : > { %2624 = vmatpush.bf16.msra.mxu0 %v4283_v36  ;;  %2638 = vmatpush.bf16.msra.mxu1 %v4285_v41 }
 0x4b4   : > { %2652 = vmatpush.bf16.msra.mxu2 %v4290_v46  ;;  %2666 = vmatpush.bf16.msra.mxu3 %v4287_v43 }
 0x4b7   : > { %2625 = vmatpush.bf16.msra.mxu0 %v4296_v55  ;;  %2639 = vmatpush.bf16.msra.mxu1 %v5614_v37 }
 0x4b8   : > { %2653 = vmatpush.bf16.msra.mxu2 %v5641_v24  ;;  %2667 = vmatpush.bf16.msra.mxu3 %v5642_v11 }
 0x4bb   : > { %2626 = vmatpush.bf16.msra.mxu0 %v5643_v19  ;;  %2640 = vmatpush.bf16.msra.mxu1 %v5644_v30 }
 0x4bc   : > { %2654 = vmatpush.bf16.msra.mxu2 %v5645_v44  ;;  %2668 = vmatpush.bf16.msra.mxu3 %v5646_v34 }
 0x51a   : > { %v2192_v56 = vpop.f32.mrf.mxu0  ;;  %v2206_v60 = vpop.f32.mrf.mxu1 }
 0x51b   : > { %v2239_v61 = vadd.f32 %v2192_v56, %v695_v48  ;;  %v2240_v0 = vadd.f32 %v2206_v60, %v744_v53 }
 0x51d   : > { %v3314_v4 = vmul.f32 -1.442695, %v2239_v61  ;;  %v3316_v5 = vmul.f32 -1.442695, %v2240_v0  ;;  %v5209_v61 = vpop.permute.xlu1 %2380 }
 0x51e   : > { %vm2385_vm9 = vcmp.eq.s32.totalorder %v5209_v61, 1 }
 0x51f   : > { %3712 = vpow2.f32 %v3314_v4 }
 0x520   : > { %3714 = vpow2.f32 %v3316_v5 }
 0x521   : > { %v2234_v31 = vpop.f32.mrf.mxu3  ;;  %v2220_v44 = vpop.f32.mrf.mxu2 }
 0x522   : > { %v2242_v36 = vadd.f32 %v2234_v31, %v842_v15  ;;  %v2194_v41 = vpop.f32.mrf.mxu0  ;;  %v2208_v43 = vpop.f32.mrf.mxu1  ;;  %v2241_v57 = vadd.f32 %v2220_v44, %v793_v52 }
 0x523   : > { %v2243_v46 = vadd.f32 %v2194_v41, %v697_v23  ;;  %v2244_v55 = vadd.f32 %v2208_v43, %v746_v28 }
 0x524   : > { %v3318_v37 = vmul.f32 -1.442695, %v2242_v36 }
 0x525   : > { %v3713_v24 = vpop.eup %3712  ;;  %v3315_v11 = vmul.f32 -1.442695, %v2243_v46  ;;  %v3317_v34 = vmul.f32 -1.442695, %v2244_v55  ;;  %v5704_v55 = vld [vmem:[#allocation36_spill] sm:$0xff] }
 0x526   : > { %v3715_v19 = vpop.eup %3714  ;;  %v2253_v30 = vadd.f32 1.0, %v3713_v24  ;;  %3716 = vpow2.f32 %v3318_v37 }
 0x527   : > { %v2291_v62 = vadd.f32 1.0, %v3715_v19  ;;  %3718 = vpow2.f32 %v3315_v11 }
 0x528   : > { %3720 = vrcp.f32 %v2253_v30  ;;  %v2264_v13 = vand.u32 2147483647, %v2253_v30  ;;  %v2266_v51 = vand.u32 2147483648, %v2253_v30  ;;  %vm2260_vm7 = vweird.f32 %v2253_v30 }
 0x529   : > { %3722 = vrcp.f32 %v2291_v62  ;;  %v2236_v58 = vpop.f32.mrf.mxu3  ;;  %v2222_v29 = vpop.f32.mrf.mxu2  ;;  %v2304_v26 = vand.u32 2147483648, %v2291_v62  ;;  %v2302_v2 = vand.u32 2147483647, %v2291_v62  ;;  %vm2298_vm6 = vweird.f32 %v2291_v62 }
 0x52a   : > { %3724 = vpow2.f32 %v3317_v34  ;;  %v2246_v54 = vadd.f32 %v2236_v58, %v844_v22  ;;  %v2245_v48 = vadd.f32 %v2222_v29, %v795_v25  ;;  %vm2265_vm10 = vcmp.eq.f32.partialorder %v2264_v13, 8.507059e+37 }
 0x52b   : > { %v2267_v0 = vor.u32 1.1754944e-38, %v2266_v51  ;;  %v2305_v15 = vor.u32 1.1754944e-38, %v2304_v26  ;;  %vm2303_vm12 = vcmp.eq.f32.partialorder %v2302_v2, 8.507059e+37 }
 0x52c   : > { %v3717_v20 = vpop.eup %3716  ;;  %v3319_v8 = vmul.f32 -1.442695, %v2246_v54 }
 0x52d   : > { %v3719_v45 = vpop.eup %3718  ;;  %v5196_v6 = vadd.f32 1.0, %v3717_v20 }
 0x52e   : > { %v3721_v32 = vpop.eup %3720  ;;  %v5198_v21 = vadd.f32 1.0, %v3719_v45 }
 0x52f   : > { %v3723_v47 = vpop.eup %3722  ;;  %v2256_v12 = vmul.f32 %v3721_v32, %v2253_v30  ;;  %3726 = vrcp.f32 %v5196_v6  ;;  %vm2261_vm5 = vweird.f32 %v3721_v32  ;;  %vm2338_vm13 = vweird.f32 %v5196_v6 }
 0x530   : > { %v3725_v33 = vpop.eup %3724  ;;  %v2294_v1 = vmul.f32 %v3723_v47, %v2291_v62  ;;  %3728 = vtanh.f32 %v2241_v57  ;;  %vm2299_vm15 = vweird.f32 %v3723_v47  ;;  %vm2262_vm8 = vmor %vm2260_vm7, %vm2261_vm5  ;;  %v2344_v46 = vand.u32 2147483648, %v5196_v6 }
 0x531   : > { %v2257_v3 = vsub.f32 1.0, %v2256_v12  ;;  %3730 = vrcp.f32 %v5198_v21  ;;  %v5204_v59 = vadd.f32 1.0, %v3725_v33  ;;  %vm2300_vm11 = vmor %vm2298_vm6, %vm2299_vm15  ;;  %vm2275_vm14 = vweird.f32 %v5198_v21 }
 0x532   : > { %v2295_v17 = vsub.f32 1.0, %v2294_v1  ;;  %v2279_v34 = vand.u32 2147483647, %v5198_v21  ;;  %v2281_v62 = vand.u32 2147483648, %v5198_v21 }
 0x533   : > { %v2258_v42 = vmul.f32 %v3721_v32, %v2257_v3  ;;  %3732 = vrcp.f32 %v5204_v59  ;;  %v2319_v44 = vand.u32 2147483648, %v5204_v59  ;;  %v2317_v20 = vand.u32 2147483647, %v5204_v59 }
 0x534   : > { %v2296_v50 = vmul.f32 %v3723_v47, %v2295_v17  ;;  %3734 = vpow2.f32 %v3319_v8  ;;  %vm2313_vm3 = vweird.f32 %v5204_v59  ;;  %vm2280_vm15 = vcmp.eq.f32.partialorder %v2279_v34, 8.507059e+37  ;;  %v5711_v34 = vld [vmem:[#allocation82_spill] sm:$0xff] }
 0x535   : > { %v5207_v53 = vpop.eup %3726  ;;  %v2259_v56 = vadd.f32 %v3721_v32, %v2258_v42  ;;  %3736 = vtanh.f32 %v2245_v48  ;;  %v2320_v1 = vor.u32 1.1754944e-38, %v2319_v44  ;;  %vm2318_vm7 = vcmp.eq.f32.partialorder %v2317_v20, 8.507059e+37  ;;  %v2384_v42 = vpop.permute.xlu2 %2383 }
 0x536   : > { %v3729_v60 = vpop.eup %3728  ;;  %v2297_v4 = vadd.f32 %v3723_v47, %v2296_v50  ;;  %v2334_v5 = vmul.f32 %v5207_v53, %v5196_v6  ;;  %vm2339_vm1 = vweird.f32 %v5207_v53 }
 0x537   : > { %v3731_v14 = vpop.eup %3730  ;;  %v2263_v18 = vsel %vm2262_vm8, %v3721_v32, %v2259_v56  ;;  %v2342_v32 = vand.u32 2147483647, %v5196_v6  ;;  %vm5234_vm5 = vmor %vm2338_vm13, %vm2339_vm1  ;;  %v2345_v6 = vor.u32 1.1754944e-38, %v2344_v46 }
 0x538   : > { %v2268_v23 = vsel %vm2265_vm10, %v2267_v0, %v2263_v18  ;;  %v2301_v27 = vsel %vm2300_vm11, %v3723_v47, %v2297_v4  ;;  %v2335_v28 = vsub.f32 1.0, %v2334_v5  ;;  %v2271_v31 = vmul.f32 %v3731_v14, %v5198_v21 }
 0x539   : > { %v3733_v36 = vpop.eup %3732  ;;  %v2306_v41 = vsel %vm2303_vm12, %v2305_v15, %v2301_v27  ;;  %v2365_v43 = vmul.f32 %v3729_v60, %v2268_v23  ;;  %vm2276_vm0 = vweird.f32 %v3731_v14  ;;  %v2282_v47 = vor.u32 1.1754944e-38, %v2281_v62 }
 0x53a   : > { %v2363_v37 = vmul.f32 %v2306_v41, %v5704_v55  ;;  %v2336_v24 = vmul.f32 %v5207_v53, %v2335_v28  ;;  %v2272_v11 = vsub.f32 1.0, %v2271_v31  ;;  %v2309_v19 = vmul.f32 %v3733_v36, %v5204_v59  ;;  %v3735_v30 = vpop.eup %3734  ;;  %vm2277_vm4 = vmor %vm2275_vm14, %vm2276_vm0 }
 0x53b   : > { %v3737_v39 = vpop.eup %3736  ;;  %v2332_v57 = vadd.f32 1.0, %v3735_v30  ;;  %vm2314_vm2 = vweird.f32 %v3733_v36  ;;  %vm2343_vm8 = vcmp.eq.f32.partialorder %v2342_v32, 8.507059e+37  ;;  %vm2386_vm10 = vcmp.eq.s32.totalorder %v2384_v42, 1  ;;  %v5710_v30 = vld [vmem:[#allocation81_spill] sm:$0xff] }
 0x53c   : > { %v2367_v63 = vadd.f32 %v2365_v43, %v2363_v37  ;;  %v2310_v52 = vsub.f32 1.0, %v2309_v19  ;;  %v2273_v58 = vmul.f32 %v3731_v14, %v2272_v11  ;;  %v2337_v22 = vadd.f32 %v5207_v53, %v2336_v24  ;;  %vm2315_vm6 = vmor %vm2313_vm3, %vm2314_vm2  ;;  %v5708_v43 = vld [vmem:[#allocation78_spill] sm:$0xff]  ;;  %v5709_v11 = vld [vmem:[#allocation80_spill] sm:$0xff] }
 0x53d   : > { %v2359_v60 = vand.u32 2147483648, %v2332_v57  ;;  %v2357_v4 = vand.u32 2147483647, %v2332_v57  ;;  %vm2353_vm12 = vweird.f32 %v2332_v57  ;;  %v749_v46 = vadd.f32 %v5708_v43, %v5694_v49 }
 0x53e   : > { %3738 = vtanh.f32 %v2367_v63  ;;  %v2311_v45 = vmul.f32 %v3733_v36, %v2310_v52  ;;  %v2274_v54 = vadd.f32 %v3731_v14, %v2273_v58  ;;  %v5241_v25 = vsel %vm2385_vm9, %v2367_v63, %v5704_v55 }
 0x53f   : > { %3740 = vrcp.f32 %v2332_v57  ;;  %v2341_v21 = vsel %vm5234_vm5, %v5207_v53, %v2337_v22  ;;  %vm2358_vm14 = vcmp.eq.f32.partialorder %v2357_v4, 8.507059e+37  ;;  %v847_v19 = vadd.f32 %v5709_v11, %v5696_v10 }
 0x540   : > { %v2278_v33 = vsel %vm2277_vm4, %v3731_v14, %v2274_v54  ;;  %v2312_v16 = vadd.f32 %v3733_v36, %v2311_v45  ;;  %v2346_v26 = vsel %vm2343_vm8, %v2345_v6, %v2341_v21  ;;  %v2360_v14 = vor.u32 1.1754944e-38, %v2359_v60  ;;  %v5712_v21 = vld [vmem:[#allocation79_spill] sm:$0xff]  ;;  %v5713_v6 = vld [vmem:[#allocation84_spill] sm:$0xff] }
 0x541   : > { %v2283_v13 = vsel %vm2280_vm15, %v2282_v47, %v2278_v33  ;;  %v702_v44 = vadd.f32 %v5710_v30, %v5692_v38  ;;  %v751_v62 = vadd.f32 %v5711_v34, %v5694_v49 }
 0x542   : > { %v2316_v29 = vsel %vm2315_vm6, %v3733_v36, %v2312_v16  ;;  %v2366_v3 = vmul.f32 %v3737_v39, %v2283_v13  ;;  %v5707_v36 = vld [vmem:[#allocation77_spill] sm:$0xff] }
 0x543   : > { %v2321_v59 = vsel %vm2318_vm7, %v2320_v1, %v2316_v29  ;;  %v700_v41 = vadd.f32 %v5707_v36, %v5692_v38  ;;  %v798_v1 = vadd.f32 %v5712_v21, %v5700_v9  ;;  %v849_v29 = vadd.f32 %v5713_v6, %v5696_v10 }
 0x544   : > { %v3739_v8 = vpop.eup %3738  ;;  %v2364_v17 = vmul.f32 %v2321_v59, %v5137_v40 }
 0x545   : > { %v3741_v51 = vpop.eup %3740  ;;  %v2371_v2 = vmul.f32 %v3739_v8, %v2346_v26 }
 0x546   : > { %v2368_v48 = vadd.f32 %v2366_v3, %v2364_v17  ;;  %v2349_v50 = vmul.f32 %v3741_v51, %v2332_v57  ;;  %vm2354_vm11 = vweird.f32 %v3741_v51 }
 0x547   : > { %vm2355_vm13 = vmor %vm2353_vm12, %vm2354_vm11  ;;  %v5254_v28 = vsel %vm2385_vm9, %v2371_v2, %v5142_v7 }
 0x548   : > { %3742 = vtanh.f32 %v2368_v48  ;;  %v2350_v53 = vsub.f32 1.0, %v2349_v50  ;;  %v5249_v56 = vsel %vm2386_vm10, %v2368_v48, %v5137_v40 }
 0x54a   : > { %v2351_v0 = vmul.f32 %v3741_v51, %v2350_v53  ;;  %v5714_v53 = vld [vmem:[#allocation83_spill] sm:$0xff] }
 0x54b   : > { %v800_v60 = vadd.f32 %v5714_v53, %v5700_v9 }
 0x54c   : > { %v2352_v5 = vadd.f32 %v3741_v51, %v2351_v0 }
 0x54e   : > { %v3743_v15 = vpop.eup %3742  ;;  %v2356_v18 = vsel %vm2355_vm13, %v3741_v51, %v2352_v5 }
 0x54f   : > { %v2361_v23 = vsel %vm2358_vm14, %v2360_v14, %v2356_v18 }
 0x550   : > { %v2372_v27 = vmul.f32 %v3743_v15, %v2361_v23 }
 0x552   : > { %v5258_v40 = vsel %vm2386_vm10, %v2372_v27, %v5146_v35 }
 0x553   : > { %v2400_v31 = vpack.c.bf16 %v5258_v40, %v5254_v28 }
 0x555   : > { %2409 = vmatmul.bf16.vlgmr.msrb.gmra.mxu0 %v2400_v31  ;;  %2423 = vmatmul.bf16.vlgmr.msrb.gmra.mxu1 %v2400_v31 }
 0x556   : > { %2437 = vmatmul.bf16.vlgmr.msrb.gmra.mxu2 %v2400_v31  ;;  %2451 = vmatmul.bf16.vlgmr.msrb.gmra.mxu3 %v2400_v31 }
 0x5d2   : > { %v2410_v61 = vpop.f32.mrf.mxu0  ;;  %v2424_v7 = vpop.f32.mrf.mxu1 }
 0x5d3   : > { %v2457_v55 = vadd.f32 %v2410_v61, %v700_v41  ;;  %v2458_v37 = vadd.f32 %v2424_v7, %v749_v46 }
 0x5d5   : > { %v3320_v24 = vmul.f32 -1.442695, %v2457_v55  ;;  %v3322_v35 = vmul.f32 -1.442695, %v2458_v37  ;;  %v5289_v37 = vpop.permute.xlu0 %2598 }
 0x5d6   : > { %vm2603_vm5 = vcmp.eq.s32.totalorder %v5289_v37, 1 }
 0x5d7   : > { %3744 = vpow2.f32 %v3320_v24 }
 0x5d8   : > { %3746 = vpow2.f32 %v3322_v35 }
 0x5d9   : > { %v2452_v63 = vpop.f32.mrf.mxu3  ;;  %v2438_v12 = vpop.f32.mrf.mxu2 }
 0x5da   : > { %v2460_v52 = vadd.f32 %v2452_v63, %v847_v19  ;;  %v2412_v58 = vpop.f32.mrf.mxu0  ;;  %v2426_v39 = vpop.f32.mrf.mxu1  ;;  %v2459_v59 = vadd.f32 %v2438_v12, %v798_v1 }
 0x5db   : > { %v2461_v22 = vadd.f32 %v2412_v58, %v702_v44  ;;  %v2462_v20 = vadd.f32 %v2426_v39, %v751_v62 }
 0x5dc   : > { %v3324_v57 = vmul.f32 -1.442695, %v2460_v52 }
 0x5dd   : > { %v3745_v45 = vpop.eup %3744  ;;  %v3321_v54 = vmul.f32 -1.442695, %v2461_v22  ;;  %v3323_v33 = vmul.f32 -1.442695, %v2462_v20 }
 0x5de   : > { %v3747_v32 = vpop.eup %3746  ;;  %v2471_v47 = vadd.f32 1.0, %v3745_v45  ;;  %3748 = vpow2.f32 %v3324_v57 }
 0x5df   : > { %v2509_v16 = vadd.f32 1.0, %v3747_v32  ;;  %3750 = vpow2.f32 %v3321_v54 }
 0x5e0   : > { %3752 = vrcp.f32 %v2471_v47  ;;  %v2482_v4 = vand.u32 2147483647, %v2471_v47  ;;  %v2484_v31 = vand.u32 2147483648, %v2471_v47  ;;  %vm2478_vm2 = vweird.f32 %v2471_v47 }
 0x5e1   : > { %3754 = vrcp.f32 %v2509_v16  ;;  %v2454_v13 = vpop.f32.mrf.mxu3  ;;  %v2440_v5 = vpop.f32.mrf.mxu2  ;;  %v2522_v27 = vand.u32 2147483648, %v2509_v16  ;;  %v2520_v36 = vand.u32 2147483647, %v2509_v16  ;;  %vm2516_vm1 = vweird.f32 %v2509_v16 }
 0x5e2   : > { %3756 = vpow2.f32 %v3323_v33  ;;  %v2464_v26 = vadd.f32 %v2454_v13, %v849_v29  ;;  %v2463_v43 = vadd.f32 %v2440_v5, %v800_v60  ;;  %vm2483_vm4 = vcmp.eq.f32.partialorder %v2482_v4, 8.507059e+37 }
 0x5e3   : > { %v2485_v24 = vor.u32 1.1754944e-38, %v2484_v31  ;;  %v2523_v30 = vor.u32 1.1754944e-38, %v2522_v27  ;;  %vm2521_vm6 = vcmp.eq.f32.partialorder %v2520_v36, 8.507059e+37 }
 0x5e4   : > { %v3749_v3 = vpop.eup %3748  ;;  %v3325_v18 = vmul.f32 -1.442695, %v2464_v26 }
 0x5e5   : > { %v3751_v8 = vpop.eup %3750  ;;  %v5276_v17 = vadd.f32 1.0, %v3749_v3 }
 0x5e6   : > { %v3753_v51 = vpop.eup %3752  ;;  %v5278_v2 = vadd.f32 1.0, %v3751_v8 }
 0x5e7   : > { %v3755_v42 = vpop.eup %3754  ;;  %v2474_v48 = vmul.f32 %v3753_v51, %v2471_v47  ;;  %3758 = vrcp.f32 %v5276_v17  ;;  %vm2479_vm9 = vweird.f32 %v3753_v51  ;;  %vm2556_vm7 = vweird.f32 %v5276_v17 }
 0x5e8   : > { %v3757_v50 = vpop.eup %3756  ;;  %v2512_v0 = vmul.f32 %v3755_v42, %v2509_v16  ;;  %3760 = vtanh.f32 %v2459_v59  ;;  %vm2517_vm0 = vweird.f32 %v3755_v42  ;;  %vm2480_vm3 = vmor %vm2478_vm2, %vm2479_vm9  ;;  %v2562_v20 = vand.u32 2147483648, %v5276_v17 }
 0x5e9   : > { %v2475_v14 = vsub.f32 1.0, %v2474_v48  ;;  %3762 = vrcp.f32 %v5278_v2  ;;  %v5284_v15 = vadd.f32 1.0, %v3757_v50  ;;  %vm2518_vm15 = vmor %vm2516_vm1, %vm2517_vm0  ;;  %vm2493_vm8 = vweird.f32 %v5278_v2 }
 0x5ea   : > { %v2513_v23 = vsub.f32 1.0, %v2512_v0  ;;  %v2497_v33 = vand.u32 2147483647, %v5278_v2  ;;  %v2499_v16 = vand.u32 2147483648, %v5278_v2 }
 0x5eb   : > { %v2476_v41 = vmul.f32 %v3753_v51, %v2475_v14  ;;  %3764 = vrcp.f32 %v5284_v15  ;;  %v2537_v12 = vand.u32 2147483648, %v5284_v15  ;;  %v2535_v3 = vand.u32 2147483647, %v5284_v15 }
 0x5ec   : > { %v2514_v46 = vmul.f32 %v3755_v42, %v2513_v23  ;;  %3766 = vpow2.f32 %v3325_v18  ;;  %vm2531_vm13 = vweird.f32 %v5284_v15  ;;  %vm2498_vm0 = vcmp.eq.f32.partialorder %v2497_v33, 8.507059e+37  ;;  %v2602_v23 = vpop.permute.xlu1 %2601  ;;  %v5721_v33 = vld [vmem:[#allocation90_spill] sm:$0xff] }
 0x5ed   : > { %v5287_v61 = vpop.eup %3758  ;;  %v2477_v7 = vadd.f32 %v3753_v51, %v2476_v41  ;;  %3768 = vtanh.f32 %v2463_v43  ;;  %v2538_v0 = vor.u32 1.1754944e-38, %v2537_v12  ;;  %vm2536_vm2 = vcmp.eq.f32.partialorder %v2535_v3, 8.507059e+37 }
 0x5ee   : > { %v3761_v55 = vpop.eup %3760  ;;  %v2515_v35 = vadd.f32 %v3755_v42, %v2514_v46  ;;  %v2552_v11 = vmul.f32 %v5287_v61, %v5276_v17  ;;  %vm2557_vm11 = vweird.f32 %v5287_v61 }
 0x5ef   : > { %v3763_v19 = vpop.eup %3762  ;;  %v2481_v44 = vsel %vm2480_vm3, %v3753_v51, %v2477_v7  ;;  %v2560_v51 = vand.u32 2147483647, %v5276_v17  ;;  %vm5314_vm9 = vmor %vm2556_vm7, %vm2557_vm11  ;;  %v2563_v17 = vor.u32 1.1754944e-38, %v2562_v20 }
 0x5f0   : > { %v2486_v34 = vsel %vm2483_vm4, %v2485_v24, %v2481_v44  ;;  %v2519_v62 = vsel %vm2518_vm15, %v3755_v42, %v2515_v35  ;;  %v2553_v63 = vsub.f32 1.0, %v2552_v11  ;;  %v2489_v52 = vmul.f32 %v3763_v19, %v5278_v2 }
 0x5f1   : > { %v3765_v58 = vpop.eup %3764  ;;  %v2524_v39 = vsel %vm2521_vm6, %v2523_v30, %v2519_v62  ;;  %v2583_v22 = vmul.f32 %v3761_v55, %v2486_v34  ;;  %vm2494_vm10 = vweird.f32 %v3763_v19  ;;  %v2500_v42 = vor.u32 1.1754944e-38, %v2499_v16 }
 0x5f2   : > { %v2581_v57 = vmul.f32 %v2524_v39, %v5241_v25  ;;  %v2554_v45 = vmul.f32 %v5287_v61, %v2553_v63  ;;  %v2490_v54 = vsub.f32 1.0, %v2489_v52  ;;  %v2527_v32 = vmul.f32 %v3765_v58, %v5284_v15  ;;  %v3767_v47 = vpop.eup %3766  ;;  %vm2495_vm14 = vmor %vm2493_vm8, %vm2494_vm10  ;;  %v5717_v52 = vld [vmem:[#allocation85_spill] sm:$0xff]  ;;  %v5718_v39 = vld [vmem:[#allocation86_spill] sm:$0xff] }
 0x5f3   : > { %v3769_v6 = vpop.eup %3768  ;;  %v2550_v59 = vadd.f32 1.0, %v3767_v47  ;;  %vm2532_vm12 = vweird.f32 %v3765_v58  ;;  %vm2561_vm3 = vcmp.eq.f32.partialorder %v2560_v51, 8.507059e+37  ;;  %vm2604_vm4 = vcmp.eq.s32.totalorder %v2602_v23, 1  ;;  %v5720_v47 = vld [vmem:[#allocation89_spill] sm:$0xff] }
 0x5f4   : > { %v2585_v21 = vadd.f32 %v2583_v22, %v2581_v57  ;;  %v2528_v1 = vsub.f32 1.0, %v2527_v32  ;;  %v2491_v13 = vmul.f32 %v3763_v19, %v2490_v54  ;;  %v2555_v29 = vadd.f32 %v5287_v61, %v2554_v45  ;;  %vm2533_vm1 = vmor %vm2531_vm13, %vm2532_vm12  ;;  %v5719_v54 = vld [vmem:[#allocation88_spill] sm:$0xff] }
 0x5f5   : > { %v2577_v7 = vand.u32 2147483648, %v2550_v59  ;;  %v2575_v24 = vand.u32 2147483647, %v2550_v59  ;;  %vm2571_vm6 = vweird.f32 %v2550_v59  ;;  %v754_v22 = vadd.f32 %v5718_v39, %v5694_v49 }
 0x5f6   : > { %3770 = vtanh.f32 %v2585_v21  ;;  %v2529_v8 = vmul.f32 %v3765_v58, %v2528_v1  ;;  %v2492_v26 = vadd.f32 %v3763_v19, %v2491_v13  ;;  %v5321_v60 = vsel %vm2603_vm5, %v2585_v21, %v5241_v25 }
 0x5f7   : > { %3772 = vrcp.f32 %v2550_v59  ;;  %v2559_v2 = vsel %vm5314_vm9, %v5287_v61, %v2555_v29  ;;  %v2578_v11 = vor.u32 1.1754944e-38, %v2577_v7  ;;  %vm2576_vm8 = vcmp.eq.f32.partialorder %v2575_v24, 8.507059e+37  ;;  %v5366_v24 = vpop.permute.xlu2 %2816 }
 0x5f8   : > { %v2496_v50 = vsel %vm2495_vm14, %v3763_v19, %v2492_v26  ;;  %v2530_v53 = vadd.f32 %v3765_v58, %v2529_v8  ;;  %v2564_v31 = vsel %vm2561_vm3, %v2563_v17, %v2559_v2  ;;  %v852_v32 = vadd.f32 %v5719_v54, %v5696_v10 }
 0x5f9   : > { %v2501_v4 = vsel %vm2498_vm0, %v2500_v42, %v2496_v50  ;;  %v707_v12 = vadd.f32 %v5720_v47, %v5692_v38  ;;  %v756_v16 = vadd.f32 %v5721_v33, %v5694_v49  ;;  %v5722_v49 = vld [vmem:[#allocation87_spill] sm:$0xff]  ;;  %vm2821_vm11 = vcmp.eq.s32.totalorder %v5366_v24, 1 }
 0x5fa   : > { %v2534_v5 = vsel %vm2533_vm1, %v3765_v58, %v2530_v53  ;;  %v2584_v14 = vmul.f32 %v3769_v6, %v2501_v4  ;;  %v705_v58 = vadd.f32 %v5717_v52, %v5692_v38  ;;  %v803_v53 = vadd.f32 %v5722_v49, %v5700_v9 }
 0x5fb   : > { %v2539_v15 = vsel %vm2536_vm2, %v2538_v0, %v2534_v5  ;;  %v5723_v0 = vld [vmem:[#allocation93_spill] sm:$0xff] }
 0x5fc   : > { %v3771_v18 = vpop.eup %3770  ;;  %v2582_v27 = vmul.f32 %v2539_v15, %v5249_v56  ;;  %v854_v4 = vadd.f32 %v5723_v0, %v5696_v10 }
 0x5fd   : > { %v3773_v25 = vpop.eup %3772  ;;  %v2589_v36 = vmul.f32 %v3771_v18, %v2564_v31 }
 0x5fe   : > { %v2586_v41 = vadd.f32 %v2584_v14, %v2582_v27  ;;  %v2567_v43 = vmul.f32 %v3773_v25, %v2550_v59  ;;  %vm2572_vm15 = vweird.f32 %v3773_v25 }
 0x5ff   : > { %vm2573_vm7 = vmor %vm2571_vm6, %vm2572_vm15  ;;  %v5334_v62 = vsel %vm2603_vm5, %v2589_v36, %v5254_v28 }
 0x600   : > { %3774 = vtanh.f32 %v2586_v41  ;;  %v2568_v46 = vsub.f32 1.0, %v2567_v43  ;;  %v5329_v61 = vsel %vm2604_vm4, %v2586_v41, %v5249_v56  ;;  %v5724_v41 = vld [vmem:[#allocation94_spill] sm:$0xff] }
 0x601   : > { %v805_v43 = vadd.f32 %v5724_v41, %v5700_v9 }
 0x602   : > { %v2569_v55 = vmul.f32 %v3773_v25, %v2568_v46 }
 0x604   : > { %v2570_v35 = vadd.f32 %v3773_v25, %v2569_v55 }
 0x606   : > { %v3775_v19 = vpop.eup %3774  ;;  %v2574_v30 = vsel %vm2573_vm7, %v3773_v25, %v2570_v35 }
 0x607   : > { %v2579_v44 = vsel %vm2576_vm8, %v2578_v11, %v2574_v30 }
 0x608   : > { %v2590_v34 = vmul.f32 %v3775_v19, %v2579_v44 }
 0x60a   : > { %v5338_v56 = vsel %vm2604_vm4, %v2590_v34, %v5258_v40 }
 0x60b   : > { %v2618_v63 = vpack.c.bf16 %v5338_v56, %v5334_v62 }
 0x60d   : > { %2627 = vmatmul.bf16.vlgmr.msra.gmra.mxu0 %v2618_v63  ;;  %2641 = vmatmul.bf16.vlgmr.msra.gmra.mxu1 %v2618_v63 }
 0x60e   : > { %2655 = vmatmul.bf16.vlgmr.msra.gmra.mxu2 %v2618_v63  ;;  %2669 = vmatmul.bf16.vlgmr.msra.gmra.mxu3 %v2618_v63 }
 0x68a   : > { %v2628_v37 = vpop.f32.mrf.mxu0  ;;  %v2642_v28 = vpop.f32.mrf.mxu1 }
 0x68b   : > { %v2675_v20 = vadd.f32 %v2628_v37, %v705_v58  ;;  %v2676_v57 = vadd.f32 %v2642_v28, %v754_v22 }
 0x68d   : > { %v3326_v45 = vmul.f32 -1.442695, %v2675_v20  ;;  %v3328_v40 = vmul.f32 -1.442695, %v2676_v57 }
 0x68f   : > { %3776 = vpow2.f32 %v3326_v45 }
 0x690   : > { %3778 = vpow2.f32 %v3328_v40 }
 0x691   : > { %v2670_v21 = vpop.f32.mrf.mxu3  ;;  %v2656_v38 = vpop.f32.mrf.mxu2 }
 0x692   : > { %v2678_v1 = vadd.f32 %v2670_v21, %v852_v32  ;;  %v2630_v13 = vpop.f32.mrf.mxu0  ;;  %v2644_v6 = vpop.f32.mrf.mxu1  ;;  %v2677_v5 = vadd.f32 %v2656_v38, %v803_v53 }
 0x693   : > { %v2679_v29 = vadd.f32 %v2630_v13, %v707_v12  ;;  %v2680_v3 = vadd.f32 %v2644_v6, %v756_v16 }
 0x694   : > { %v3330_v59 = vmul.f32 -1.442695, %v2678_v1 }
 0x695   : > { %v3777_v8 = vpop.eup %3776  ;;  %v3327_v26 = vmul.f32 -1.442695, %v2679_v29  ;;  %v3329_v48 = vmul.f32 -1.442695, %v2680_v3 }
 0x696   : > { %v3779_v51 = vpop.eup %3778  ;;  %v2689_v42 = vadd.f32 1.0, %v3777_v8  ;;  %3780 = vpow2.f32 %v3330_v59 }
 0x697   : > { %v2727_v50 = vadd.f32 1.0, %v3779_v51  ;;  %3782 = vpow2.f32 %v3327_v26 }
 0x698   : > { %3784 = vrcp.f32 %v2689_v42  ;;  %v2700_v19 = vand.u32 2147483647, %v2689_v42  ;;  %v2702_v30 = vand.u32 2147483648, %v2689_v42  ;;  %vm2696_vm12 = vweird.f32 %v2689_v42 }
 0x699   : > { %3786 = vrcp.f32 %v2727_v50  ;;  %v2672_v2 = vpop.f32.mrf.mxu3  ;;  %v2740_v11 = vand.u32 2147483648, %v2727_v50  ;;  %v2658_v44 = vpop.f32.mrf.mxu2  ;;  %v2738_v63 = vand.u32 2147483647, %v2727_v50  ;;  %vm2734_vm13 = vweird.f32 %v2727_v50 }
 0x69a   : > { %3788 = vpow2.f32 %v3329_v48  ;;  %v2682_v18 = vadd.f32 %v2672_v2, %v854_v4  ;;  %v2681_v39 = vadd.f32 %v2658_v44, %v805_v43  ;;  %v2703_v37 = vor.u32 1.1754944e-38, %v2702_v30 }
 0x69b   : > { %v2741_v45 = vor.u32 1.1754944e-38, %v2740_v11  ;;  %vm2701_vm0 = vcmp.eq.f32.partialorder %v2700_v19, 8.507059e+37  ;;  %vm2739_vm1 = vcmp.eq.f32.partialorder %v2738_v63, 8.507059e+37 }
 0x69c   : > { %v3781_v17 = vpop.eup %3780  ;;  %v3331_v55 = vmul.f32 -1.442695, %v2682_v18 }
 0x69d   : > { %v3783_v14 = vpop.eup %3782  ;;  %v5356_v15 = vadd.f32 1.0, %v3781_v17 }
 0x69e   : > { %v3785_v23 = vpop.eup %3784  ;;  %v5358_v27 = vadd.f32 1.0, %v3783_v14 }
 0x69f   : > { %v3787_v31 = vpop.eup %3786  ;;  %v2692_v25 = vmul.f32 %v3785_v23, %v2689_v42  ;;  %3790 = vrcp.f32 %v5356_v15  ;;  %vm2697_vm5 = vweird.f32 %v3785_v23  ;;  %vm2774_vm2 = vweird.f32 %v5356_v15 }
 0x6a0   : > { %v3789_v36 = vpop.eup %3788  ;;  %v2730_v46 = vmul.f32 %v3787_v31, %v2727_v50  ;;  %3792 = vtanh.f32 %v2677_v5  ;;  %vm2735_vm10 = vweird.f32 %v3787_v31  ;;  %vm2698_vm14 = vmor %vm2696_vm12, %vm2697_vm5  ;;  %v2780_v59 = vand.u32 2147483648, %v5356_v15 }
 0x6a1   : > { %v2693_v10 = vsub.f32 1.0, %v2692_v25  ;;  %3794 = vrcp.f32 %v5358_v27  ;;  %v5364_v7 = vadd.f32 1.0, %v3789_v36  ;;  %vm2736_vm9 = vmor %vm2734_vm13, %vm2735_vm10  ;;  %v2715_v26 = vand.u32 2147483647, %v5358_v27 }
 0x6a2   : > { %v2731_v35 = vsub.f32 1.0, %v2730_v46  ;;  %v2717_v51 = vand.u32 2147483648, %v5358_v27  ;;  %v2778_v5 = vand.u32 2147483647, %v5356_v15  ;;  %vm2711_vm7 = vweird.f32 %v5358_v27 }
 0x6a3   : > { %v2694_v34 = vmul.f32 %v3785_v23, %v2693_v10  ;;  %3796 = vrcp.f32 %v5364_v7  ;;  %v2755_v8 = vand.u32 2147483648, %v5364_v7  ;;  %v2753_v49 = vand.u32 2147483647, %v5364_v7  ;;  %v2820_v10 = vpop.permute.xlu0 %2819 }
 0x6a4   : > { %v2732_v9 = vmul.f32 %v3787_v31, %v2731_v35  ;;  %3798 = vpow2.f32 %v3331_v55  ;;  %vm2749_vm8 = vweird.f32 %v5364_v7  ;;  %vm2716_vm12 = vcmp.eq.f32.partialorder %v2715_v26, 8.507059e+37 }
 0x6a5   : > { %v5369_v52 = vpop.eup %3790  ;;  %v2695_v58 = vadd.f32 %v3785_v23, %v2694_v34  ;;  %3800 = vtanh.f32 %v2681_v39  ;;  %v2781_v36 = vor.u32 1.1754944e-38, %v2780_v59  ;;  %vm2754_vm13 = vcmp.eq.f32.partialorder %v2753_v49, 8.507059e+37 }
 0x6a6   : > { %v3793_v22 = vpop.eup %3792  ;;  %v2733_v28 = vadd.f32 %v3787_v31, %v2732_v9  ;;  %v2770_v20 = vmul.f32 %v5369_v52, %v5356_v15  ;;  %vm2775_vm3 = vweird.f32 %v5369_v52 }
 0x6a7   : > { %v3795_v57 = vpop.eup %3794  ;;  %v2699_v40 = vsel %vm2698_vm14, %v3785_v23, %v2695_v58  ;;  %vm5391_vm6 = vmor %vm2774_vm2, %vm2775_vm3  ;;  %vm2779_vm14 = vcmp.eq.f32.partialorder %v2778_v5, 8.507059e+37 }
 0x6a8   : > { %v2704_v54 = vsel %vm2701_vm0, %v2703_v37, %v2699_v40  ;;  %v2737_v32 = vsel %vm2736_vm9, %v3787_v31, %v2733_v28  ;;  %v2771_v47 = vsub.f32 1.0, %v2770_v20  ;;  %v2707_v12 = vmul.f32 %v3795_v57, %v5358_v27 }
 0x6a9   : > { %v3797_v33 = vpop.eup %3796  ;;  %v2742_v16 = vsel %vm2739_vm1, %v2741_v45, %v2737_v32  ;;  %v2801_v21 = vmul.f32 %v3793_v22, %v2704_v54  ;;  %vm2712_vm4 = vweird.f32 %v3795_v57  ;;  %v2756_v31 = vor.u32 1.1754944e-38, %v2755_v8 }
 0x6aa   : > { %v2799_v1 = vmul.f32 %v2742_v16, %v5321_v60  ;;  %v2772_v13 = vmul.f32 %v5369_v52, %v2771_v47  ;;  %v2708_v6 = vsub.f32 1.0, %v2707_v12  ;;  %v2745_v29 = vmul.f32 %v3797_v33, %v5364_v7  ;;  %v3799_v3 = vpop.eup %3798  ;;  %vm2713_vm5 = vmor %vm2711_vm7, %vm2712_vm4 }
 0x6ab   : > { %v2768_v53 = vadd.f32 1.0, %v3799_v3  ;;  %vm2750_vm15 = vweird.f32 %v3797_v33  ;;  %v3801_v4 = vpop.eup %3800  ;;  %vm2822_vm9 = vcmp.eq.s32.totalorder %v2820_v10, 1 }
 0x6ac   : > { %v2803_v42 = vadd.f32 %v2801_v21, %v2799_v1  ;;  %v2746_v48 = vsub.f32 1.0, %v2745_v29  ;;  %v2709_v50 = vmul.f32 %v3795_v57, %v2708_v6  ;;  %v2773_v38 = vadd.f32 %v5369_v52, %v2772_v13  ;;  %vm2751_vm10 = vmor %vm2749_vm8, %vm2750_vm15 }
 0x6ad   : > { %v2795_v9 = vand.u32 2147483648, %v2768_v53  ;;  %v2793_v58 = vand.u32 2147483647, %v2768_v53  ;;  %vm2789_vm1 = vweird.f32 %v2768_v53 }
 0x6ae   : > { %3802 = vtanh.f32 %v2803_v42  ;;  %v2825_v2 = vsel %vm2821_vm11, %v2803_v42, %v5321_v60  ;;  %v2747_v0 = vmul.f32 %v3797_v33, %v2746_v48  ;;  %v2710_v14 = vadd.f32 %v3795_v57, %v2709_v50 }
 0x6af   : > { %2829 = vst [vmem:[#allocation4 + $0x8] sm:$0xff] %v2825_v2  ;;  %3804 = vrcp.f32 %v2768_v53  ;;  %v2718_v60 = vor.u32 1.1754944e-38, %v2717_v51  ;;  %v2777_v23 = vsel %vm5391_vm6, %v5369_v52, %v2773_v38  ;;  %v2796_v22 = vor.u32 1.1754944e-38, %v2795_v9 }
 0x6b0   : > { %v2748_v18 = vadd.f32 %v3797_v33, %v2747_v0  ;;  %v2714_v25 = vsel %vm2713_vm5, %v3795_v57, %v2710_v14  ;;  %v2782_v7 = vsel %vm2779_vm14, %v2781_v36, %v2777_v23  ;;  %vm2794_vm3 = vcmp.eq.f32.partialorder %v2793_v58, 8.507059e+37 }
 0x6b1   : > { %v2719_v15 = vsel %vm2716_vm12, %v2718_v60, %v2714_v25 }
 0x6b2   : > { %v2752_v41 = vsel %vm2751_vm10, %v3797_v33, %v2748_v18  ;;  %v2802_v43 = vmul.f32 %v3801_v4, %v2719_v15 }
 0x6b3   : > { %v2757_v27 = vsel %vm2754_vm13, %v2756_v31, %v2752_v41 }
 0x6b4   : > { %v3803_v46 = vpop.eup %3802  ;;  %v2800_v55 = vmul.f32 %v2757_v27, %v5329_v61 }
 0x6b5   : > { %v3805_v35 = vpop.eup %3804  ;;  %v2807_v11 = vmul.f32 %v3803_v46, %v2782_v7 }
 0x6b6   : > { %v2804_v19 = vadd.f32 %v2802_v43, %v2800_v55  ;;  %v2785_v30 = vmul.f32 %v3805_v35, %v2768_v53  ;;  %vm2790_vm0 = vweird.f32 %v3805_v35 }
 0x6b7   : > { %v2823_v44 = vsel %vm2821_vm11, %v2807_v11, %v5334_v62  ;;  %vm2791_vm2 = vmor %vm2789_vm1, %vm2790_vm0 }
 0x6b8   : > { %2827 = vst [vmem:[#allocation3] sm:$0xff] %v2823_v44  ;;  %3806 = vtanh.f32 %v2804_v19  ;;  %v2826_v34 = vsel %vm2822_vm9, %v2804_v19, %v5329_v61  ;;  %v2786_v63 = vsub.f32 1.0, %v2785_v30 }
 0x6b9   : > { %2830 = vst [vmem:[#allocation4] sm:$0xff] %v2826_v34 }
 0x6ba   : > { %v2787_v52 = vmul.f32 %v3805_v35, %v2786_v63 }
 0x6bc   : > { %v2788_v39 = vadd.f32 %v3805_v35, %v2787_v52 }
 0x6be   : > { %v3807_v37 = vpop.eup %3806  ;;  %v2792_v28 = vsel %vm2791_vm2, %v3805_v35, %v2788_v39 }
 0x6bf   : > { %v2797_v24 = vsel %vm2794_vm3, %v2796_v22, %v2792_v28 }
 0x6c0   : > { %v2808_v62 = vmul.f32 %v3807_v37, %v2797_v24 }
 0x6c2   : > { %v2824_v20 = vsel %vm2822_vm9, %v2808_v62, %v5338_v56 }
 0x6c3   : > { %2828 = vst [vmem:[#allocation3 + $0x8] sm:$0xff] %v2824_v20 }
 0x6c4 PF: > { %p3332_p11 = scmp.ne.s32.totalorder %s3980_s29, 1 }
 0x6c6   : > { %2834 = sbr.rel (%p3332_p11) target bundleno = 1742 (0x6ce), region = 64 }
 0x6cb   : > { %v2835_v61 = vld [vmem:[#allocation3] sm:$0xff]  ;;  %v2836_v57 = vld [vmem:[#allocation3 + $0x8] sm:$0xff] }
 0x6cc   : > { %2837 = vst [vmem:[%s4215_s3] sm:$0xff] %v2835_v61 }
 0x6cd   : > { %2838 = vst [vmem:[%s4215_s3 + $0x8] sm:$0xff] %v2836_v57 }
 0x6ce PF: > { %s3411_s7 = sshll.u32 %s3984_s0, 4  ;;  %s2852_s25 = sshll.u32 %s4215_s3, 4  ;;  %s2853_s25 = int_to_ptr.vmem [resolvable:$true] %s2852_s25 }
 0x6cf   : > { %s2851_s19 = scalar_lea.hbm %s5473_s6, %s3411_s7  ;;  %s2840_s18 = scalar_lea.sflag [#allocation9], %s335_s30 }
 0x6d0   : > { %s2854_s29 = sshll.u32 %s2851_s19, 4  ;;  %s3890_s0 = scalar_lea.hbm %s5473_s6, 32  ;;  %s2855_s29 = int_to_ptr.hbm [resolvable:$true] %s2854_s29 }
 0x6d1   : > { %s3884_s16 = sshra.s32 %s2855_s29, 4  ;;  %s3885_s16 = int_to_ptr.hbm [resolvable:$true] %s3884_s16 }
 0x6d2   : > { %s3886_s13 = scalar_lea.hbm %s3885_s16, 16  ;;  %p3891_p2 = scmp.lt.s32.totalorder %s3885_s16, %s5473_s6 }
 0x6d3   : > { %p3887_p13 = scmp.ne.s32.totalorder %s3885_s16, %s3886_s13  ;;  %p3892_p5 = scmp.lt.s32.totalorder %s3890_s0, %s3886_s13 }
 0x6d5   : > { %p3888_p0 = pnand %p3887_p13, %p4138_p12  ;;  %p3893_p8 = por %p3892_p5, %p3891_p2 }
 0x6d7   : > { %p3889_p1 = pneg %p3888_p0 }
 0x6d9   : > { %p3894_p9 = pnand %p3893_p8, %p3889_p1 }
 0x6db   : > { %3897 = shalt.err (!%p3894_p9)
}
 0x6dc   : > { %s4010_s30 = smov 128   ;;  %s4011_s3 = smov 8  }
 0x6dd   : > { %3429 = dma.vmem_to_hbm [thread:$0]  (%p4138_p12), %s2853_s25, 256, %s2855_s29, %s2840_s18, %s4010_s30, %s4010_s30, %s4011_s3  }
 0x6de PF: > { %p3446_p10 = scmp.ge.s32.totalorder %s3996_s8, 2  ;;  %s2869_s26 = sand.u32 1, %s3956_s23  }
 0x6df   : > { %s2870_s10 = scalar_lea.sflag [#allocation9], %s2869_s26 }
 0x6e0   : > { %p3439_p3 = pnand %p3446_p10, %p4152_p4 }
 0x6e2   : > { %p3440_p7 = pneg %p3439_p3 }
 0x6e4   : > { %3951 = dma.done.wait (%p3440_p7), %s2870_s10, 256  }
 0x6e5   : > { %3953 = vsyncadd (%p3440_p7), %s2870_s10, 4294967040  ;;  %s24_s8 = sadd.s32 1, %s3996_s8   ;;  %s5728_s14 = sld [smem:[#allocation20_spill]] }
 0x6e6   : > { %p21_p6 = scmp.ge.s32.totalorder %s24_s8, 6   ;;  %s5729_s25 = sld [smem:[#allocation25_spill]] }
 0x6e7   : > { %s5730_s21 = sld [smem:[#allocation26_spill]]  ;;  %s5735_s23 = smov %s3960_s24 }
 0x6e8   : > { %s5731_s29 = sld [smem:[#allocation21_spill]]  ;;  %s5737_s26 = smov %s3972_s27 }
 0x6e9   : > { %s5732_s0 = sld [smem:[#allocation22_spill]]  ;;  %s5738_s27 = smov %s3976_s28 }
 0x6ea   : > { %s5733_s30 = sld [smem:[#allocation23_spill]]  ;;  %23 = sbr.rel (!%p21_p6) target bundleno = 14 (0xe), region = 120 }
 0x6eb   : > { %s5734_s7 = sld [smem:[#allocation24_spill]]  ;;  %s5736_s24 = smov %s5728_s14 }
 0x6ed   : > { %s5739_s28 = smov %s5730_s21 }
 0x6ef   :  { %2876 = vsyncpa [#allocation8], 1 }
 0x6f0   :  { %2878 = vsyncpa [#allocation8 + $0x1], 1 }
 0x6f1   :  { %2879 = vsyncpa [#allocation11], 1 }
 0x6f2   :  { %2880 = vsyncpa [#allocation9], 1 }
 0x6f3   :  { %2882 = vsyncpa [#allocation9 + $0x1], 1 }

</bundles_post_ra>
